<compile_context>
chip_gen: v6e
topology: v6e:2x2x1
jax: 0.10.0
libtpu: 0.0.40
codegen_flags: <defaults>
</compile_context>

<pallas_src>
import functools

import jax
import jax.numpy as jnp
from jax.experimental import pallas as pl
from jax.experimental.pallas import tpu as pltpu

# Make the pure-JAX reference use f32-precision matmuls so it matches the
# kernel's f32 MXU accumulation.
jax.config.update("jax_default_matmul_precision", "highest")


def _pick_tile(requested, dim, align):
    """Tile size satisfying TPU block constraints without wrapper-side padding.

    If the requested tile covers the whole dimension, use the full dimension
    (a full-dim block is exempt from the (8,128) divisibility rule).  Otherwise
    round the tile down to the alignment; Pallas handles the partial edge tile.
    """
    if requested >= dim:
        return dim
    return max(align, (requested // align) * align)


# --------------------------------------------------------------------------
# Stage 1: row-strip projection + LeakyReLU + L2-normalize + IMC factor.
# --------------------------------------------------------------------------
def _factor_kernel(x_ref, wk_ref, bk_ref, wf_ref, bf_ref, wimc_ref, out_ref):
    f32 = jnp.float32
    h = jnp.dot(x_ref[...], wk_ref[...], preferred_element_type=f32) + bk_ref[...]
    # concat([h, h], 1) @ W == h @ (W[:H] + W[H:]); weight pre-folded in wrapper.
    f = jnp.dot(h, wf_ref[...], preferred_element_type=f32) + bf_ref[...]
    # LeakyReLU (default negative_slope = 0.01).
    f = jnp.where(f >= 0, f, 0.01 * f)
    # F.normalize: x / max(||x||, 1e-12) == x * rsqrt(max(||x||^2, 1e-24)).
    f = f * jax.lax.rsqrt(jnp.maximum(jnp.sum(f * f, axis=1, keepdims=True), 1e-24))
    out_ref[...] = jnp.dot(f, wimc_ref[...], preferred_element_type=f32)


def _compute_factor(x, w_kge, b_kge, w_fc, b_fc, w_imc, *, rows_per_step=1024):
    n, d_in = x.shape
    k = w_imc.shape[1]
    tr = _pick_tile(rows_per_step, n, 8)
    grid = (pl.cdiv(n, tr),)

    def _full(arr):
        nd = arr.ndim
        return pl.BlockSpec(arr.shape, lambda r, _nd=nd: (0,) * _nd)

    return pl.pallas_call(
        _factor_kernel,
        out_shape=jax.ShapeDtypeStruct((n, k), jnp.float32),
        grid=grid,
        in_specs=[
            pl.BlockSpec((tr, d_in), lambda r: (r, 0)),   # embedding row strip
            _full(w_kge), _full(b_kge),                   # resident weights / biases
            _full(w_fc), _full(b_fc), _full(w_imc),
        ],
        out_specs=pl.BlockSpec((tr, k), lambda r: (r, 0)),
        compiler_params=pltpu.CompilerParams(
            dimension_semantics=("parallel",)),
    )(x, w_kge, b_kge, w_fc, b_fc, w_imc)


# --------------------------------------------------------------------------
# Stage 2: tiled CPI reconstruction + masked squared-error loss.
# --------------------------------------------------------------------------
def _rec_loss_kernel(a_ref, b_ref, cpi_ref, mask_ref, rec_ref, loss_ref,
                     *, tm, tn, n_c, n_p):
    i = pl.program_id(0)
    j = pl.program_id(1)

    # a/b are fully VMEM-resident; slice the current strips in-kernel.
    a = a_ref[pl.ds(pl.multiple_of(i * tm, tm), tm), :]
    b = b_ref[pl.ds(pl.multiple_of(j * tn, tn), tn), :]

    # rec tile = a (tm, k) @ b (tn, k)^T as a trans-B dot_general (no transpose).
    rec = jax.lax.dot_general(
        a, b, dimension_numbers=(((1,), (1,)), ((), ())),
        preferred_element_type=jnp.float32)
    rec_ref[...] = rec

    # CPI / mask stream in their native (possibly narrow) dtypes; cast here.
    diff = mask_ref[...].astype(jnp.float32) * (rec - cpi_ref[...].astype(jnp.float32))

    # In-kernel bounds mask for partial edge tiles (unpadded inputs).
    row = jax.lax.broadcasted_iota(jnp.int32, (tm, 1), 0) + i * tm
    col = jax.lax.broadcasted_iota(jnp.int32, (1, tn), 1) + j * tn
    valid = jnp.logical_and(row < n_c, col < n_p)
    partial = jnp.sum(jnp.where(valid, diff * diff, 0.0))

    # Per-row-strip partial loss, resident across the (sequential) j axis only.
    @pl.when(j == 0)
    def _():
        loss_ref[...] = jnp.zeros_like(loss_ref)

    loss_ref[...] += partial


# --------------------------------------------------------------------------
# Wrapper
# --------------------------------------------------------------------------
def pna_imc_forward(params, compound_embedding, protein_embedding, cpi, cpi_mask,
                    *, tm=512, tn=1024, stage1_rows=1024):
    """Returns (CPI_reconstruct_loss, CPI_reconstruct)."""
    n_c = compound_embedding.shape[0]
    n_p = protein_embedding.shape[0]
    h = params["W_kge_c"].shape[1]
    k = params["W0p"].shape[1]

    # Fold the row-wise self-concat into the final-FC weights (exact algebra).
    w_fc_c = params["W_fc_c"][:h] + params["W_fc_c"][h:]
    w_fc_p = params["W_fc_p"][:h] + params["W_fc_p"][h:]

    a = _compute_factor(compound_embedding, params["W_kge_c"], params["b_kge_c"],
                        w_fc_c, params["b_fc_c"], params["W0p"],
                        rows_per_step=stage1_rows)
    b = _compute_factor(protein_embedding, params["W_kge_p"], params["b_kge_p"],
                        w_fc_p, params["b_fc_p"], params["W1p"],
                        rows_per_step=stage1_rows)

    tm = _pick_tile(tm, n_c, 8)      # sublane tile (multiple of 8 or full dim)
    tn = _pick_tile(tn, n_p, 128)    # lane tile    (multiple of 128 or full dim)
    grid_m = pl.cdiv(n_c, tm)
    grid_n = pl.cdiv(n_p, tn)

    # a/b are tiny (n x k); pad them to the tile multiple so the in-kernel
    # pl.ds strip slices never read out of bounds.  (The big CPI / mask / rec
    # matrices are NOT padded — edge tiles are masked in-kernel.)
    a_pad = jnp.pad(a, ((0, grid_m * tm - n_c), (0, 0)))
    b_pad = jnp.pad(b, ((0, grid_n * tn - n_p), (0, 0)))

    kernel = functools.partial(_rec_loss_kernel, tm=tm, tn=tn, n_c=n_c, n_p=n_p)
    rec, loss_parts = pl.pallas_call(
        kernel,
        out_shape=(
            jax.ShapeDtypeStruct((n_c, n_p), jnp.float32),        # CPI_reconstruct
            jax.ShapeDtypeStruct((grid_m, 8, 128), jnp.float32),  # per-strip loss partials
        ),
        grid=(grid_m, grid_n),
        in_specs=[
            pl.BlockSpec(a_pad.shape, lambda i, j: (0, 0)),       # a (VMEM resident)
            pl.BlockSpec(b_pad.shape, lambda i, j: (0, 0)),       # b (VMEM resident)
            pl.BlockSpec((tm, tn), lambda i, j: (i, j)),          # CPI tile (native dtype)
            pl.BlockSpec((tm, tn), lambda i, j: (i, j)),          # mask tile (native dtype)
        ],
        out_specs=(
            pl.BlockSpec((tm, tn), lambda i, j: (i, j)),          # rec tile
            pl.BlockSpec((1, 8, 128), lambda i, j: (i, 0, 0)),    # loss partial per i-strip
        ),
        compiler_params=pltpu.CompilerParams(
            # i-strips are independent (per-strip loss partials) -> parallel for
            # megacore; j is the sequential reduction over the loss accumulator.
            dimension_semantics=("parallel", "arbitrary"),
            vmem_limit_bytes=32 * 1024 * 1024),
    )(a_pad, b_pad, cpi, cpi_mask)

    loss = jnp.sum(loss_parts[:, 0, 0])
    return loss, rec


# --------------------------------------------------------------------------
# Reference + test harness
# --------------------------------------------------------------------------
def _xavier_uniform(key, shape, dtype=jnp.float32):
    fan_in, fan_out = shape[0], shape[1]
    limit = (6.0 / (fan_in + fan_out)) ** 0.5
    return jax.random.uniform(key, shape, dtype, minval=-limit, maxval=limit)


def _reference_forward(params, ce, pe, cpi, mask):
    compound = ce @ params["W_kge_c"] + params["b_kge_c"]
    protein = pe @ params["W_kge_p"] + params["b_kge_p"]
    comp2 = jnp.concatenate([compound, compound], axis=1)
    prot2 = jnp.concatenate([protein, protein], axis=1)
    fc = comp2 @ params["W_fc_c"] + params["b_fc_c"]
    fp = prot2 @ params["W_fc_p"] + params["b_fc_p"]
    fc = jnp.where(fc >= 0, fc, 0.01 * fc)
    fp = jnp.where(fp >= 0, fp, 0.01 * fp)
    fc = fc / jnp.maximum(jnp.linalg.norm(fc, axis=1, keepdims=True), 1e-12)
    fp = fp / jnp.maximum(jnp.linalg.norm(fp, axis=1, keepdims=True), 1e-12)
    rec = (fc @ params["W0p"]) @ (fp @ params["W1p"]).T
    tmp = mask * (rec - cpi)
    return jnp.sum(tmp * tmp), rec


if __name__ == "__main__":
    # Small shapes consistent with the module; tiles chosen so stage 2 runs a
    # 2x2 grid with partial edge tiles (exercises the in-kernel bounds masks).
    n_compound, n_protein = 100, 200
    dim_kge_compound, dim_kge_protein = 64, 96
    dim_hidden = 32                        # pna_hidden_dim
    dim_compound_final, dim_protein_final = 16, 16
    dim_pred = 8                           # imc_k

    key = jax.random.PRNGKey(0)
    keys = jax.random.split(key, 10)

    # Deterministic parameter init (xavier-uniform for matrices, zeros for biases),
    # stored as (in, out) so the kernel does x @ W + b (same math as nn.Linear).
    params = {
        "W_kge_c": _xavier_uniform(keys[0], (dim_kge_compound, dim_hidden)),
        "b_kge_c": jnp.zeros((1, dim_hidden), jnp.float32),
        "W_kge_p": _xavier_uniform(keys[1], (dim_kge_protein, dim_hidden)),
        "b_kge_p": jnp.zeros((1, dim_hidden), jnp.float32),
        "W_fc_c": _xavier_uniform(keys[2], (2 * dim_hidden, dim_compound_final)),
        "b_fc_c": jnp.zeros((1, dim_compound_final), jnp.float32),
        "W_fc_p": _xavier_uniform(keys[3], (2 * dim_hidden, dim_protein_final)),
        "b_fc_p": jnp.zeros((1, dim_protein_final), jnp.float32),
        "W0p": _xavier_uniform(keys[4], (dim_compound_final, dim_pred)),
        "W1p": _xavier_uniform(keys[5], (dim_protein_final, dim_pred)),
    }

    compound_embedding = jax.random.normal(keys[6], (n_compound, dim_kge_compound), jnp.float32)
    protein_embedding = jax.random.normal(keys[7], (n_protein, dim_kge_protein), jnp.float32)
    cpi = (jax.random.uniform(keys[8], (n_compound, n_protein)) > 0.5).astype(jnp.float32)
    # Mask streams at a narrow dtype and is cast to f32 inside the kernel.
    cpi_mask = (jax.random.uniform(keys[9], (n_compound, n_protein)) > 0.3).astype(jnp.int8)

    # Small tiles here so the toy problem runs a multi-step grid with partial
    # edge tiles; at real sizes use the defaults (tm=512, tn=1024, rows=1024).
    fwd = jax.jit(functools.partial(pna_imc_forward, tm=64, tn=128, stage1_rows=64))
    loss, rec = fwd(params, compound_embedding, protein_embedding, cpi, cpi_mask)
    jax.block_until_ready((loss, rec))

    ref_loss, ref_rec = _reference_forward(params, compound_embedding, protein_embedding,
                                           cpi, cpi_mask.astype(jnp.float32))
    assert rec.shape == (n_compound, n_protein)
    assert jnp.allclose(rec, ref_rec, atol=2e-5, rtol=1e-4), "CPI_reconstruct mismatch"
    assert jnp.allclose(loss, ref_loss, atol=1e-2, rtol=1e-4), "loss mismatch"

    print("KERNEL_OK")
</pallas_src>

<mosaic_0001>
module attributes {stable_mosaic.version = 11 : i64} {
  func.func @_factor_kernel(%arg0: i32, %arg1: memref<64x64xf32, #tpu.memory_space<vmem>>, %arg2: memref<64x32xf32, #tpu.memory_space<vmem>>, %arg3: memref<1x32xf32, #tpu.memory_space<vmem>>, %arg4: memref<32x16xf32, #tpu.memory_space<vmem>>, %arg5: memref<1x16xf32, #tpu.memory_space<vmem>>, %arg6: memref<16x8xf32, #tpu.memory_space<vmem>>, %arg7: memref<64x8xf32, #tpu.memory_space<vmem>>) attributes {dimension_semantics = [#tpu.dimension_semantics<parallel>], iteration_bounds = array<i64: 2>, scalar_prefetch = 0 : i64, scratch_operands = 0 : i64, tpu.core_type = #tpu.core_type<tc>, window_params = [{transform_indices = @transform_0, window_bounds = array<i64: 64, 64>}, {pipeline_mode = #tpu.pipeline_mode<synchronous>, transform_indices = @transform_1, window_bounds = array<i64: 64, 32>}, {pipeline_mode = #tpu.pipeline_mode<synchronous>, transform_indices = @transform_2, window_bounds = array<i64: 1, 32>}, {pipeline_mode = #tpu.pipeline_mode<synchronous>, transform_indices = @transform_3, window_bounds = array<i64: 32, 16>}, {pipeline_mode = #tpu.pipeline_mode<synchronous>, transform_indices = @transform_4, window_bounds = array<i64: 1, 16>}, {pipeline_mode = #tpu.pipeline_mode<synchronous>, transform_indices = @transform_5, window_bounds = array<i64: 16, 8>}, {transform_indices = @transform_6, window_bounds = array<i64: 64, 8>}]} {
    %c0 = arith.constant 0 : index
    %c0_0 = arith.constant 0 : index
    %0 = vector.load %arg1[%c0, %c0_0] : memref<64x64xf32, #tpu.memory_space<vmem>>, vector<64x64xf32>
    %c0_1 = arith.constant 0 : index
    %c0_2 = arith.constant 0 : index
    %1 = vector.load %arg2[%c0_1, %c0_2] : memref<64x32xf32, #tpu.memory_space<vmem>>, vector<64x32xf32>
    %cst = arith.constant dense<0.000000e+00> : vector<64x32xf32>
    %2 = tpu.matmul %0, %1, %cst {dimension_numbers = #tpu.dot_dimension_numbers<[1], [0], [0], [1], [0, 0, 1, 1], [], []>, precision = #tpu.contract_precision<fp32>} : vector<64x64xf32>, vector<64x32xf32>, vector<64x32xf32> -> vector<64x32xf32>
    %c0_3 = arith.constant 0 : index
    %c0_4 = arith.constant 0 : index
    %3 = vector.load %arg3[%c0_3, %c0_4] : memref<1x32xf32, #tpu.memory_space<vmem>>, vector<1x32xf32>
    %4 = vector.broadcast %3 : vector<1x32xf32> to vector<64x32xf32>
    %5 = arith.addf %2, %4 : vector<64x32xf32>
    %c0_5 = arith.constant 0 : index
    %c0_6 = arith.constant 0 : index
    %6 = vector.load %arg4[%c0_5, %c0_6] : memref<32x16xf32, #tpu.memory_space<vmem>>, vector<32x16xf32>
    %cst_7 = arith.constant dense<0.000000e+00> : vector<64x16xf32>
    %7 = tpu.matmul %5, %6, %cst_7 {dimension_numbers = #tpu.dot_dimension_numbers<[1], [0], [0], [1], [0, 0, 1, 1], [], []>, precision = #tpu.contract_precision<fp32>} : vector<64x32xf32>, vector<32x16xf32>, vector<64x16xf32> -> vector<64x16xf32>
    %c0_8 = arith.constant 0 : index
    %c0_9 = arith.constant 0 : index
    %8 = vector.load %arg5[%c0_8, %c0_9] : memref<1x16xf32, #tpu.memory_space<vmem>>, vector<1x16xf32>
    %9 = vector.broadcast %8 : vector<1x16xf32> to vector<64x16xf32>
    %10 = arith.addf %7, %9 : vector<64x16xf32>
    %cst_10 = arith.constant 0.000000e+00 : f32
    %11 = vector.broadcast %cst_10 : f32 to vector<64x16xf32>
    %12 = arith.cmpf oge, %10, %11 : vector<64x16xf32>
    %cst_11 = arith.constant 0.00999999977 : f32
    %13 = vector.broadcast %cst_11 : f32 to vector<64x16xf32>
    %14 = arith.mulf %13, %10 : vector<64x16xf32>
    %15 = arith.select %12, %10, %14 : vector<64x16xi1>, vector<64x16xf32>
    %16 = arith.mulf %15, %15 : vector<64x16xf32>
    %cst_12 = arith.constant dense<0.000000e+00> : vector<64xf32>
    %17 = vector.multi_reduction <add>, %16, %cst_12 [1] : vector<64x16xf32> to vector<64xf32>
    %18 = vector.shape_cast %17 : vector<64xf32> to vector<64x1xf32>
    %cst_13 = arith.constant 1.000000e-24 : f32
    %19 = vector.broadcast %cst_13 : f32 to vector<64x1xf32>
    %20 = arith.maximumf %18, %19 : vector<64x1xf32>
    %21 = math.rsqrt %20 : vector<64x1xf32>
    %22 = vector.broadcast %21 : vector<64x1xf32> to vector<64x16xf32>
    %23 = arith.mulf %15, %22 : vector<64x16xf32>
    %c0_14 = arith.constant 0 : index
    %c0_15 = arith.constant 0 : index
    %24 = vector.load %arg6[%c0_14, %c0_15] : memref<16x8xf32, #tpu.memory_space<vmem>>, vector<16x8xf32>
    %cst_16 = arith.constant dense<0.000000e+00> : vector<64x8xf32>
    %25 = tpu.matmul %23, %24, %cst_16 {dimension_numbers = #tpu.dot_dimension_numbers<[1], [0], [0], [1], [0, 0, 1, 1], [], []>, precision = #tpu.contract_precision<fp32>} : vector<64x16xf32>, vector<16x8xf32>, vector<64x8xf32> -> vector<64x8xf32>
    %c0_17 = arith.constant 0 : index
    %c0_18 = arith.constant 0 : index
    %26 = vector.load %arg7[%c0_17, %c0_18] : memref<64x8xf32, #tpu.memory_space<vmem>>, vector<64x8xf32>
    tpu.vector_store %arg7[%c0_17, %c0_18], %25 {strides = array<i32>} : memref<64x8xf32, #tpu.memory_space<vmem>>, vector<64x8xf32>,
    return
  }
  func.func @transform_0(%arg0: i32) -> (i32, i32) {
    %c0_i32 = arith.constant 0 : i32
    %c0_i32_0 = arith.constant 0 : i32
    return %arg0, %c0_i32 : i32, i32
  }
  func.func @transform_1(%arg0: i32) -> (i32, i32) {
    %c0_i32 = arith.constant 0 : i32
    %c0_i32_0 = arith.constant 0 : i32
    %c0_i32_1 = arith.constant 0 : i32
    return %c0_i32, %c0_i32_0 : i32, i32
  }
  func.func @transform_2(%arg0: i32) -> (i32, i32) {
    %c0_i32 = arith.constant 0 : i32
    %c0_i32_0 = arith.constant 0 : i32
    %c0_i32_1 = arith.constant 0 : i32
    return %c0_i32, %c0_i32_0 : i32, i32
  }
  func.func @transform_3(%arg0: i32) -> (i32, i32) {
    %c0_i32 = arith.constant 0 : i32
    %c0_i32_0 = arith.constant 0 : i32
    %c0_i32_1 = arith.constant 0 : i32
    return %c0_i32, %c0_i32_0 : i32, i32
  }
  func.func @transform_4(%arg0: i32) -> (i32, i32) {
    %c0_i32 = arith.constant 0 : i32
    %c0_i32_0 = arith.constant 0 : i32
    %c0_i32_1 = arith.constant 0 : i32
    return %c0_i32, %c0_i32_0 : i32, i32
  }
  func.func @transform_5(%arg0: i32) -> (i32, i32) {
    %c0_i32 = arith.constant 0 : i32
    %c0_i32_0 = arith.constant 0 : i32
    %c0_i32_1 = arith.constant 0 : i32
    return %c0_i32, %c0_i32_0 : i32, i32
  }
  func.func @transform_6(%arg0: i32) -> (i32, i32) {
    %c0_i32 = arith.constant 0 : i32
    %c0_i32_0 = arith.constant 0 : i32
    return %arg0, %c0_i32 : i32, i32
  }
}

module attributes {stable_mosaic.version = 11 : i64} {
  func.func @_factor_kernel(%arg0: i32, %arg1: memref<64x96xf32, #tpu.memory_space<vmem>>, %arg2: memref<96x32xf32, #tpu.memory_space<vmem>>, %arg3: memref<1x32xf32, #tpu.memory_space<vmem>>, %arg4: memref<32x16xf32, #tpu.memory_space<vmem>>, %arg5: memref<1x16xf32, #tpu.memory_space<vmem>>, %arg6: memref<16x8xf32, #tpu.memory_space<vmem>>, %arg7: memref<64x8xf32, #tpu.memory_space<vmem>>) attributes {dimension_semantics = [#tpu.dimension_semantics<parallel>], iteration_bounds = array<i64: 4>, scalar_prefetch = 0 : i64, scratch_operands = 0 : i64, tpu.core_type = #tpu.core_type<tc>, window_params = [{transform_indices = @transform_0, window_bounds = array<i64: 64, 96>}, {pipeline_mode = #tpu.pipeline_mode<synchronous>, transform_indices = @transform_1, window_bounds = array<i64: 96, 32>}, {pipeline_mode = #tpu.pipeline_mode<synchronous>, transform_indices = @transform_2, window_bounds = array<i64: 1, 32>}, {pipeline_mode = #tpu.pipeline_mode<synchronous>, transform_indices = @transform_3, window_bounds = array<i64: 32, 16>}, {pipeline_mode = #tpu.pipeline_mode<synchronous>, transform_indices = @transform_4, window_bounds = array<i64: 1, 16>}, {pipeline_mode = #tpu.pipeline_mode<synchronous>, transform_indices = @transform_5, window_bounds = array<i64: 16, 8>}, {transform_indices = @transform_6, window_bounds = array<i64: 64, 8>}]} {
    %c0 = arith.constant 0 : index
    %c0_0 = arith.constant 0 : index
    %0 = vector.load %arg1[%c0, %c0_0] : memref<64x96xf32, #tpu.memory_space<vmem>>, vector<64x96xf32>
    %c0_1 = arith.constant 0 : index
    %c0_2 = arith.constant 0 : index
    %1 = vector.load %arg2[%c0_1, %c0_2] : memref<96x32xf32, #tpu.memory_space<vmem>>, vector<96x32xf32>
    %cst = arith.constant dense<0.000000e+00> : vector<64x32xf32>
    %2 = tpu.matmul %0, %1, %cst {dimension_numbers = #tpu.dot_dimension_numbers<[1], [0], [0], [1], [0, 0, 1, 1], [], []>, precision = #tpu.contract_precision<fp32>} : vector<64x96xf32>, vector<96x32xf32>, vector<64x32xf32> -> vector<64x32xf32>
    %c0_3 = arith.constant 0 : index
    %c0_4 = arith.constant 0 : index
    %3 = vector.load %arg3[%c0_3, %c0_4] : memref<1x32xf32, #tpu.memory_space<vmem>>, vector<1x32xf32>
    %4 = vector.broadcast %3 : vector<1x32xf32> to vector<64x32xf32>
    %5 = arith.addf %2, %4 : vector<64x32xf32>
    %c0_5 = arith.constant 0 : index
    %c0_6 = arith.constant 0 : index
    %6 = vector.load %arg4[%c0_5, %c0_6] : memref<32x16xf32, #tpu.memory_space<vmem>>, vector<32x16xf32>
    %cst_7 = arith.constant dense<0.000000e+00> : vector<64x16xf32>
    %7 = tpu.matmul %5, %6, %cst_7 {dimension_numbers = #tpu.dot_dimension_numbers<[1], [0], [0], [1], [0, 0, 1, 1], [], []>, precision = #tpu.contract_precision<fp32>} : vector<64x32xf32>, vector<32x16xf32>, vector<64x16xf32> -> vector<64x16xf32>
    %c0_8 = arith.constant 0 : index
    %c0_9 = arith.constant 0 : index
    %8 = vector.load %arg5[%c0_8, %c0_9] : memref<1x16xf32, #tpu.memory_space<vmem>>, vector<1x16xf32>
    %9 = vector.broadcast %8 : vector<1x16xf32> to vector<64x16xf32>
    %10 = arith.addf %7, %9 : vector<64x16xf32>
    %cst_10 = arith.constant 0.000000e+00 : f32
    %11 = vector.broadcast %cst_10 : f32 to vector<64x16xf32>
    %12 = arith.cmpf oge, %10, %11 : vector<64x16xf32>
    %cst_11 = arith.constant 0.00999999977 : f32
    %13 = vector.broadcast %cst_11 : f32 to vector<64x16xf32>
    %14 = arith.mulf %13, %10 : vector<64x16xf32>
    %15 = arith.select %12, %10, %14 : vector<64x16xi1>, vector<64x16xf32>
    %16 = arith.mulf %15, %15 : vector<64x16xf32>
    %cst_12 = arith.constant dense<0.000000e+00> : vector<64xf32>
    %17 = vector.multi_reduction <add>, %16, %cst_12 [1] : vector<64x16xf32> to vector<64xf32>
    %18 = vector.shape_cast %17 : vector<64xf32> to vector<64x1xf32>
    %cst_13 = arith.constant 1.000000e-24 : f32
    %19 = vector.broadcast %cst_13 : f32 to vector<64x1xf32>
    %20 = arith.maximumf %18, %19 : vector<64x1xf32>
    %21 = math.rsqrt %20 : vector<64x1xf32>
    %22 = vector.broadcast %21 : vector<64x1xf32> to vector<64x16xf32>
    %23 = arith.mulf %15, %22 : vector<64x16xf32>
    %c0_14 = arith.constant 0 : index
    %c0_15 = arith.constant 0 : index
    %24 = vector.load %arg6[%c0_14, %c0_15] : memref<16x8xf32, #tpu.memory_space<vmem>>, vector<16x8xf32>
    %cst_16 = arith.constant dense<0.000000e+00> : vector<64x8xf32>
    %25 = tpu.matmul %23, %24, %cst_16 {dimension_numbers = #tpu.dot_dimension_numbers<[1], [0], [0], [1], [0, 0, 1, 1], [], []>, precision = #tpu.contract_precision<fp32>} : vector<64x16xf32>, vector<16x8xf32>, vector<64x8xf32> -> vector<64x8xf32>
    %c0_17 = arith.constant 0 : index
    %c0_18 = arith.constant 0 : index
    %26 = vector.load %arg7[%c0_17, %c0_18] : memref<64x8xf32, #tpu.memory_space<vmem>>, vector<64x8xf32>
    tpu.vector_store %arg7[%c0_17, %c0_18], %25 {strides = array<i32>} : memref<64x8xf32, #tpu.memory_space<vmem>>, vector<64x8xf32>,
    return
  }
  func.func @transform_0(%arg0: i32) -> (i32, i32) {
    %c0_i32 = arith.constant 0 : i32
    %c0_i32_0 = arith.constant 0 : i32
    return %arg0, %c0_i32 : i32, i32
  }
  func.func @transform_1(%arg0: i32) -> (i32, i32) {
    %c0_i32 = arith.constant 0 : i32
    %c0_i32_0 = arith.constant 0 : i32
    %c0_i32_1 = arith.constant 0 : i32
    return %c0_i32, %c0_i32_0 : i32, i32
  }
  func.func @transform_2(%arg0: i32) -> (i32, i32) {
    %c0_i32 = arith.constant 0 : i32
    %c0_i32_0 = arith.constant 0 : i32
    %c0_i32_1 = arith.constant 0 : i32
    return %c0_i32, %c0_i32_0 : i32, i32
  }
  func.func @transform_3(%arg0: i32) -> (i32, i32) {
    %c0_i32 = arith.constant 0 : i32
    %c0_i32_0 = arith.constant 0 : i32
    %c0_i32_1 = arith.constant 0 : i32
    return %c0_i32, %c0_i32_0 : i32, i32
  }
  func.func @transform_4(%arg0: i32) -> (i32, i32) {
    %c0_i32 = arith.constant 0 : i32
    %c0_i32_0 = arith.constant 0 : i32
    %c0_i32_1 = arith.constant 0 : i32
    return %c0_i32, %c0_i32_0 : i32, i32
  }
  func.func @transform_5(%arg0: i32) -> (i32, i32) {
    %c0_i32 = arith.constant 0 : i32
    %c0_i32_0 = arith.constant 0 : i32
    %c0_i32_1 = arith.constant 0 : i32
    return %c0_i32, %c0_i32_0 : i32, i32
  }
  func.func @transform_6(%arg0: i32) -> (i32, i32) {
    %c0_i32 = arith.constant 0 : i32
    %c0_i32_0 = arith.constant 0 : i32
    return %arg0, %c0_i32 : i32, i32
  }
}

module attributes {stable_mosaic.version = 11 : i64} {
  func.func @_rec_loss_kernel(%arg0: i32, %arg1: i32, %arg2: memref<128x8xf32, #tpu.memory_space<vmem>>, %arg3: memref<256x8xf32, #tpu.memory_space<vmem>>, %arg4: memref<64x128xf32, #tpu.memory_space<vmem>>, %arg5: memref<64x128xi8, #tpu.memory_space<vmem>>, %arg6: memref<64x128xf32, #tpu.memory_space<vmem>>, %arg7: memref<1x8x128xf32, #tpu.memory_space<vmem>>) attributes {dimension_semantics = [#tpu.dimension_semantics<parallel>, #tpu.dimension_semantics<arbitrary>], iteration_bounds = array<i64: 2, 2>, scalar_prefetch = 0 : i64, scratch_operands = 0 : i64, tpu.core_type = #tpu.core_type<tc>, window_params = [{pipeline_mode = #tpu.pipeline_mode<synchronous>, transform_indices = @transform_0, window_bounds = array<i64: 128, 8>}, {pipeline_mode = #tpu.pipeline_mode<synchronous>, transform_indices = @transform_1, window_bounds = array<i64: 256, 8>}, {transform_indices = @transform_2, window_bounds = array<i64: 64, 128>}, {transform_indices = @transform_3, window_bounds = array<i64: 64, 128>}, {transform_indices = @transform_4, window_bounds = array<i64: 64, 128>}, {transform_indices = @transform_5, window_bounds = array<i64: 1, 8, 128>}]} {
    %c64_i32 = arith.constant 64 : i32
    %0 = arith.muli %arg0, %c64_i32 : i32
    %1 = tpu.assume_multiple %0, 64 : i32
    %2 = arith.index_cast %1 : i32 to index
    %c0 = arith.constant 0 : index
    %3 = vector.load %arg2[%2, %c0] : memref<128x8xf32, #tpu.memory_space<vmem>>, vector<64x8xf32>
    %c128_i32 = arith.constant 128 : i32
    %4 = arith.muli %arg1, %c128_i32 : i32
    %5 = tpu.assume_multiple %4, 128 : i32
    %6 = arith.index_cast %5 : i32 to index
    %c0_0 = arith.constant 0 : index
    %7 = vector.load %arg3[%6, %c0_0] : memref<256x8xf32, #tpu.memory_space<vmem>>, vector<128x8xf32>
    %cst = arith.constant dense<0.000000e+00> : vector<64x128xf32>
    %8 = tpu.matmul %3, %7, %cst {dimension_numbers = #tpu.dot_dimension_numbers<[1], [1], [0], [0], [0, 0, 1, 0], [], []>, precision = #tpu.contract_precision<fp32>} : vector<64x8xf32>, vector<128x8xf32>, vector<64x128xf32> -> vector<64x128xf32>
    %c0_1 = arith.constant 0 : index
    %c0_2 = arith.constant 0 : index
    %9 = vector.load %arg6[%c0_1, %c0_2] : memref<64x128xf32, #tpu.memory_space<vmem>>, vector<64x128xf32>
    tpu.vector_store %arg6[%c0_1, %c0_2], %8 {strides = array<i32>} : memref<64x128xf32, #tpu.memory_space<vmem>>, vector<64x128xf32>,
    %c0_3 = arith.constant 0 : index
    %c0_4 = arith.constant 0 : index
    %10 = vector.load %arg5[%c0_3, %c0_4] : memref<64x128xi8, #tpu.memory_space<vmem>>, vector<64x128xi8>
    %11 = arith.sitofp %10 : vector<64x128xi8> to vector<64x128xf32>
    %c0_5 = arith.constant 0 : index
    %c0_6 = arith.constant 0 : index
    %12 = vector.load %arg4[%c0_5, %c0_6] : memref<64x128xf32, #tpu.memory_space<vmem>>, vector<64x128xf32>
    %13 = arith.subf %8, %12 : vector<64x128xf32>
    %14 = arith.mulf %11, %13 : vector<64x128xf32>
    %15 = tpu.iota {dimensions = array<i32: 0>} : vector<64x1xi32>
    %c64_i32_7 = arith.constant 64 : i32
    %16 = arith.muli %arg0, %c64_i32_7 : i32
    %17 = vector.broadcast %16 : i32 to vector<64x1xi32>
    %18 = arith.addi %15, %17 : vector<64x1xi32>
    %19 = tpu.iota {dimensions = array<i32: 1>} : vector<1x128xi32>
    %c128_i32_8 = arith.constant 128 : i32
    %20 = arith.muli %arg1, %c128_i32_8 : i32
    %21 = vector.broadcast %20 : i32 to vector<1x128xi32>
    %22 = arith.addi %19, %21 : vector<1x128xi32>
    %c100_i32 = arith.constant 100 : i32
    %23 = vector.broadcast %c100_i32 : i32 to vector<64x1xi32>
    %24 = arith.cmpi slt, %18, %23 : vector<64x1xi32>
    %c200_i32 = arith.constant 200 : i32
    %25 = vector.broadcast %c200_i32 : i32 to vector<1x128xi32>
    %26 = arith.cmpi slt, %22, %25 : vector<1x128xi32>
    %27 = vector.broadcast %24 : vector<64x1xi1> to vector<64x128xi1>
    %28 = vector.broadcast %26 : vector<1x128xi1> to vector<64x128xi1>
    %29 = arith.andi %27, %28 : vector<64x128xi1>
    %30 = arith.mulf %14, %14 : vector<64x128xf32>
    %cst_9 = arith.constant 0.000000e+00 : f32
    %31 = vector.broadcast %cst_9 : f32 to vector<64x128xf32>
    %32 = arith.select %29, %30, %31 : vector<64x128xi1>, vector<64x128xf32>
    %33 = vector.shape_cast %32 : vector<64x128xf32> to vector<1x64x128xf32>
    %cst_10 = arith.constant dense<0.000000e+00> : vector<1xf32>
    %34 = vector.multi_reduction <add>, %33, %cst_10 [1, 2] : vector<1x64x128xf32> to vector<1xf32>
    %35 = vector.shape_cast %34 : vector<1xf32> to vector<1x1x1xf32>
    %36 = vector.extract %35[0, 0, 0] : f32 from vector<1x1x1xf32>
    %c0_i32 = arith.constant 0 : i32
    %37 = arith.cmpi eq, %arg1, %c0_i32 : i32
    %38 = arith.extui %37 : i1 to i32
    %c0_i32_11 = arith.constant 0 : i32
    %39 = arith.cmpi ne, %38, %c0_i32_11 : i32
    scf.if %39 {
      %cst_18 = arith.constant 0.000000e+00 : f32
      %44 = vector.broadcast %cst_18 : f32 to vector<1x8x128xf32>
      %c0_19 = arith.constant 0 : index
      %c0_20 = arith.constant 0 : index
      %c0_21 = arith.constant 0 : index
      %45 = vector.load %arg7[%c0_19, %c0_20, %c0_21] : memref<1x8x128xf32, #tpu.memory_space<vmem>>, vector<1x8x128xf32>
      tpu.vector_store %arg7[%c0_19, %c0_20, %c0_21], %44 {strides = array<i32>} : memref<1x8x128xf32, #tpu.memory_space<vmem>>, vector<1x8x128xf32>,
    } else {
    }
    %c0_12 = arith.constant 0 : index
    %c0_13 = arith.constant 0 : index
    %c0_14 = arith.constant 0 : index
    %40 = vector.load %arg7[%c0_12, %c0_13, %c0_14] : memref<1x8x128xf32, #tpu.memory_space<vmem>>, vector<1x8x128xf32>
    %41 = vector.broadcast %36 : f32 to vector<1x8x128xf32>
    %42 = arith.addf %40, %41 : vector<1x8x128xf32>
    %c0_15 = arith.constant 0 : index
    %c0_16 = arith.constant 0 : index
    %c0_17 = arith.constant 0 : index
    %43 = vector.load %arg7[%c0_15, %c0_16, %c0_17] : memref<1x8x128xf32, #tpu.memory_space<vmem>>, vector<1x8x128xf32>
    tpu.vector_store %arg7[%c0_15, %c0_16, %c0_17], %42 {strides = array<i32>} : memref<1x8x128xf32, #tpu.memory_space<vmem>>, vector<1x8x128xf32>,
    return
  }
  func.func @transform_0(%arg0: i32, %arg1: i32) -> (i32, i32) {
    %c0_i32 = arith.constant 0 : i32
    %c0_i32_0 = arith.constant 0 : i32
    %c0_i32_1 = arith.constant 0 : i32
    return %c0_i32, %c0_i32_0 : i32, i32
  }
  func.func @transform_1(%arg0: i32, %arg1: i32) -> (i32, i32) {
    %c0_i32 = arith.constant 0 : i32
    %c0_i32_0 = arith.constant 0 : i32
    %c0_i32_1 = arith.constant 0 : i32
    return %c0_i32, %c0_i32_0 : i32, i32
  }
  func.func @transform_2(%arg0: i32, %arg1: i32) -> (i32, i32) {
    %c0_i32 = arith.constant 0 : i32
    return %arg0, %arg1 : i32, i32
  }
  func.func @transform_3(%arg0: i32, %arg1: i32) -> (i32, i32) {
    %c0_i32 = arith.constant 0 : i32
    return %arg0, %arg1 : i32, i32
  }
  func.func @transform_4(%arg0: i32, %arg1: i32) -> (i32, i32) {
    %c0_i32 = arith.constant 0 : i32
    return %arg0, %arg1 : i32, i32
  }
  func.func @transform_5(%arg0: i32, %arg1: i32) -> (i32, i32, i32) {
    %c0_i32 = arith.constant 0 : i32
    %c0_i32_0 = arith.constant 0 : i32
    %c0_i32_1 = arith.constant 0 : i32
    return %arg0, %c0_i32, %c0_i32_0 : i32, i32, i32
  }
}

</mosaic_0001>

<bundles_post_ra>
// kernel: pna_imc_forward.5
= control target key start
LH: loop header
LB: loop body
LE: loop exit
PB: predicated region body
PF: predicated region fallthrough
CT: control target
= control target key end

     0   :  { %s4193_s0 = inlined_call_operand.vmem [shape: f32[128,8], index: 0, kind: input, shape index: {}]   ;;  %s4194_s1 = inlined_call_operand.vmem [shape: f32[256,8], index: 1, kind: input, shape index: {}]   ;;  %s4195_s2 = inlined_call_operand.vmem [shape: f32[100,200], index: 2, kind: input, shape index: {}]   ;;  %s4196_s3 = inlined_call_operand.vmem [shape: s8[100,200], index: 3, kind: input, shape index: {}]   ;;  %s4197_s4 = inlined_call_operand.vmem [shape: f32[100,200], index: 4, kind: output, shape index: {0}]   ;;  %s4198_s5 = inlined_call_operand.vmem [shape: f32[2,8,128], index: 5, kind: output, shape index: {1}]  }
   0x1   :  { %4231 = sst [smem:[#allocation21_spill]] %s4195_s2 }
   0x2   :  { %s3206_s18 = smov 0   ;;  %s3208_s19 = smov 0  }
   0x3   :  { %s3210_s20 = smov 0   ;;  %s3212_s21 = smov 0  }
   0x4   :  { %s3214_s22 = smov 0   ;;  %s3216_s23 = smov 0  }
   0x5   :  { %s3218_s24 = smov 0  }
   0x6 LB: > { %s25_s25 = sadd.s32 1, %s3069_s22  ;;  %s28_s26 = sadd.s32 1, %s3073_s23  ;;  %s3077_s24 = sphi %s3218_s24, %s16_s24   ;;  %s3073_s23 = sphi %s3216_s23, %s4300_s23   ;;  %s3069_s22 = sphi %s3214_s22, %s4299_s22   ;;  %s3065_s21 = sphi %s3212_s21, %s4298_s21   ;;  %s3061_s20 = sphi %s3210_s20, %s4297_s20   ;;  %s3057_s19 = sphi %s3208_s19, %s4296_s19   ;;  %s3053_s18 = sphi %s3206_s18, %s4295_s18  }
   0x7   : > { %p26_p0 = scmp.ge.s32.totalorder %s25_s25, 2  ;;  %s2178_s27 = sadd.s32 4294967295, %s3077_s24  }
   0x8   : > { %p86_p1 = scmp.ne.s32.totalorder %s3057_s19, %s3053_s18  ;;  %p87_p2 = scmp.eq.s32.totalorder %s3077_s24, 0 }
   0x9   : > { %s4302_s25 = smov (%p26_p0, %s25_s25), 0  ;;  %s4304_s26 = smov (!%p26_p0, %s28_s26), %s3073_s23 }
   0xa   : > { %p30_p3 = scmp.ge.s32.totalorder %s4304_s26, 2  ;;  %p146_p4 = scmp.eq.s32.totalorder %s2178_s27, 3 }
   0xb   : > { %s75_s28 = ssub.s32 %s3069_s22, %s4302_s25  ;;  %p3252_p5 = por %p87_p2, %p86_p1 }
   0xc   : > { %s4306_s26 = smov (%p30_p3, %s4304_s26), 0  ;;  %p3258_p6 = por %p146_p4, %p86_p1 }
   0xd   : > { %4233 = sst [smem:[#allocation5_spill]] %s4306_s26  ;;  %s74_s6 = ssub.s32 %s3073_s23, %s4306_s26 }
   0xe   : > { %s76_s7 = sor.u32 %s75_s28, %s74_s6  ;;  %s79_s8 = sadd.s32 1, %s3057_s19 }
   0xf   : > { %p77_p7 = scmp.eq.s32.totalorder %s76_s7, 0  ;;  %p2181_p8 = scmp.ge.s32.totalorder %s3077_s24, 4 }
  0x11   : > { %s3266_s9 = scalar_select %p77_p7, %s3057_s19, %s79_s8  }
  0x12   : > { %200 = sbr.rel (%p2181_p8) target bundleno = 118 (0x76), region = 24 }
  0x17   : > { %203 = sbr.rel (!%p3252_p5) target bundleno = 67 (0x43), region = 28  ;;  %s205_s10 = sand.u32 (%p3252_p5), 1, %s3057_s19  }
  0x18   : > { %s2183_s11 = sshll.u32 (%p3252_p5), %s3073_s23, 3  ;;  %s2182_s12 = sshll.u32 (%p3252_p5), %s205_s10, 6 }
  0x19   : > { %s209_s13 = ssub.s32 (%p3252_p5), 13, %s2183_s11  ;;  %s2240_s14 = sshll.u32 (%p3252_p5), %s3073_s23, 4 }
  0x1a   : > { %p210_p9 = scmp.lt.s32.totalorder (%p3252_p5), %s209_s13, 8  ;;  %s215_s15 = sadd.s32 (%p3252_p5), %s3069_s22, %s2240_s14 }
  0x1b   : > { %s2187_s17 = sshll.u32 (%p3252_p5), %s215_s15, 3  ;;  %s4235_s2 = sld [smem:[#allocation21_spill]] (%p3252_p5) }
  0x1c   : > { %s4308_s13 = smov (!%p210_p9, %s209_s13), 8  ;;  %s3283_s7 = scalar_lea.vmem [#allocation2], %s2182_s12  }
  0x1d   : > { %s2184_s16 = sshll.u32 %s4308_s13, 7 }
  0x1e   : > { %p2188_p10 = scmp.eq.s32.totalorder %s2184_s16, 0 }
  0x1f   : > { %s3286_s8 = sshrl.u32 (!%p2188_p10), %s4308_s13, 3 }
  0x20   : > { %220 = sbr.rel (%p2188_p10) target bundleno = 67 (0x43), region = 32  ;;  %p2189_p11 = scmp.le.s32.totalorder (!%p2188_p10), %s3286_s8, 0 }
  0x21   : > { %s3281_s6 = scalar_lea.vmem %s4235_s2, %s2187_s17  }
  0x25   : > { %2052 = sbr.rel (%p2189_p11) target bundleno = 50 (0x32), region = 267  ;;  %s4236_s10 = smov (!%p2189_p11), %s3283_s7 }
  0x26   : > { %s4237_s11 = smov (!%p2189_p11), %s3281_s6  ;;  %s3295_s14 = smov (!%p2189_p11), 0  }
  0x27   : > { %s3297_s15 = smov (!%p2189_p11), 0  }
  0x2a LB: >> { %v297_v0 = vld [vmem:[%s3085_s11] sm:$0xff]  ;;  %v299_v1 = vld [vmem:[%s3085_s11 + $0x10] sm:$0xff]  ;;  %s313_s12 = sadd.s32 1, %s3089_s14  ;;  %s291_s15 = sadd.s32 1, %s3093_s15   ;;  %s3093_s15 = sphi %s3297_s15, %s291_s15   ;;  %s3089_s14 = sphi %s3295_s14, %s4238_s14   ;;  %s3085_s11 = sphi %s4237_s11, %s318_s11   ;;  %s3081_s10 = sphi %s4236_s10, %s319_s10  }
  0x2b   : >> { %v301_v2 = vld [vmem:[%s3085_s11 + $0x20] sm:$0xff]  ;;  %298 = vst [vmem:[%s3081_s10] sm:$0xff] %v297_v0  ;;  %300 = vst [vmem:[%s3081_s10 + $0x8] sm:$0xff] %v299_v1  ;;  %v303_v3 = vld [vmem:[%s3085_s11 + $0x30] sm:$0xff]  ;;  %p314_p12 = scmp.ge.s32.totalorder %s313_s12, %s3286_s8  ;;  %p290_p13 = scmp.ge.s32.totalorder %s291_s15, %s3286_s8 }
  0x2c   : >> { %302 = vst [vmem:[%s3081_s10 + $0x10] sm:$0xff] %v301_v2  ;;  %v305_v4 = vld [vmem:[%s3085_s11 + $0x40] sm:$0xff]  ;;  %v307_v5 = vld [vmem:[%s3085_s11 + $0x50] sm:$0xff]  ;;  %304 = vst [vmem:[%s3081_s10 + $0x18] sm:$0xff] %v303_v3 }
  0x2d   : >> { %306 = vst [vmem:[%s3081_s10 + $0x20] sm:$0xff] %v305_v4  ;;  %308 = vst [vmem:[%s3081_s10 + $0x28] sm:$0xff] %v307_v5  ;;  %v309_v6 = vld [vmem:[%s3085_s11 + $0x60] sm:$0xff]  ;;  %v311_v7 = vld [vmem:[%s3085_s11 + $0x70] sm:$0xff]  ;;  %s4310_s12 = smov (%p314_p12, %s313_s12), 0  ;;  %293 = sbr.rel (!%p290_p13) target bundleno = 42 (0x2a), region = 273 }
  0x2e   : >> { %310 = vst [vmem:[%s3081_s10 + $0x30] sm:$0xff] %v309_v6  ;;  %312 = vst [vmem:[%s3081_s10 + $0x38] sm:$0xff] %v311_v7  ;;  %s2190_s16 = sshll.u32 %s4310_s12, 7  ;;  %s2191_s17 = sshll.u32 %s4310_s12, 6 }
  0x2f   : >> { %s318_s11 = scalar_lea.vmem %s3281_s6, %s2190_s16   ;;  %s319_s10 = scalar_lea.vmem %s3283_s7, %s2191_s17 [#allocation2]  }
  0x30   : >> { %s4238_s14 = smov %s4310_s12 }
  0x32 PF: > { %s3319_s27 = sand.u32 7, %s4308_s13   ;;  %s2241_s28 = sshll.u32 %s3286_s8, 7 }
  0x33   : > { %s3323_s16 = scalar_lea.vmem %s3281_s6, %s2241_s28   ;;  %s2242_s17 = sshll.u32 %s3286_s8, 6 }
  0x34   : > { %s326_s2 = scalar_lea.vmem %s3283_s7, %s2242_s17 [#allocation2]   ;;  %p2195_p0 = scmp.le.s32.totalorder %s3319_s27, 0 }
  0x35   : > { %s3095_s12 = smov (!%p2195_p0), %s326_s2   ;;  %s3099_s15 = smov (!%p2195_p0), %s3323_s16  }
  0x36   : > { %2066 = sbr.rel (%p2195_p0) target bundleno = 67 (0x43), region = 278  ;;  %s3103_s26 = smov (!%p2195_p0), 0  }
  0x37   : > { %s3107_s10 = smov (!%p2195_p0), 0  }
  0x3b LB: >> { %v336_v8 = vld [vmem:[%s3101_s15] sm:$0xff]  ;;  %s338_s13 = sadd.s32 1, %s3105_s26  ;;  %s330_s10 = sadd.s32 1, %s3109_s10   ;;  %s3109_s10 = sphi %s3107_s10, %s330_s10   ;;  %s3105_s26 = sphi %s3103_s26, %s3104_s26   ;;  %s3101_s15 = sphi %s3099_s15, %s343_s15   ;;  %s3097_s12 = sphi %s3095_s12, %s344_s12  }
  0x3c   : >> { %337 = vst [vmem:[%s3097_s12] sm:$0xff] %v336_v8  ;;  %p339_p1 = scmp.ge.s32.totalorder %s338_s13, %s3319_s27  ;;  %p329_p2 = scmp.ge.s32.totalorder %s330_s10, %s3319_s27 }
  0x3e   : >> { %s4312_s13 = smov (%p339_p1, %s338_s13), 0  ;;  %332 = sbr.rel (!%p329_p2) target bundleno = 59 (0x3b), region = 284 }
  0x3f   : >> { %s2196_s6 = sshll.u32 %s4312_s13, 4  ;;  %s2197_s7 = sshll.u32 %s4312_s13, 3 }
  0x40   : >> { %s343_s15 = scalar_lea.vmem %s3323_s16, %s2196_s6   ;;  %s344_s12 = scalar_lea.vmem %s326_s2, %s2197_s7 [#allocation2]  }
  0x41   : >> { %s3104_s26 = smov %s4312_s13  }
  0x43 PF: > { %350 = sbr.rel (!%p3252_p5) target bundleno = 118 (0x76), region = 80  ;;  %s352_s26 = sand.u32 (%p3252_p5), 1, %s3057_s19  }
  0x44   : > { %s2199_s8 = sshll.u32 (%p3252_p5), %s3073_s23, 3  ;;  %s2198_s11 = sshll.u32 (%p3252_p5), %s352_s26, 4 }
  0x45   : > { %s356_s14 = ssub.s32 (%p3252_p5), 13, %s2199_s8  ;;  %s2243_s28 = sshll.u32 (%p3252_p5), %s3073_s23, 4 }
  0x46   : > { %p357_p3 = scmp.lt.s32.totalorder (%p3252_p5), %s356_s14, 8  ;;  %s362_s17 = sadd.s32 (%p3252_p5), %s3069_s22, %s2243_s28 }
  0x47   : > { %s2203_s27 = sshll.u32 (%p3252_p5), %s362_s17, 1  ;;  %s3346_s15 = scalar_lea.vmem (%p3252_p5), [#allocation3], %s2198_s11  }
  0x48   : > { %s4314_s14 = smov (!%p357_p3, %s356_s14), 8  ;;  %s3344_s29 = scalar_lea.vmem %s4196_s3, %s2203_s27  }
  0x49   : > { %s2200_s2 = sshll.u32 %s4314_s14, 5 }
  0x4a   : > { %p2204_p4 = scmp.eq.s32.totalorder %s2200_s2, 0 }
  0x4b   : > { %s3349_s10 = sshrl.u32 (!%p2204_p4), %s4314_s14, 3 }
  0x4c   : > { %367 = sbr.rel (%p2204_p4) target bundleno = 118 (0x76), region = 84  ;;  %p2205_p5 = scmp.le.s32.totalorder (!%p2204_p4), %s3349_s10, 0 }
  0x51   : > { %2080 = sbr.rel (%p2205_p5) target bundleno = 101 (0x65), region = 289  ;;  %s4239_s13 = smov (!%p2205_p5), %s3346_s15 }
  0x52   : > { %s4240_s6 = smov (!%p2205_p5), %s3344_s29  ;;  %s3358_s7 = smov (!%p2205_p5), 0  }
  0x53   : > { %s3360_s26 = smov (!%p2205_p5), 0  }
  0x56 LB: >> { %v384_v9 = vld [vmem:[%s3117_s6] sm:$0x3]  ;;  %v386_v10 = vld [vmem:[%s3117_s6 + $0x4] sm:$0x3]  ;;  %v388_v11 = vld [vmem:[%s3117_s6 + $0x8] sm:$0x3]  ;;  %s3125_s26 = sphi %s3360_s26, %s378_s26   ;;  %s3121_s7 = sphi %s3358_s7, %s4241_s7   ;;  %s3117_s6 = sphi %s4240_s6, %s405_s6   ;;  %s3113_s13 = sphi %s4239_s13, %s406_s13  }
  0x57   : >> { %385 = vst [vmem:[%s3113_s13] sm:$0x3] %v384_v9  ;;  %387 = vst [vmem:[%s3113_s13 + $0x2] sm:$0x3] %v386_v10  ;;  %v390_v12 = vld [vmem:[%s3117_s6 + $0xc] sm:$0x3]  ;;  %s400_s8 = sadd.s32 1, %s3121_s7 }
  0x58   : >> { %389 = vst [vmem:[%s3113_s13 + $0x4] sm:$0x3] %v388_v11  ;;  %v392_v13 = vld [vmem:[%s3117_s6 + $0x10] sm:$0x3]  ;;  %v394_v14 = vld [vmem:[%s3117_s6 + $0x14] sm:$0x3]  ;;  %p401_p7 = scmp.ge.s32.totalorder %s400_s8, %s3349_s10 }
  0x59   : >> { %391 = vst [vmem:[%s3113_s13 + $0x6] sm:$0x3] %v390_v12  ;;  %393 = vst [vmem:[%s3113_s13 + $0x8] sm:$0x3] %v392_v13  ;;  %v396_v15 = vld [vmem:[%s3117_s6 + $0x18] sm:$0x3] }
  0x5a   : >> { %395 = vst [vmem:[%s3113_s13 + $0xa] sm:$0x3] %v394_v14  ;;  %v398_v16 = vld [vmem:[%s3117_s6 + $0x1c] sm:$0x3]  ;;  %397 = vst [vmem:[%s3113_s13 + $0xc] sm:$0x3] %v396_v15 }
  0x5b   : >> { %399 = vst [vmem:[%s3113_s13 + $0xe] sm:$0x3] %v398_v16  ;;  %s4316_s8 = smov (%p401_p7, %s400_s8), 0  ;;  %s378_s26 = sadd.s32 1, %s3125_s26  }
  0x5c   : >> { %s2206_s11 = sshll.u32 %s4316_s8, 5  ;;  %s2207_s28 = sshll.u32 %s4316_s8, 4 }
  0x5d   : >> { %s405_s6 = scalar_lea.vmem %s3344_s29, %s2206_s11   ;;  %s406_s13 = scalar_lea.vmem %s3346_s15, %s2207_s28 [#allocation3]  }
  0x5e   : >> { %p377_p8 = scmp.ge.s32.totalorder %s378_s26, %s3349_s10  ;;  %s4241_s7 = smov %s4316_s8 }
  0x60   : > { %380 = sbr.rel (!%p377_p8) target bundleno = 86 (0x56), region = 295 }
  0x65 PF: > { %s3382_s17 = sand.u32 7, %s4314_s14   ;;  %s2244_s2 = sshll.u32 %s3349_s10, 5 }
  0x66   : > { %s3386_s27 = scalar_lea.vmem %s3344_s29, %s2244_s2   ;;  %s2245_s16 = sshll.u32 %s3349_s10, 4 }
  0x67   : > { %s413_s12 = scalar_lea.vmem %s3346_s15, %s2245_s16 [#allocation3]   ;;  %p2211_p9 = scmp.le.s32.totalorder %s3382_s17, 0 }
  0x68   : > { %s3127_s8 = smov (!%p2211_p9), %s413_s12   ;;  %s3131_s26 = smov (!%p2211_p9), %s3386_s27  }
  0x69   : > { %2094 = sbr.rel (%p2211_p9) target bundleno = 118 (0x76), region = 300  ;;  %s3135_s11 = smov (!%p2211_p9), 0  }
  0x6a   : > { %s3139_s13 = smov (!%p2211_p9), 0  }
  0x6e LB: >> { %v423_v17 = vld [vmem:[%s3133_s26] sm:$0x3]  ;;  %s425_s14 = sadd.s32 1, %s3137_s11  ;;  %s417_s13 = sadd.s32 1, %s3141_s13   ;;  %s3141_s13 = sphi %s3139_s13, %s417_s13   ;;  %s3137_s11 = sphi %s3135_s11, %s3136_s11   ;;  %s3133_s26 = sphi %s3131_s26, %s430_s26   ;;  %s3129_s8 = sphi %s3127_s8, %s431_s8  }
  0x6f   : >> { %424 = vst [vmem:[%s3129_s8] sm:$0x3] %v423_v17  ;;  %p426_p10 = scmp.ge.s32.totalorder %s425_s14, %s3382_s17  ;;  %p416_p11 = scmp.ge.s32.totalorder %s417_s13, %s3382_s17 }
  0x71   : >> { %s4318_s14 = smov (%p426_p10, %s425_s14), 0  ;;  %419 = sbr.rel (!%p416_p11) target bundleno = 110 (0x6e), region = 306 }
  0x72   : >> { %s2212_s29 = sshll.u32 %s4318_s14, 2  ;;  %s2213_s15 = sshll.u32 %s4318_s14, 1 }
  0x73   : >> { %s430_s26 = scalar_lea.vmem %s3386_s27, %s2212_s29   ;;  %s431_s8 = scalar_lea.vmem %s413_s12, %s2213_s15 [#allocation3]  }
  0x74   : >> { %s3136_s11 = smov %s4318_s14  }
  0x76 PF: > { %p2214_p12 = scmp.ge.s32.totalorder %s3077_s24, 1  ;;  %p496_p13 = scmp.lt.s32.totalorder %s3077_s24, 5 }
  0x78   : > { %p497_p0 = pnand %p2214_p12, %p496_p13 }
  0x7a   : > { %500 = sbr.rel (%p497_p0) target bundleno = 804 (0x324), region = 128 }
  0x7f   : > { %p559_p1 = scmp.lt.s32.totalorder %s3065_s21, 1  ;;  %s2220_s10 = sshll.u32 %s3061_s20, 7  ;;  %vm591_vm0 = vcmask 64512  }
  0x80   : > { %s3404_s28 = scalar_lea.vmem %s4194_s1, %s2220_s10  ;;  %s2219_s8 = sshll.u32 %s3065_s21, 6 }
  0x81   : > { %s560_s17 = scalar_select %p559_p1, %s3065_s21, 1  ;;  %v590_v18 = vld [vmem:[%s3404_s28 + $0x78] sm:$0xff]  ;;  %v589_v19 = vld [vmem:[%s3404_s28 + $0x70] sm:$0xff]  ;;  %v588_v20 = vld [vmem:[%s3404_s28 + $0x68] sm:$0xff] }
  0x82   : > { %v662_v21 = vsel %vm591_vm0, %v590_v18, 0  ;;  %v659_v22 = vsel %vm591_vm0, %v589_v19, 0  ;;  %v656_v23 = vsel %vm591_vm0, %v588_v20, 0  ;;  %v587_v24 = vld [vmem:[%s3404_s28 + $0x60] sm:$0xff]  ;;  %v586_v25 = vld [vmem:[%s3404_s28 + $0x58] sm:$0xff]  ;;  %v585_v30 = vld [vmem:[%s3404_s28 + $0x50] sm:$0xff]  ;;  %s3497_s13 = scalar_lea.vmem %s4193_s0, %s2219_s8 }
  0x83   : > { %s2218_s2 = sshll.u32 %s560_s17, 3  ;;  %v3415_v26 = vand.u32 4294901760, %v662_v21  ;;  %v3417_v27 = vand.u32 4294901760, %v659_v22  ;;  %v3419_v28 = vand.u32 4294901760, %v656_v23  ;;  %v653_v29 = vsel %vm591_vm0, %v587_v24, 0  ;;  %v584_v42 = vld [vmem:[%s3404_s28 + $0x48] sm:$0xff] }
  0x84   : > { %s3426_s12 = scalar_lea.vmem %s4198_s5, %s2218_s2  ;;  %v3428_v31 = vand.u32 4294901760, %v653_v29  ;;  %v650_v32 = vsel %vm591_vm0, %v586_v25, 0  ;;  %v647_v37 = vsel %vm591_vm0, %v585_v30, 0  ;;  %v644_v46 = vsel %vm591_vm0, %v584_v42, 0  ;;  %v583_v52 = vld [vmem:[%s3404_s28 + $0x40] sm:$0xff]  ;;  %v582_v59 = vld [vmem:[%s3404_s28 + $0x38] sm:$0xff] }
  0x85   : > { %2409 = vmatprep.subr.mxu0 %v3415_v26  ;;  %v3433_v33 = vsub.f32 %v662_v21, %v3415_v26  ;;  %v3436_v34 = vsub.f32 %v659_v22, %v3417_v27  ;;  %v3439_v35 = vsub.f32 %v656_v23, %v3419_v28  ;;  %v3442_v36 = vand.u32 4294901760, %v650_v32  ;;  %v565_v2 = vld [vmem:[%s3497_s13] sm:$0xff]  ;;  %v581_v3 = vld [vmem:[%s3404_s28 + $0x30] sm:$0xff]  ;;  %v580_v11 = vld [vmem:[%s3404_s28 + $0x28] sm:$0xff]  ;;  %s503_s14 = sand.u32 1, %s3053_s18   ;;  %p2221_p2 = scmp.ne.s32.totalorder %s3061_s20, 0 }
  0x86   : > { %2410 = vmatpush3.xpose.msra.mxu0 %v3415_v26  ;;  %v3456_v41 = vsub.f32 %v653_v29, %v3428_v31  ;;  %v3464_v45 = vand.u32 4294901760, %v647_v37  ;;  %v3479_v53 = vand.u32 4294901760, %v644_v46  ;;  %v641_v58 = vsel %vm591_vm0, %v583_v52, 0  ;;  %v579_v20 = vld [vmem:[%s3404_s28 + $0x20] sm:$0xff]  ;;  %v577_v52 = vld [vmem:[%s3404_s28 + $0x10] sm:$0xff]  ;;  %s2216_s29 = sshll.u32 %s503_s14, 4 }
  0x87   : > { %2411 = vmatprep.subr.mxu0 %v3417_v27  ;;  %v3447_v38 = vand.u32 4294901760, %v3433_v33  ;;  %v3450_v39 = vand.u32 4294901760, %v3436_v34  ;;  %v3453_v40 = vand.u32 4294901760, %v3439_v35  ;;  %v3468_v47 = vsub.f32 %v650_v32, %v3442_v36  ;;  %s512_s15 = scalar_lea.vmem [#allocation3], %s2216_s29  ;;  %s3952_s18 = sshll.u32 %s503_s14, 6 }
  0x88   : > { %v3474_v51 = vand.u32 4294901760, %v3456_v41  ;;  %v3482_v54 = vsub.f32 %v647_v37, %v3464_v45  ;;  %v3504_v61 = vsub.f32 %v644_v46, %v3479_v53  ;;  %v3509_v0 = vand.u32 4294901760, %v641_v58  ;;  %v578_v37 = vld [vmem:[%s3404_s28 + $0x18] sm:$0xff]  ;;  %s4007_s6 = scalar_lea.vmem [#allocation4], %s3952_s18  }
  0x89   : > { %4242 = vst [vmem:[#allocation6_spill] sm:$0xff] %v3453_v40  ;;  %v829_v43 = vsub.f32 %v3433_v33, %v3447_v38  ;;  %v836_v44 = vsub.f32 %v3436_v34, %v3450_v39  ;;  %v843_v50 = vsub.f32 %v3439_v35, %v3453_v40  ;;  %v3488_v57 = vand.u32 4294901760, %v3468_v47 }
  0x8a   : > { %2412 = vmatpush3.xpose.msra.mxu0 %v3417_v27  ;;  %4243 = vst [vmem:[#allocation7_spill] sm:$0xff] %v3474_v51  ;;  %v850_v56 = vsub.f32 %v3456_v41, %v3474_v51  ;;  %v3501_v60 = vand.u32 4294901760, %v3482_v54  ;;  %v638_v1 = vsel %vm591_vm0, %v582_v59, 0  ;;  %v3520_v6 = vand.u32 4294901760, %v3504_v61 }
  0x8b   : > { %2413 = vmatprep.subr.mxu0 %v3419_v28  ;;  %v830_v48 = vand.u32 4294901760, %v829_v43  ;;  %v837_v49 = vand.u32 4294901760, %v836_v44  ;;  %v844_v55 = vand.u32 4294901760, %v843_v50  ;;  %4244 = vst [vmem:[#allocation8_spill] sm:$0xff] %v3488_v57  ;;  %v857_v63 = vsub.f32 %v3468_v47, %v3488_v57 }
  0x8c   : > { %4245 = vst [vmem:[#allocation9_spill] sm:$0xff] %v3501_v60  ;;  %v851_v62 = vand.u32 4294901760, %v850_v56  ;;  %v864_v4 = vsub.f32 %v3482_v54, %v3501_v60  ;;  %v3517_v5 = vand.u32 4294901760, %v638_v1  ;;  %4246 = vst [vmem:[#allocation10_spill] sm:$0xff] %v3520_v6  ;;  %v593_v7 = vsel %vm591_vm0, %v565_v2, 0 }
  0x8d   : > { %2453 = vmatprep.subr.mxu1 %v830_v48  ;;  %v858_v8 = vand.u32 4294901760, %v857_v63  ;;  %v635_v9 = vsel %vm591_vm0, %v581_v3, 0  ;;  %v3526_v10 = vsub.f32 %v641_v58, %v3509_v0  ;;  %v3529_v12 = vand.u32 4294901760, %v593_v7 }
  0x8e   : > { %2414 = vmatpush3.xpose.msra.mxu0 %v3419_v28  ;;  %2454 = vmatpush3.xpose.msra.mxu1 %v830_v48  ;;  %v865_v14 = vand.u32 4294901760, %v864_v4  ;;  %v3536_v15 = vand.u32 4294901760, %v635_v9  ;;  %v632_v16 = vsel %vm591_vm0, %v580_v11, 0  ;;  %v871_v17 = vsub.f32 %v3504_v61, %v3520_v6  ;;  %v575_v11 = vld [vmem:[%s3404_s28] sm:$0xff] }
  0x8f   : > { %2415 = vmatprep.subr.mxu0 %v3428_v31  ;;  %2455 = vmatprep.subr.mxu1 %v837_v49  ;;  %4247 = vst [vmem:[#allocation11_spill] sm:$0xff] %v3529_v12  ;;  %v3532_v13 = vsub.f32 %v593_v7, %v3529_v12  ;;  %v3543_v18 = vand.u32 4294901760, %v3526_v10  ;;  %v3546_v19 = vsub.f32 %v638_v1, %v3517_v5  ;;  %v3554_v23 = vand.u32 4294901760, %v632_v16  ;;  %v576_v1 = vld [vmem:[%s3404_s28 + $0x8] sm:$0xff] }
  0x90   : > { %2485 = vmatprep.mubr.f32.mxu1 %v3529_v12  ;;  %v629_v24 = vsel %vm591_vm0, %v579_v20, 0  ;;  %v3558_v25 = vsub.f32 %v635_v9, %v3536_v15  ;;  %v872_v29 = vand.u32 4294901760, %v871_v17  ;;  %v626_v44 = vsel %vm591_vm0, %v578_v37, 0 }
  0x91   : > { %4248 = vst [vmem:[#allocation12_spill] sm:$0xff] %v3543_v18  ;;  %v4200_v21 = vand.u32 4294901760, %v3532_v13  ;;  %v878_v30 = vsub.f32 %v3526_v10, %v3543_v18  ;;  %v3564_v32 = vand.u32 4294901760, %v3546_v19  ;;  %v3568_v43 = vand.u32 4294901760, %v629_v24 }
  0x92   : > { %2416 = vmatpush3.xpose.msra.mxu0 %v3428_v31  ;;  %2456 = vmatpush3.xpose.msra.mxu1 %v837_v49  ;;  %v3575_v49 = vand.u32 4294901760, %v3558_v25  ;;  %v3578_v50 = vsub.f32 %v632_v16, %v3554_v23  ;;  %v623_v56 = vsel %vm591_vm0, %v577_v52, 0  ;;  %v620_v3 = vsel %vm591_vm0, %v576_v1, 0 }
  0x93   : > { %2417 = vmatprep.subr.mxu0 %v3442_v36  ;;  %2457 = vmatprep.subr.mxu1 %v844_v55  ;;  %v748_v22 = vsub.f32 %v3532_v13, %v4200_v21  ;;  %4249 = vst [vmem:[#allocation13_spill] sm:$0xff] %v3564_v32  ;;  %v879_v46 = vand.u32 4294901760, %v878_v30  ;;  %v885_v48 = vsub.f32 %v3546_v19, %v3564_v32  ;;  %v3596_v2 = vand.u32 4294901760, %v623_v56  ;;  %v571_v21 = vld [vmem:[%s3497_s13 + $0x30] sm:$0xff] }
  0x94   : > { %4250 = vst [vmem:[#allocation14_spill] sm:$0xff] %v3575_v49  ;;  %v892_v59 = vsub.f32 %v3558_v25, %v3575_v49  ;;  %v3592_v63 = vsub.f32 %v629_v24, %v3568_v43  ;;  %v3611_v16 = vand.u32 4294901760, %v620_v3  ;;  %v617_v17 = vsel %vm591_vm0, %v575_v11, 0 }
  0x95   : > { %v749_v42 = vand.u32 4294901760, %v748_v22  ;;  %v886_v58 = vand.u32 4294901760, %v885_v48  ;;  %v567_v22 = vld [vmem:[%s3497_s13 + $0x10] sm:$0xff]  ;;  %v3623_v37 = vsub.f32 %v623_v56, %v3596_v2  ;;  %v3630_v48 = vand.u32 4294901760, %v617_v17 }
  0x96   : > { %2418 = vmatpush3.xpose.msra.mxu0 %v3442_v36  ;;  %2458 = vmatpush3.xpose.msra.mxu1 %v844_v55  ;;  %v3582_v55 = vand.u32 4294901760, %v626_v44  ;;  %v893_v4 = vand.u32 4294901760, %v892_v59 }
  0x97   : > { %2419 = vmatprep.subr.mxu0 %v3464_v45  ;;  %2459 = vmatprep.subr.mxu1 %v851_v62  ;;  %v3638_v1 = vand.u32 4294901760, %v3623_v37 }
  0x98   : > { %2441 = vmatprep.mubr.f32.mxu0 %v749_v42  ;;  %v3606_v9 = vsub.f32 %v626_v44, %v3582_v55  ;;  %v568_v42 = vld [vmem:[%s3497_s13 + $0x18] sm:$0xff] }
  0x99   : > { %v602_v52 = vsel %vm591_vm0, %v568_v42, 0  ;;  %4254 = vst [vmem:[#allocation18_spill] sm:$0xff] %v3638_v1 }
  0x9a   : > { %2420 = vmatpush3.xpose.msra.mxu0 %v3464_v45  ;;  %2460 = vmatpush3.xpose.msra.mxu1 %v851_v62  ;;  %v3589_v62 = vand.u32 4294901760, %v3578_v50  ;;  %v3620_v30 = vand.u32 4294901760, %v3606_v9 }
  0x9b   : > { %2421 = vmatprep.subr.mxu0 %v3479_v53  ;;  %2461 = vmatprep.subr.mxu1 %v858_v8 }
  0x9c   : > { %4251 = vst [vmem:[#allocation15_spill] sm:$0xff] %v3589_v62  ;;  %v899_v7 = vsub.f32 %v3578_v50, %v3589_v62  ;;  %4253 = vst [vmem:[#allocation17_spill] sm:$0xff] %v3620_v30  ;;  %v913_v56 = vsub.f32 %v3606_v9, %v3620_v30  ;;  %v920_v30 = vsub.f32 %v3623_v37, %v3638_v1  ;;  %v611_v1 = vsel %vm591_vm0, %v571_v21, 0 }
  0x9d   : > { %v3689_v21 = vand.u32 4294901760, %v611_v1 }
  0x9e   : > { %2422 = vmatpush3.xpose.msra.mxu0 %v3479_v53  ;;  %2462 = vmatpush3.xpose.msra.mxu1 %v858_v8  ;;  %v3603_v8 = vand.u32 4294901760, %v3592_v63  ;;  %v900_v24 = vand.u32 4294901760, %v899_v7  ;;  %v3641_v7 = vsub.f32 %v620_v3, %v3611_v16  ;;  %v914_v3 = vand.u32 4294901760, %v913_v56 }
  0x9f   : > { %2423 = vmatprep.subr.mxu0 %v3509_v0  ;;  %2463 = vmatprep.subr.mxu1 %v865_v14 }
  0xa0   : > { %4252 = vst [vmem:[#allocation16_spill] sm:$0xff] %v3603_v8 }
  0xa2   : > { %2424 = vmatpush3.xpose.msra.mxu0 %v3509_v0  ;;  %2464 = vmatpush3.xpose.msra.mxu1 %v865_v14  ;;  %v566_v14 = vld [vmem:[%s3497_s13 + $0x8] sm:$0xff] }
  0xa3   : > { %2425 = vmatprep.subr.mxu0 %v3517_v5  ;;  %2465 = vmatprep.subr.mxu1 %v872_v29  ;;  %v596_v20 = vsel %vm591_vm0, %v566_v14, 0 }
  0xa4   : > { %v3626_v44 = vand.u32 4294901760, %v596_v20 }
  0xa6   : > { %2426 = vmatpush3.xpose.msra.mxu0 %v3517_v5  ;;  %2466 = vmatpush3.xpose.msra.mxu1 %v872_v29  ;;  %v906_v29 = vsub.f32 %v3592_v63, %v3603_v8  ;;  %v3647_v14 = vsub.f32 %v596_v20, %v3626_v44  ;;  %v3659_v20 = vand.u32 4294901760, %v3641_v7  ;;  %v3662_v8 = vsub.f32 %v617_v17, %v3630_v48 }
  0xa7   : > { %2427 = vmatprep.subr.mxu0 %v3536_v15  ;;  %2467 = vmatprep.subr.mxu1 %v879_v46 }
  0xa8   : > { %v907_v59 = vand.u32 4294901760, %v906_v29  ;;  %4255 = vst [vmem:[#allocation19_spill] sm:$0xff] %v3659_v20  ;;  %v927_v32 = vsub.f32 %v3641_v7, %v3659_v20 }
  0xaa   : > { %2428 = vmatpush3.xpose.msra.mxu0 %v3536_v15  ;;  %2468 = vmatpush3.xpose.msra.mxu1 %v879_v46  ;;  %v599_v46 = vsel %vm591_vm0, %v567_v22, 0  ;;  %v3649_v22 = vand.u32 4294901760, %v602_v52 }
  0xab   : > { %2429 = vmatprep.subr.mxu0 %v3554_v23  ;;  %2469 = vmatprep.subr.mxu1 %v886_v58  ;;  %v3644_v11 = vand.u32 4294901760, %v599_v46 }
  0xac   : > { %v3672_v49 = vsub.f32 %v602_v52, %v3649_v22 }
  0xad   : > { %v3666_v62 = vsub.f32 %v599_v46, %v3644_v11  ;;  %v921_v46 = vand.u32 4294901760, %v920_v30 }
  0xae   : > { %2430 = vmatpush3.xpose.msra.mxu0 %v3554_v23  ;;  %2470 = vmatpush3.xpose.msra.mxu1 %v886_v58  ;;  %v569_v58 = vld [vmem:[%s3497_s13 + $0x20] sm:$0xff]  ;;  %v4259_v57 = vand.u32 4294901760, %v3672_v49 }
  0xaf   : > { %2431 = vmatprep.subr.mxu0 %v3568_v43  ;;  %2471 = vmatprep.subr.mxu1 %v893_v4  ;;  %v605_v29 = vsel %vm591_vm0, %v569_v58, 0  ;;  %v572_v58 = vld [vmem:[%s3497_s13 + $0x38] sm:$0xff]  ;;  %v4258_v60 = vand.u32 4294901760, %v3666_v62 }
  0xb0   : > { %v614_v17 = vsel %vm591_vm0, %v572_v58, 0 }
  0xb1   : > { %v3698_v20 = vand.u32 4294901760, %v614_v17 }
  0xb2   : > { %2432 = vmatpush3.xpose.msra.mxu0 %v3568_v43  ;;  %2472 = vmatpush3.xpose.msra.mxu1 %v893_v4  ;;  %v570_v4 = vld [vmem:[%s3497_s13 + $0x28] sm:$0xff] }
  0xb3   : > { %2433 = vmatprep.subr.mxu0 %v3582_v55  ;;  %2473 = vmatprep.subr.mxu1 %v900_v24  ;;  %v608_v42 = vsel %vm591_vm0, %v570_v4, 0  ;;  %v3683_v4 = vand.u32 4294901760, %v3662_v8 }
  0xb4   : > { %v3674_v56 = vand.u32 4294901760, %v608_v42 }
  0xb5   : > { %4256 = vst [vmem:[#allocation20_spill] sm:$0xff] %v3683_v4  ;;  %v934_v52 = vsub.f32 %v3662_v8, %v3683_v4 }
  0xb6   : > { %2434 = vmatpush3.xpose.msra.mxu0 %v3582_v55  ;;  %2474 = vmatpush3.xpose.msra.mxu1 %v900_v24  ;;  %v3668_v24 = vand.u32 4294901760, %v605_v29  ;;  %v3696_v30 = vsub.f32 %v608_v42, %v3674_v56  ;;  %v3709_v42 = vsub.f32 %v611_v1, %v3689_v21 }
  0xb7   : > { %2435 = vmatprep.subr.mxu0 %v3596_v2  ;;  %2475 = vmatprep.subr.mxu1 %v907_v59 }
  0xb8   : > { %v3687_v18 = vsub.f32 %v605_v29, %v3668_v24  ;;  %v928_v29 = vand.u32 4294901760, %v927_v32  ;;  %v797_v51 = vand.u32 4294901760, %v3696_v30  ;;  %v3716_v32 = vsub.f32 %v614_v17, %v3698_v20 }
  0xb9   : > { %v807_v4 = vand.u32 4294901760, %v3709_v42 }
  0xba   : > { %2436 = vmatpush3.xpose.msra.mxu0 %v3596_v2  ;;  %2476 = vmatpush3.xpose.msra.mxu1 %v907_v59  ;;  %v4257_v59 = vand.u32 4294901760, %v3647_v14  ;;  %v4260_v1 = vand.u32 4294901760, %v3687_v18  ;;  %v798_v17 = vsub.f32 %v3696_v30, %v797_v51  ;;  %v817_v40 = vand.u32 4294901760, %v3716_v32 }
  0xbb   : > { %2437 = vmatprep.subr.mxu0 %v3611_v16  ;;  %2477 = vmatprep.subr.mxu1 %v914_v3 }
  0xbc   : > { %v758_v58 = vsub.f32 %v3647_v14, %v4257_v59  ;;  %v768_v59 = vsub.f32 %v3666_v62, %v4258_v60  ;;  %v935_v60 = vand.u32 4294901760, %v934_v52  ;;  %v808_v52 = vsub.f32 %v3709_v42, %v807_v4 }
  0xbe   : > { %2438 = vmatpush3.xpose.msra.mxu0 %v3611_v16  ;;  %2478 = vmatpush3.xpose.msra.mxu1 %v914_v3  ;;  %v759_v12 = vand.u32 4294901760, %v758_v58  ;;  %v778_v3 = vsub.f32 %v3672_v49, %v4259_v57  ;;  %v769_v6 = vand.u32 4294901760, %v768_v59  ;;  %v788_v58 = vsub.f32 %v3687_v18, %v4260_v1 }
  0xbf   : > { %2439 = vmatprep.subr.mxu0 %v3630_v48  ;;  %2479 = vmatprep.subr.mxu1 %v921_v46  ;;  %v818_v59 = vsub.f32 %v3716_v32, %v817_v40 }
  0xc0   : > { %v779_v57 = vand.u32 4294901760, %v778_v3 }
  0xc2   : > { %2440 = vmatpush3.xpose.msra.mxu0 %v3630_v48  ;;  %2480 = vmatpush3.xpose.msra.mxu1 %v921_v46  ;;  %v789_v46 = vand.u32 4294901760, %v788_v58 }
  0xc3   : > { %2481 = vmatprep.subr.mxu1 %v928_v29  ;;  %2497 = vmatprep.subr.mxu0 %v3433_v33 }
  0xc5   : > { %2442 = vmatmul.mubr.f32.vlgmr.msra.gmra.mxu0 %v759_v12  ;;  %v799_v12 = vand.u32 4294901760, %v798_v17 }
  0xc6   : > { %2482 = vmatpush3.xpose.msra.mxu1 %v928_v29  ;;  %2498 = vmatpush3.xpose.msra.mxu0 %v3433_v33  ;;  %v809_v33 = vand.u32 4294901760, %v808_v52  ;;  %v2250_v29 = vld [vmem:[%s512_s15] sm:$0xff]  }
  0xc7   : > { %2483 = vmatprep.subr.mxu1 %v935_v60  ;;  %2499 = vmatprep.subr.mxu0 %v3436_v34 }
  0xc8   : > { %2444 = vmatprep.mubr.f32.mxu0 %v769_v6  ;;  %v819_v6 = vand.u32 4294901760, %v818_v59  ;;  %v2256_v59 = vunpack.c.3.s8 %v2250_v29 }
  0xc9   : > { %2445 = vmatmul.mubr.f32.gmra.mxu0 %v779_v57  ;;  %v3944_v57 = vstv %s2219_s8 }
  0xca   : > { %2484 = vmatpush3.xpose.msra.mxu1 %v935_v60  ;;  %2500 = vmatpush3.xpose.msra.mxu0 %v3436_v34  ;;  %v4261_v34 = vand.u32 4294901760, %v3532_v13  ;;  %v2252_v60 = vunpack.c.1.s8 %v2250_v29 }
  0xcb   : > { %2501 = vmatprep.subr.mxu0 %v3439_v35  ;;  %2541 = vmatprep.subr.mxu1 %v3415_v26 }
  0xcc   : > { %2447 = vmatprep.mubr.f32.mxu0 %v789_v46  ;;  %v2251_v46 = vunpack.c.0.s8 %v2250_v29 }
  0xcd   : > { %2486 = vmatmul.mubr.f32.vlgmr.msra.gmra.mxu1 %v3626_v44  ;;  %2448 = vmatmul.mubr.f32.gmra.mxu0 %v799_v12  ;;  %v1682_v12 = vstv %s2220_s10  ;;  %s3985_s10 = scalar_lea.vmem [#allocation2], %s3952_s18 }
  0xce   : > { %2502 = vmatpush3.xpose.msra.mxu0 %v3439_v35  ;;  %2542 = vmatpush3.xpose.msra.mxu1 %v3415_v26  ;;  %v4262_v35 = vld [vmem:[#allocation6_spill] sm:$0xff] }
  0xcf   : > { %2503 = vmatprep.subr.mxu0 %v3456_v41  ;;  %2543 = vmatprep.subr.mxu1 %v3417_v27 }
  0xd0   : > { %2488 = vmatprep.mubr.f32.mxu1 %v3644_v11  ;;  %2450 = vmatprep.mubr.f32.mxu0 %v809_v33  ;;  %v3948_v33 = vld [vmem:[%s512_s15 + $0x8] sm:$0xff]  }
  0xd1   : > { %2489 = vmatmul.mubr.f32.gmra.mxu1 %v3649_v22  ;;  %2451 = vmatmul.mubr.f32.gmra.mxu0 %v819_v6 }
  0xd2   : > { %2504 = vmatpush3.xpose.msra.mxu0 %v3456_v41  ;;  %2544 = vmatpush3.xpose.msra.mxu1 %v3417_v27  ;;  %v4264_v41 = vand.u32 4294901760, %v3666_v62 }
  0xd3   : > { %2505 = vmatprep.subr.mxu0 %v3468_v47  ;;  %2545 = vmatprep.subr.mxu1 %v3419_v28 }
  0xd4   : > { %2491 = vmatprep.mubr.f32.mxu1 %v3668_v24  ;;  %2529 = vmatprep.mubr.f32.mxu0 %v3532_v13 }
  0xd5   : > { %2492 = vmatmul.mubr.f32.gmra.mxu1 %v3674_v56 }
  0xd6   : > { %2506 = vmatpush3.xpose.msra.mxu0 %v3468_v47  ;;  %2546 = vmatpush3.xpose.msra.mxu1 %v3419_v28  ;;  %v4266_v47 = vand.u32 4294901760, %v3672_v49 }
  0xd7   : > { %2507 = vmatprep.subr.mxu0 %v3482_v54  ;;  %2547 = vmatprep.subr.mxu1 %v3428_v31 }
  0xd8   : > { %2494 = vmatprep.mubr.f32.mxu1 %v3689_v21 }
  0xd9   : > { %2495 = vmatmul.mubr.f32.gmra.mxu1 %v3698_v20 }
  0xda   : > { %2508 = vmatpush3.xpose.msra.mxu0 %v3482_v54  ;;  %2548 = vmatpush3.xpose.msra.mxu1 %v3428_v31  ;;  %v4268_v54 = vld [vmem:[#allocation8_spill] sm:$0xff] }
  0xdb   : > { %2509 = vmatprep.subr.mxu0 %v3504_v61  ;;  %2549 = vmatprep.subr.mxu1 %v3442_v36 }
  0xdc   : > { %2573 = vmatprep.mubr.f32.mxu1 %v4261_v34 }
  0xde   : > { %2510 = vmatpush3.xpose.msra.mxu0 %v3504_v61  ;;  %2550 = vmatpush3.xpose.msra.mxu1 %v3442_v36  ;;  %v4269_v61 = vld [vmem:[#allocation11_spill] sm:$0xff] }
  0xdf   : > { %2511 = vmatprep.subr.mxu0 %v3526_v10  ;;  %2551 = vmatprep.subr.mxu1 %v3464_v45 }
  0xe2   : > { %2512 = vmatpush3.xpose.msra.mxu0 %v3526_v10  ;;  %2552 = vmatpush3.xpose.msra.mxu1 %v3464_v45  ;;  %v4271_v10 = vld [vmem:[#allocation10_spill] sm:$0xff] }
  0xe3   : > { %2513 = vmatprep.subr.mxu0 %v3546_v19  ;;  %2553 = vmatprep.subr.mxu1 %v3479_v53 }
  0xe6   : > { %2514 = vmatpush3.xpose.msra.mxu0 %v3546_v19  ;;  %2554 = vmatpush3.xpose.msra.mxu1 %v3479_v53 }
  0xe7   : > { %2515 = vmatprep.subr.mxu0 %v3558_v25  ;;  %2555 = vmatprep.subr.mxu1 %v3509_v0 }
  0xea   : > { %2516 = vmatpush3.xpose.msra.mxu0 %v3558_v25  ;;  %2556 = vmatpush3.xpose.msra.mxu1 %v3509_v0 }
  0xeb   : > { %2517 = vmatprep.subr.mxu0 %v3578_v50  ;;  %2557 = vmatprep.subr.mxu1 %v3517_v5 }
  0xee   : > { %2518 = vmatpush3.xpose.msra.mxu0 %v3578_v50  ;;  %2558 = vmatpush3.xpose.msra.mxu1 %v3517_v5 }
  0xef   : > { %2519 = vmatprep.subr.mxu0 %v3592_v63  ;;  %2559 = vmatprep.subr.mxu1 %v3536_v15 }
  0xf2   : > { %2520 = vmatpush3.xpose.msra.mxu0 %v3592_v63  ;;  %2560 = vmatpush3.xpose.msra.mxu1 %v3536_v15 }
  0xf3   : > { %2521 = vmatprep.subr.mxu0 %v3606_v9  ;;  %2561 = vmatprep.subr.mxu1 %v3554_v23 }
  0xf6   : > { %2522 = vmatpush3.xpose.msra.mxu0 %v3606_v9  ;;  %2562 = vmatpush3.xpose.msra.mxu1 %v3554_v23 }
  0xf7   : > { %2523 = vmatprep.subr.mxu0 %v3623_v37  ;;  %2563 = vmatprep.subr.mxu1 %v3568_v43 }
  0xfa   : > { %2524 = vmatpush3.xpose.msra.mxu0 %v3623_v37  ;;  %2564 = vmatpush3.xpose.msra.mxu1 %v3568_v43 }
  0xfb   : > { %2525 = vmatprep.subr.mxu0 %v3641_v7  ;;  %2565 = vmatprep.subr.mxu1 %v3582_v55 }
  0xfe   : > { %2526 = vmatpush3.xpose.msra.mxu0 %v3641_v7  ;;  %2566 = vmatpush3.xpose.msra.mxu1 %v3582_v55 }
  0xff   : > { %2527 = vmatprep.subr.mxu0 %v3662_v8  ;;  %2567 = vmatprep.subr.mxu1 %v3596_v2 }
 0x102   : > { %2528 = vmatpush3.xpose.msra.mxu0 %v3662_v8  ;;  %2568 = vmatpush3.xpose.msra.mxu1 %v3596_v2 }
 0x103   : > { %2569 = vmatprep.subr.mxu1 %v3611_v16  ;;  %2585 = vmatprep.subr.mxu0 %v3447_v38 }
 0x105   : > { %2530 = vmatmul.mubr.f32.vlgmr.msra.gmra.mxu0 %v3647_v14 }
 0x106   : > { %2570 = vmatpush3.xpose.msra.mxu1 %v3611_v16  ;;  %2586 = vmatpush3.xpose.msra.mxu0 %v3447_v38  ;;  %v4263_v38 = vand.u32 4294901760, %v3647_v14 }
 0x107   : > { %2532 = vmatprep.mubr.f32.mxu0 %v3666_v62  ;;  %2571 = vmatprep.subr.mxu1 %v3630_v48 }
 0x108   : > { %2587 = vmatprep.subr.mxu0 %v3450_v39 }
 0x109   : > { %2533 = vmatmul.mubr.f32.gmra.mxu0 %v3672_v49 }
 0x10a   : > { %2572 = vmatpush3.xpose.msra.mxu1 %v3630_v48  ;;  %2588 = vmatpush3.xpose.msra.mxu0 %v3450_v39  ;;  %v4265_v39 = vld [vmem:[#allocation7_spill] sm:$0xff] }
 0x10b   : > { %2535 = vmatprep.mubr.f32.mxu0 %v3687_v18  ;;  %2589 = vmatprep.subr.mxu0 %v4262_v35 }
 0x10c   : > { %2629 = vmatprep.subr.mxu1 %v3415_v26 }
 0x10d   : > { %2536 = vmatmul.mubr.f32.gmra.mxu0 %v3696_v30  ;;  %2574 = vmatmul.mubr.f32.vlgmr.msra.gmra.mxu1 %v4263_v38  ;;  %v3954_v38 = vcvt.s32.f32 %v2252_v60 }
 0x10e   : > { %2590 = vmatpush3.xpose.msra.mxu0 %v4262_v35  ;;  %2630 = vmatpush3.xpose.msra.mxu1 %v3415_v26  ;;  %v4267_v26 = vmov %v4260_v1 }
 0x10f   : > { %2538 = vmatprep.mubr.f32.mxu0 %v3709_v42  ;;  %2576 = vmatprep.mubr.f32.mxu1 %v4264_v41 }
 0x110   : > { %2591 = vmatprep.subr.mxu0 %v4265_v39  ;;  %2631 = vmatprep.subr.mxu1 %v3417_v27 }
 0x111   : > { %2539 = vmatmul.mubr.f32.gmra.mxu0 %v3716_v32  ;;  %2577 = vmatmul.mubr.f32.gmra.mxu1 %v4266_v47 }
 0x112   : > { %2592 = vmatpush3.xpose.msra.mxu0 %v4265_v39  ;;  %2632 = vmatpush3.xpose.msra.mxu1 %v3417_v27  ;;  %v4270_v27 = vld [vmem:[#allocation9_spill] sm:$0xff] }
 0x113   : > { %2579 = vmatprep.mubr.f32.mxu1 %v4267_v26  ;;  %2593 = vmatprep.subr.mxu0 %v4268_v54 }
 0x114   : > { %2633 = vmatprep.subr.mxu1 %v3419_v28  ;;  %2617 = vmatprep.mubr.f32.mxu0 %v4269_v61 }
 0x115   : > { %2580 = vmatmul.mubr.f32.gmra.mxu1 %v797_v51  ;;  %v4277_v51 = vld [vmem:[#allocation17_spill] sm:$0xff] }
 0x116   : > { %2594 = vmatpush3.xpose.msra.mxu0 %v4268_v54  ;;  %2634 = vmatpush3.xpose.msra.mxu1 %v3419_v28  ;;  %v4272_v28 = vld [vmem:[#allocation12_spill] sm:$0xff] }
 0x117   : > { %2582 = vmatprep.mubr.f32.mxu1 %v807_v4  ;;  %2595 = vmatprep.subr.mxu0 %v4270_v27 }
 0x118   : > { %2635 = vmatprep.subr.mxu1 %v3428_v31 }
 0x119   : > { %2583 = vmatmul.mubr.f32.gmra.mxu1 %v817_v40  ;;  %v4273_v40 = vld [vmem:[#allocation13_spill] sm:$0xff] }
 0x11a   : > { %2596 = vmatpush3.xpose.msra.mxu0 %v4270_v27  ;;  %2636 = vmatpush3.xpose.msra.mxu1 %v3428_v31  ;;  %v4274_v31 = vld [vmem:[#allocation14_spill] sm:$0xff] }
 0x11b   : > { %2597 = vmatprep.subr.mxu0 %v4271_v10  ;;  %2637 = vmatprep.subr.mxu1 %v3442_v36 }
 0x11c   : > { %2661 = vmatprep.mubr.f32.mxu1 %v4269_v61 }
 0x11e   : > { %2598 = vmatpush3.xpose.msra.mxu0 %v4271_v10  ;;  %2638 = vmatpush3.xpose.msra.mxu1 %v3442_v36  ;;  %v4275_v36 = vld [vmem:[#allocation15_spill] sm:$0xff] }
 0x11f   : > { %2599 = vmatprep.subr.mxu0 %v4272_v28  ;;  %2639 = vmatprep.subr.mxu1 %v3464_v45 }
 0x122   : > { %2600 = vmatpush3.xpose.msra.mxu0 %v4272_v28  ;;  %2640 = vmatpush3.xpose.msra.mxu1 %v3464_v45  ;;  %v4276_v45 = vld [vmem:[#allocation16_spill] sm:$0xff]  ;;  %v3967_v28 = vcvt.s32.f32 %v2251_v46  ;;  %v2264_v46 = vunpack.c.3.s8 %v3948_v33 }
 0x123   : > { %2601 = vmatprep.subr.mxu0 %v4273_v40  ;;  %2641 = vmatprep.subr.mxu1 %v3479_v53 }
 0x126   : > { %2602 = vmatpush3.xpose.msra.mxu0 %v4273_v40  ;;  %2642 = vmatpush3.xpose.msra.mxu1 %v3479_v53  ;;  %v4278_v53 = vld [vmem:[#allocation18_spill] sm:$0xff]  ;;  %v2255_v40 = vunpack.c.2.s8 %v2250_v29 }
 0x127   : > { %2603 = vmatprep.subr.mxu0 %v4274_v31  ;;  %2643 = vmatprep.subr.mxu1 %v3509_v0 }
 0x12a   : > { %2604 = vmatpush3.xpose.msra.mxu0 %v4274_v31  ;;  %2644 = vmatpush3.xpose.msra.mxu1 %v3509_v0  ;;  %v4279_v0 = vld [vmem:[#allocation19_spill] sm:$0xff]  ;;  %v2260_v31 = vunpack.c.1.s8 %v3948_v33 }
 0x12b   : > { %2605 = vmatprep.subr.mxu0 %v4275_v36  ;;  %2645 = vmatprep.subr.mxu1 %v3517_v5 }
 0x12e   : > { %2606 = vmatpush3.xpose.msra.mxu0 %v4275_v36  ;;  %2646 = vmatpush3.xpose.msra.mxu1 %v3517_v5  ;;  %v4280_v5 = vld [vmem:[#allocation20_spill] sm:$0xff] }
 0x12f   : > { %2607 = vmatprep.subr.mxu0 %v4276_v45  ;;  %2647 = vmatprep.subr.mxu1 %v3536_v15 }
 0x132   : > { %2608 = vmatpush3.xpose.msra.mxu0 %v4276_v45  ;;  %2648 = vmatpush3.xpose.msra.mxu1 %v3536_v15 }
 0x133   : > { %2609 = vmatprep.subr.mxu0 %v4277_v51  ;;  %2649 = vmatprep.subr.mxu1 %v3554_v23 }
 0x136   : > { %2610 = vmatpush3.xpose.msra.mxu0 %v4277_v51  ;;  %2650 = vmatpush3.xpose.msra.mxu1 %v3554_v23 }
 0x137   : > { %2611 = vmatprep.subr.mxu0 %v4278_v53  ;;  %2651 = vmatprep.subr.mxu1 %v3568_v43 }
 0x13a   : > { %2612 = vmatpush3.xpose.msra.mxu0 %v4278_v53  ;;  %2652 = vmatpush3.xpose.msra.mxu1 %v3568_v43  ;;  %v3970_v53 = vcvt.s32.f32 %v2256_v59 }
 0x13b   : > { %2613 = vmatprep.subr.mxu0 %v4279_v0  ;;  %2653 = vmatprep.subr.mxu1 %v3582_v55 }
 0x13e   : > { %2614 = vmatpush3.xpose.msra.mxu0 %v4279_v0  ;;  %2654 = vmatpush3.xpose.msra.mxu1 %v3582_v55 }
 0x13f   : > { %2615 = vmatprep.subr.mxu0 %v4280_v5  ;;  %2655 = vmatprep.subr.mxu1 %v3596_v2 }
 0x142   : > { %2616 = vmatpush3.xpose.msra.mxu0 %v4280_v5  ;;  %2656 = vmatpush3.xpose.msra.mxu1 %v3596_v2 }
 0x143   : > { %2657 = vmatprep.subr.mxu1 %v3611_v16 }
 0x145   : > { %2618 = vmatmul.mubr.f32.vlgmr.msra.gmra.mxu0 %v3626_v44 }
 0x146   : > { %2658 = vmatpush3.xpose.msra.mxu1 %v3611_v16  ;;  %2620 = vmatprep.mubr.f32.mxu0 %v3644_v11 }
 0x147   : > { %2659 = vmatprep.subr.mxu1 %v3630_v48 }
 0x149   : > { %2621 = vmatmul.mubr.f32.gmra.mxu0 %v3649_v22 }
 0x14a   : > { %2660 = vmatpush3.xpose.msra.mxu1 %v3630_v48  ;;  %2623 = vmatprep.mubr.f32.mxu0 %v3668_v24 }
 0x14d   : > { %2624 = vmatmul.mubr.f32.gmra.mxu0 %v3674_v56  ;;  %2662 = vmatmul.mubr.f32.vlgmr.msra.gmra.mxu1 %v3626_v44 }
 0x14e   : > { %2626 = vmatprep.mubr.f32.mxu0 %v3689_v21  ;;  %2664 = vmatprep.mubr.f32.mxu1 %v3644_v11 }
 0x151   : > { %2627 = vmatmul.mubr.f32.gmra.mxu0 %v3698_v20  ;;  %2665 = vmatmul.mubr.f32.gmra.mxu1 %v3649_v22 }
 0x152   : > { %2667 = vmatprep.mubr.f32.mxu1 %v3668_v24 }
 0x155   : > { %2668 = vmatmul.mubr.f32.gmra.mxu1 %v3674_v56  ;;  %v1662_v56 = vlaneseq }
 0x156   : > { %2670 = vmatprep.mubr.f32.mxu1 %v3689_v21 }
 0x157   : > { %v3935_v42 = vshrl.u32 %v1662_v56, 7  ;;  %v1681_v17 = vand.u32 127, %v1662_v56 }
 0x159   : > { %2671 = vmatmul.mubr.f32.gmra.mxu1 %v3698_v20  ;;  %v1664_v1 = vadd.s32 8, %v3935_v42  ;;  %v3958_v41 = vadd.s32 %v3944_v57, %v3935_v42  ;;  %v1665_v39 = vadd.s32 16, %v3935_v42  ;;  %v1666_v61 = vadd.s32 24, %v3935_v42 }
 0x15a   : > { %v3965_v10 = vadd.s32 %v1682_v12, %v1681_v17 }
 0x15b   : > { %v3962_v54 = vadd.s32 %v3944_v57, %v1664_v1  ;;  %vm1684_vm1 = vcmp.lt.s32.totalorder %v3958_v41, 100 }
 0x15c   : > { %vm1692_vm3 = vcmp.lt.s32.totalorder %v3965_v10, 200 }
 0x15d   : > { %vm1685_vm2 = vcmp.lt.s32.totalorder %v3962_v54, 100  ;;  %vm4039_vm6 = vmand %vm1684_vm1, %vm1692_vm3 }
 0x15e   : > { %vm4052_vm7 = vmand %vm1685_vm2, %vm1692_vm3 }
 0x185   : > { %v2443_v13 = vpop.f32.mrf.mxu0 }
 0x187   : > { %v751_v15 = vpop.f32.mrf.mxu0 }
 0x189   : > { %v2446_v18 = vpop.f32.mrf.mxu0 }
 0x18b   : > { %v771_v23 = vpop.f32.mrf.mxu0 }
 0x18d   : > { %v2487_v19 = vpop.f32.mrf.mxu1  ;;  %v2449_v43 = vpop.f32.mrf.mxu0 }
 0x18e   : > { %v979_v52 = vadd.f32 %v2487_v19, %v2443_v13 }
 0x18f   : > { %v972_v25 = vpop.f32.mrf.mxu1  ;;  %v3908_v50 = vpop.f32.mrf.mxu0 }
 0x190   : > { %v973_v6 = vadd.f32 %v972_v25, %v751_v15  ;;  %v3976_v15 = vadd.s32 %v3944_v57, %v1665_v39  ;;  %v2263_v39 = vunpack.c.2.s8 %v3948_v33 }
 0x191   : > { %v2490_v49 = vpop.f32.mrf.mxu1  ;;  %v3910_v62 = vpop.f32.mrf.mxu0 }
 0x192   : > { %v991_v47 = vadd.f32 %v2490_v49, %v2446_v18  ;;  %v2259_v18 = vunpack.c.0.s8 %v3948_v33  ;;  %vm1686_vm4 = vcmp.lt.s32.totalorder %v3976_v15, 100 }
 0x193   : > { %v984_v55 = vpop.f32.mrf.mxu1  ;;  %v3912_v2 = vpop.f32.mrf.mxu0  ;;  %vm4065_vm9 = vmand %vm1686_vm4, %vm1692_vm3 }
 0x194   : > { %v985_v36 = vadd.f32 %v984_v55, %v771_v23  ;;  %v3980_v23 = vadd.s32 %v3944_v57, %v1666_v61  ;;  %v4001_v17 = vcvt.s32.f32 %v2259_v18 }
 0x195   : > { %v2493_v63 = vpop.f32.mrf.mxu1 }
 0x196   : > { %v1003_v0 = vadd.f32 %v2493_v63, %v2449_v43  ;;  %vm1687_vm5 = vcmp.lt.s32.totalorder %v3980_v23, 100 }
 0x197   : > { %v3914_v8 = vpop.f32.mrf.mxu1  ;;  %vm4079_vm10 = vmand %vm1687_vm5, %vm1692_vm3 }
 0x198   : > { %v997_v55 = vadd.f32 %v3914_v8, %v3908_v50 }
 0x199   : > { %v3916_v16 = vpop.f32.mrf.mxu1 }
 0x19a   : > { %v1015_v50 = vadd.f32 %v3916_v16, %v3910_v62 }
 0x19b   : > { %v3918_v44 = vpop.f32.mrf.mxu1 }
 0x19c   : > { %v1009_v12 = vadd.f32 %v3918_v44, %v3912_v2 }
 0x1c5   : > { %v2531_v9 = vpop.f32.mrf.mxu0 }
 0x1c6   : > { %v1126_v26 = vadd.f32 %v2531_v9, %v979_v52  ;;  %v1639_v9 = vld [vmem:[%s3985_s10 + $0x8] sm:$0xff]  ;;  %v1667_v52 = vadd.s32 32, %v3935_v42 }
 0x1c7   : > { %v1118_v37 = vpop.f32.mrf.mxu0 }
 0x1c8   : > { %v1119_v45 = vadd.f32 %v1118_v37, %v973_v6  ;;  %v3990_v37 = vcvt.s32.f32 %v2255_v40 }
 0x1c9   : > { %v2534_v48 = vpop.f32.mrf.mxu0 }
 0x1ca   : > { %v1140_v19 = vadd.f32 %v2534_v48, %v991_v47  ;;  %v3992_v48 = vcvt.s32.f32 %v2260_v31  ;;  %v4024_v31 = vcvt.s32.f32 %v2264_v46 }
 0x1cb   : > { %v3920_v11 = vpop.f32.mrf.mxu0 }
 0x1cc   : > { %v1133_v29 = vadd.f32 %v3920_v11, %v985_v36 }
 0x1cd   : > { %v2575_v7 = vpop.f32.mrf.mxu1  ;;  %v3922_v22 = vpop.f32.mrf.mxu0 }
 0x1ce   : > { %v1265_v51 = vadd.f32 %v2575_v7, %v1126_v26  ;;  %v1668_v7 = vadd.s32 40, %v3935_v42  ;;  %v1154_v62 = vadd.f32 %v3922_v22, %v1003_v0 }
 0x1cf   : > { %v1256_v14 = vpop.f32.mrf.mxu1  ;;  %v3927_v24 = vpop.f32.mrf.mxu0 }
 0x1d0   : > { %v1257_v25 = vadd.f32 %v1256_v14, %v1119_v45  ;;  %v4017_v22 = vadd.s32 %v3944_v57, %v1668_v7  ;;  %v1147_v47 = vadd.f32 %v3927_v24, %v997_v55  ;;  %v1642_v7 = vld [vmem:[%s3985_s10 + $0x20] sm:$0xff] }
 0x1d1   : > { %v3924_v20 = vpop.f32.mrf.mxu1  ;;  %v3931_v21 = vpop.f32.mrf.mxu0 }
 0x1d2   : > { %v1281_v8 = vadd.f32 %v3924_v20, %v1140_v19  ;;  %v1168_v44 = vadd.f32 %v3931_v21, %v1015_v50  ;;  %v1676_v19 = vadd.s32 %v3944_v57, %v1667_v52  ;;  %v1670_v50 = vadd.s32 56, %v3935_v42 }
 0x1d3   : > { %v3929_v4 = vpop.f32.mrf.mxu1  ;;  %v3937_v3 = vpop.f32.mrf.mxu0  ;;  %vm1689_vm11 = vcmp.lt.s32.totalorder %v4017_v22, 100 }
 0x1d4   : > { %v1273_v59 = vadd.f32 %v3929_v4, %v1133_v29  ;;  %v1161_v0 = vadd.f32 %v3937_v3, %v1009_v12  ;;  %vm1688_vm8 = vcmp.lt.s32.totalorder %v1676_v19, 100  ;;  %vm1716_vm14 = vmand %vm1689_vm11, %vm1692_vm3 }
 0x1d5   : > { %v3933_v30 = vpop.f32.mrf.mxu1  ;;  %vm4092_vm12 = vmand %vm1688_vm8, %vm1692_vm3 }
 0x1d6   : > { %v1297_v26 = vadd.f32 %v3933_v30, %v1154_v62 }
 0x1d7   : > { %v3939_v32 = vpop.f32.mrf.mxu1 }
 0x1d8   : > { %v1289_v36 = vadd.f32 %v3939_v32, %v1147_v47 }
 0x1d9   : > { %v3950_v34 = vpop.f32.mrf.mxu1 }
 0x1db   : > { %v3972_v5 = vpop.f32.mrf.mxu1 }
 0x1dc   : > { %v1305_v41 = vadd.f32 %v3972_v5, %v1161_v0  ;;  %v1645_v5 = vld [vmem:[%s3985_s10 + $0x38] sm:$0xff] }
 0x205   : > { %v2619_v58 = vpop.f32.mrf.mxu0 }
 0x206   : > { %v1438_v49 = vadd.f32 %v2619_v58, %v1265_v51  ;;  %v1638_v58 = vld [vmem:[%s3985_s10] sm:$0xff]  ;;  %v1640_v51 = vld [vmem:[%s3985_s10 + $0x10] sm:$0xff] }
 0x207   : > { %v1431_v35 = vpop.f32.mrf.mxu0 }
 0x208   : > { %v1432_v14 = vadd.f32 %v1431_v35, %v1257_v25  ;;  %v1641_v35 = vld [vmem:[%s3985_s10 + $0x18] sm:$0xff]  ;;  %v1313_v25 = vadd.f32 %v3950_v34, %v1168_v44 }
 0x209   : > { %v2622_v27 = vpop.f32.mrf.mxu0 }
 0x20a   : > { %v1450_v16 = vadd.f32 %v2622_v27, %v1281_v8 }
 0x20b   : > { %v1443_v13 = vpop.f32.mrf.mxu0 }
 0x20c   : > { %v1444_v4 = vadd.f32 %v1443_v13, %v1273_v59  ;;  %v1643_v13 = vld [vmem:[%s3985_s10 + $0x28] sm:$0xff]  ;;  %v1644_v59 = vld [vmem:[%s3985_s10 + $0x30] sm:$0xff] }
 0x20d   : > { %v2625_v43 = vpop.f32.mrf.mxu0  ;;  %v2663_v63 = vpop.f32.mrf.mxu1 }
 0x20e   : > { %v1567_v56 = vadd.f32 %v2663_v63, %v1438_v49  ;;  %v1462_v45 = vadd.f32 %v2625_v43, %v1297_v26 }
 0x20f   : > { %v1455_v60 = vpop.f32.mrf.mxu0  ;;  %v1560_v1 = vpop.f32.mrf.mxu1 }
 0x210   : > { %1607 = vst [vmem:[%s4007_s6 + $0x8] sm:$0xff] %v1567_v56  ;;  %v1647_v11 = vsub.f32 %v1567_v56, %v1639_v9  ;;  %v1561_v20 = vadd.f32 %v1560_v1, %v1432_v14  ;;  %v1456_v32 = vadd.f32 %v1455_v60, %v1289_v36  ;;  %v1636_v1 = vcvt.s32.f32 %v2263_v39 }
 0x211   : > { %v2666_v6 = vpop.f32.mrf.mxu1  ;;  %v2628_v40 = vpop.f32.mrf.mxu0 }
 0x212   : > { %1606 = vst [vmem:[%s4007_s6] sm:$0xff] %v1561_v20  ;;  %v1646_v61 = vsub.f32 %v1561_v20, %v1638_v58  ;;  %v1579_v2 = vadd.f32 %v2666_v6, %v1450_v16  ;;  %v1655_v27 = vmul.f32 %v1647_v11, %v3954_v38  ;;  %v1669_v38 = vadd.s32 48, %v3935_v42 }
 0x213   : > { %v1572_v33 = vpop.f32.mrf.mxu1  ;;  %v1467_v63 = vpop.f32.mrf.mxu0 }
 0x214   : > { %v1654_v24 = vmul.f32 %v1646_v61, %v3967_v28  ;;  %1609 = vst [vmem:[%s4007_s6 + $0x18] sm:$0xff] %v1579_v2  ;;  %v1649_v30 = vsub.f32 %v1579_v2, %v1641_v35  ;;  %v1573_v18 = vadd.f32 %v1572_v33, %v1444_v4  ;;  %v1720_v55 = vmul.f32 %v1655_v27, %v1655_v27 }
 0x215   : > { %v2669_v21 = vpop.f32.mrf.mxu1  ;;  %v1468_v54 = vadd.f32 %v1467_v63, %v1305_v41 }
 0x216   : > { %v1719_v3 = vmul.f32 %v1654_v24, %v1654_v24  ;;  %v1591_v49 = vadd.f32 %v2669_v21, %v1462_v45  ;;  %v1657_v43 = vmul.f32 %v1649_v30, %v3970_v53  ;;  %1608 = vst [vmem:[%s4007_s6 + $0x10] sm:$0xff] %v1573_v18  ;;  %v1648_v9 = vsub.f32 %v1573_v18, %v1640_v51 }
 0x217   : > { %v1584_v34 = vpop.f32.mrf.mxu1  ;;  %v1474_v53 = vadd.f32 %v2628_v40, %v1313_v25  ;;  %v1728_v62 = vsel %vm4052_vm7, %v1720_v55, 0.0 }
 0x218   : > { %1611 = vst [vmem:[%s4007_s6 + $0x28] sm:$0xff] %v1591_v49  ;;  %v1651_v14 = vsub.f32 %v1591_v49, %v1643_v13  ;;  %v1585_v56 = vadd.f32 %v1584_v34, %v1456_v32  ;;  %v1727_v29 = vsel %vm4039_vm6, %v1719_v3, 0.0  ;;  %v1656_v60 = vmul.f32 %v1648_v9, %v3990_v37 }
 0x219   : > { %v2672_v42 = vpop.f32.mrf.mxu1  ;;  %v1678_v37 = vadd.s32 %v3944_v57, %v1669_v38  ;;  %v1722_v16 = vmul.f32 %v1657_v43, %v1657_v43  ;;  %v1735_v15 = vadd.f32 %v1728_v62, %v1727_v29 }
 0x21a   : > { %1610 = vst [vmem:[%s4007_s6 + $0x20] sm:$0xff] %v1585_v56  ;;  %v1650_v46 = vsub.f32 %v1585_v56, %v1642_v7  ;;  %v1603_v52 = vadd.f32 %v2672_v42, %v1474_v53  ;;  %v1721_v11 = vmul.f32 %v1656_v60, %v1656_v60  ;;  %v1659_v20 = vmul.f32 %v1651_v14, %v3992_v48 }
 0x21b   : > { %v1596_v12 = vpop.f32.mrf.mxu1  ;;  %v1679_v48 = vadd.s32 %v3944_v57, %v1670_v50  ;;  %vm1690_vm13 = vcmp.lt.s32.totalorder %v1678_v37, 100  ;;  %v1730_v44 = vsel %vm4079_vm10, %v1722_v16, 0.0 }
 0x21c   : > { %v1658_v35 = vmul.f32 %v1650_v46, %v4001_v17  ;;  %1613 = vst [vmem:[%s4007_s6 + $0x38] sm:$0xff] %v1603_v52  ;;  %v1653_v39 = vsub.f32 %v1603_v52, %v1645_v5  ;;  %v1597_v47 = vadd.f32 %v1596_v12, %v1468_v54  ;;  %v1729_v26 = vsel %vm4065_vm9, %v1721_v11, 0.0  ;;  %vm1717_vm0 = vmand %vm1690_vm13, %vm1692_vm3 }
 0x21d   : > { %v1736_v61 = vadd.f32 %v1735_v15, %v1729_v26  ;;  %v1724_v4 = vmul.f32 %v1659_v20, %v1659_v20  ;;  %vm1691_vm15 = vcmp.lt.s32.totalorder %v1679_v48, 100 }
 0x21e   : > { %v1723_v2 = vmul.f32 %v1658_v35, %v1658_v35  ;;  %1612 = vst [vmem:[%s4007_s6 + $0x30] sm:$0xff] %v1597_v47  ;;  %v1652_v17 = vsub.f32 %v1597_v47, %v1644_v59  ;;  %v1661_v57 = vmul.f32 %v1653_v39, %v4024_v31  ;;  %vm1718_vm1 = vmand %vm1691_vm15, %vm1692_vm3 }
 0x21f   : > { %v1737_v40 = vadd.f32 %v1736_v61, %v1730_v44  ;;  %v1732_v24 = vsel %vm1716_vm14, %v1724_v4, 0.0 }
 0x220   : > { %v1660_v27 = vmul.f32 %v1652_v17, %v1636_v1  ;;  %v1731_v22 = vsel %vm4092_vm12, %v1723_v2, 0.0  ;;  %v1726_v45 = vmul.f32 %v1661_v57, %v1661_v57 }
 0x221   : > { %v1738_v36 = vadd.f32 %v1737_v40, %v1731_v22 }
 0x222   : > { %v1725_v33 = vmul.f32 %v1660_v27, %v1660_v27  ;;  %v1734_v0 = vsel %vm1718_vm1, %v1726_v45, 0.0 }
 0x223   : > { %v1739_v30 = vadd.f32 %v1738_v36, %v1732_v24 }
 0x224   : > { %v1733_v31 = vsel %vm1717_vm0, %v1725_v33, 0.0 }
 0x225   : > { %v1740_v51 = vadd.f32 %v1739_v30, %v1733_v31 }
 0x227   : > { %v1741_v18 = vadd.f32 %v1740_v51, %v1734_v0 }
 0x229   : > { %1742 = vadd.xlane.f32.xlu0 %v1741_v18 }
 0x2b2   : > { %v1743_v21 = vpop.xlane.xlu0 %1742 }
 0x2b3   : > { %v1744_v13 = vrot.slane %v1743_v21, 4 }
 0x2b5   : > { %v1745_v38 = vadd.f32 %v1744_v13, %v1743_v21 }
 0x2b7   : > { %v1746_v19 = vrot.slane %v1745_v38, 2 }
 0x2b9   : > { %v1747_v25 = vadd.f32 %v1746_v19, %v1745_v38 }
 0x2bb   : > { %v1748_v32 = vrot.slane %v1747_v25, 1 }
 0x2bd   : > { %v1749_v28 = vadd.f32 %v1748_v32, %v1747_v25 }
 0x2bf   : > { %2676 = vpush %v1749_v28 }
 0x2ec   : > { %1754 = sbr.rel (%p2221_p2) target bundleno = 755 (0x2f3), region = 140 }
 0x2f0   : > { %s2677_s7 = spop %2676 }
 0x2f1   : > { %v3175_v10 = vmov 0.0  }
 0x2f2   : > { %1755 = vst [vmem:[%s3426_s12] sm:$0xff] %v3175_v10 }
 0x2f3 PF: > { %v1757_v49 = vstv %s2677_s7  ;;  %s2223_s28 = sshll.u32 (%p3258_p6), %s3065_s21, 3  ;;  %s2246_s17 = sshll.u32 (%p3258_p6), %s3065_s21, 4 }
 0x2f4   : > { %s1772_s2 = ssub.s32 (%p3258_p6), 13, %s2223_s28  ;;  %s1778_s27 = sadd.s32 (%p3258_p6), %s3061_s20, %s2246_s17 }
 0x2f5   : > { %p1773_p3 = scmp.lt.s32.totalorder (%p3258_p6), %s1772_s2, 8  ;;  %s2227_s16 = sshll.u32 (%p3258_p6), %s1778_s27, 3 }
 0x2f6   : > { %s4120_s11 = scalar_lea.vmem (%p3258_p6), %s4197_s4, %s2227_s16  }
 0x2f8   : > { %1770 = sbr.rel (!%p3258_p6) target bundleno = 804 (0x324), region = 144 }
 0x2f9   : > { %v1756_v3 = vld [vmem:[%s3426_s12] sm:$0xff] }
 0x2fa   : > { %v1758_v55 = vadd.f32 %v1757_v49, %v1756_v3 }
 0x2fc   : > { %1759 = vst [vmem:[%s3426_s12] sm:$0xff] %v1758_v55 }
 0x2fd   : > { %s4320_s2 = smov (!%p1773_p3, %s1772_s2), 8 }
 0x2fe   : > { %s2224_s12 = sshll.u32 %s4320_s2, 7 }
 0x2ff   : > { %p2228_p4 = scmp.eq.s32.totalorder %s2224_s12, 0 }
 0x300   : > { %s4126_s30 = sshrl.u32 (!%p2228_p4), %s4320_s2, 3 }
 0x301   : > { %1783 = sbr.rel (%p2228_p4) target bundleno = 804 (0x324), region = 148  ;;  %p2229_p6 = scmp.le.s32.totalorder (!%p2228_p4), %s4126_s30, 0 }
 0x306   : > { %2108 = sbr.rel (%p2229_p6) target bundleno = 787 (0x313), region = 311  ;;  %s4291_s20 = smov (!%p2229_p6), %s4120_s11 }
 0x307   : > { %s4292_s21 = smov (!%p2229_p6), %s4007_s6  ;;  %s4135_s13 = smov (!%p2229_p6), 0  }
 0x308   : > { %s4137_s14 = smov (!%p2229_p6), 0  }
 0x30b LB: >> { %v1860_v43 = vld [vmem:[%s3149_s21] sm:$0xff]  ;;  %v1862_v63 = vld [vmem:[%s3149_s21 + $0x8] sm:$0xff]  ;;  %v1864_v9 = vld [vmem:[%s3149_s21 + $0x10] sm:$0xff]  ;;  %s1876_s29 = sadd.s32 1, %s3153_s13  ;;  %s1854_s14 = sadd.s32 1, %s3157_s14   ;;  %s3157_s14 = sphi %s4137_s14, %s1854_s14   ;;  %s3153_s13 = sphi %s4135_s13, %s4293_s13   ;;  %s3149_s21 = sphi %s4292_s21, %s1881_s21   ;;  %s3145_s20 = sphi %s4291_s20, %s1882_s20  }
 0x30c   : >> { %1861 = vst [vmem:[%s3145_s20] sm:$0xff] %v1860_v43  ;;  %1863 = vst [vmem:[%s3145_s20 + $0x10] sm:$0xff] %v1862_v63  ;;  %v1866_v34 = vld [vmem:[%s3149_s21 + $0x18] sm:$0xff]  ;;  %v1868_v7 = vld [vmem:[%s3149_s21 + $0x20] sm:$0xff]  ;;  %p1877_p5 = scmp.ge.s32.totalorder %s1876_s29, %s4126_s30  ;;  %p1853_p7 = scmp.ge.s32.totalorder %s1854_s14, %s4126_s30 }
 0x30d   : >> { %1865 = vst [vmem:[%s3145_s20 + $0x20] sm:$0xff] %v1864_v9  ;;  %v1870_v50 = vld [vmem:[%s3149_s21 + $0x28] sm:$0xff]  ;;  %1867 = vst [vmem:[%s3145_s20 + $0x30] sm:$0xff] %v1866_v34  ;;  %v1872_v41 = vld [vmem:[%s3149_s21 + $0x30] sm:$0xff] }
 0x30e   : >> { %1869 = vst [vmem:[%s3145_s20 + $0x40] sm:$0xff] %v1868_v7  ;;  %1871 = vst [vmem:[%s3145_s20 + $0x50] sm:$0xff] %v1870_v50  ;;  %v1874_v8 = vld [vmem:[%s3149_s21 + $0x38] sm:$0xff]  ;;  %s4322_s29 = smov (%p1877_p5, %s1876_s29), 0  ;;  %1856 = sbr.rel (!%p1853_p7) target bundleno = 779 (0x30b), region = 317 }
 0x30f   : >> { %1873 = vst [vmem:[%s3145_s20 + $0x60] sm:$0xff] %v1872_v41  ;;  %1875 = vst [vmem:[%s3145_s20 + $0x70] sm:$0xff] %v1874_v8  ;;  %s2230_s15 = sshll.u32 %s4322_s29, 6  ;;  %s2231_s18 = sshll.u32 %s4322_s29, 7 }
 0x310   : >> { %s1881_s21 = scalar_lea.vmem %s4007_s6, %s2230_s15 [#allocation4]   ;;  %s1882_s20 = scalar_lea.vmem %s4120_s11, %s2231_s18  }
 0x311   : >> { %s4293_s13 = smov %s4322_s29 }
 0x313 PF: > { %s4159_s10 = sand.u32 7, %s4320_s2   ;;  %s2247_s7 = sshll.u32 %s4126_s30, 6 }
 0x314   : > { %s4163_s28 = scalar_lea.vmem %s4007_s6, %s2247_s7 [#allocation4]   ;;  %s2248_s17 = sshll.u32 %s4126_s30, 7 }
 0x315   : > { %s1889_s27 = scalar_lea.vmem %s4120_s11, %s2248_s17   ;;  %p2235_p8 = scmp.le.s32.totalorder %s4159_s10, 0 }
 0x316   : > { %s3159_s16 = smov (!%p2235_p8), %s1889_s27   ;;  %s3163_s8 = smov (!%p2235_p8), %s4163_s28  }
 0x317   : > { %2122 = sbr.rel (%p2235_p8) target bundleno = 804 (0x324), region = 322  ;;  %s3167_s26 = smov (!%p2235_p8), 0  }
 0x318   : > { %s3171_s12 = smov (!%p2235_p8), 0  }
 0x31c LB: >> { %v1899_v53 = vld [vmem:[%s3165_s8] sm:$0xff]  ;;  %s1901_s6 = sadd.s32 1, %s3169_s26  ;;  %s1893_s12 = sadd.s32 1, %s3173_s12   ;;  %s3173_s12 = sphi %s3171_s12, %s1893_s12   ;;  %s3169_s26 = sphi %s3167_s26, %s3168_s26   ;;  %s3165_s8 = sphi %s3163_s8, %s1906_s8   ;;  %s3161_s16 = sphi %s3159_s16, %s1907_s16  }
 0x31d   : >> { %1900 = vst [vmem:[%s3161_s16] sm:$0xff] %v1899_v53  ;;  %p1902_p9 = scmp.ge.s32.totalorder %s1901_s6, %s4159_s10  ;;  %p1892_p10 = scmp.ge.s32.totalorder %s1893_s12, %s4159_s10 }
 0x31f   : >> { %s4324_s6 = smov (%p1902_p9, %s1901_s6), 0  ;;  %1895 = sbr.rel (!%p1892_p10) target bundleno = 796 (0x31c), region = 328 }
 0x320   : >> { %s2236_s2 = sshll.u32 %s4324_s6, 3  ;;  %s2237_s11 = sshll.u32 %s4324_s6, 4 }
 0x321   : >> { %s1906_s8 = scalar_lea.vmem %s4163_s28, %s2236_s2 [#allocation4]   ;;  %s1907_s16 = scalar_lea.vmem %s1889_s27, %s2237_s11  }
 0x322   : >> { %s3168_s26 = smov %s4324_s6  }
 0x324 PF: > { %s16_s24 = sadd.s32 1, %s3077_s24   ;;  %s4294_s30 = sld [smem:[#allocation5_spill]] }
 0x325   : > { %p13_p11 = scmp.ge.s32.totalorder %s16_s24, 6   ;;  %s4295_s18 = smov %s3057_s19 }
 0x326   : > { %s4296_s19 = smov %s3266_s9  ;;  %s4297_s20 = smov %s3069_s22 }
 0x327   : > { %s4298_s21 = smov %s3073_s23  ;;  %s4299_s22 = smov %s4302_s25 }
 0x328   :  { %15 = sbr.rel (!%p13_p11) target bundleno = 6 (0x6), region = 339 }
 0x32a   : > { %s4300_s23 = smov %s4294_s30 }

// kernel: pna_imc_forward.3
= control target key start
LH: loop header
LB: loop body
LE: loop exit
PB: predicated region body
PF: predicated region fallthrough
CT: control target
= control target key end

     0   :  { %s3969_s21 = smov 0   ;;  %s3971_s22 = smov 0   ;;  %s4776_s0 = inlined_call_operand.vmem [shape: f32[100,64], index: 0, kind: input, shape index: {}]   ;;  %s4777_s1 = inlined_call_operand.vmem [shape: f32[64,32], index: 1, kind: input, shape index: {}]   ;;  %s4778_s2 = inlined_call_operand.vmem [shape: f32[1,32], index: 2, kind: input, shape index: {}]   ;;  %s4779_s3 = inlined_call_operand.vmem [shape: f32[32,16], index: 3, kind: input, shape index: {}]   ;;  %s4780_s4 = inlined_call_operand.vmem [shape: f32[1,16], index: 4, kind: input, shape index: {}]   ;;  %s4781_s5 = inlined_call_operand.vmem [shape: f32[16,8], index: 5, kind: input, shape index: {}]   ;;  %s4782_s6 = inlined_call_operand.vmem [shape: f32[100,8], index: 6, kind: output, shape index: {}]  }
   0x1   :  { %s3973_s23 = smov 0  }
   0x2 LB: > { %s3982_s24 = sadd.s32 4294967295, %s3900_s23   ;;  %s3984_s25 = sadd.s32 1, %s3900_s23   ;;  %s3900_s23 = sphi %s3973_s23, %s4789_s23   ;;  %s3896_s22 = sphi %s3971_s22, %s4788_s22   ;;  %s3892_s21 = sphi %s3969_s21, %s4787_s21  }
   0x3   : > { %s151_s26 = ssub.s32 %s3900_s23, %s3984_s25  ;;  %s154_s27 = sadd.s32 1, %s3896_s22 }
   0x4   : > { %p152_p0 = scmp.eq.s32.totalorder %s151_s26, 0  ;;  %p164_p1 = scmp.ne.s32.totalorder %s3896_s22, %s3892_s21 }
   0x5   : > { %p165_p2 = scmp.eq.s32.totalorder %s3982_s24, 1  ;;  %p3104_p3 = scmp.ge.s32.totalorder %s3900_s23, 1 }
   0x6   : > { %s3992_s28 = scalar_select %p152_p0, %s3896_s22, %s154_s27  }
   0x7   : > { %p3994_p4 = por %p165_p2, %p164_p1  ;;  %p221_p5 = scmp.lt.s32.totalorder %s3900_s23, 3 }
   0x9   : > { %p222_p6 = pnand %p3104_p3, %p221_p5 }
   0xa   : > { %s4008_s12 = sshll.u32 (!%p222_p6), %s3982_s24, 3 }
   0xb   : > { %225 = sbr.rel (%p222_p6) target bundleno = 991 (0x3df), region = 44  ;;  %p259_p7 = scmp.lt.s32.totalorder (!%p222_p6), %s4008_s12, 12 }
  0x10   : > { %v288_v0 = vld [vmem:[%s4777_s1 + $0x38] sm:$0xff]  ;;  %v287_v1 = vld [vmem:[%s4777_s1 + $0x30] sm:$0xff]  ;;  %v286_v2 = vld [vmem:[%s4777_s1 + $0x28] sm:$0xff]  ;;  %vm296_vm0 = vcmask 523264   ;;  %s260_s27 = scalar_select %p259_p7, %s4008_s12, 12  ;;  %vm1170_vm1 = vcmask 261120  }
  0x11   : > { %v4010_v3 = vand.u32 4294901760, %v288_v0  ;;  %v4012_v4 = vand.u32 4294901760, %v287_v1  ;;  %v4014_v5 = vand.u32 4294901760, %v286_v2  ;;  %v285_v6 = vld [vmem:[%s4777_s1 + $0x20] sm:$0xff]  ;;  %v284_v7 = vld [vmem:[%s4777_s1 + $0x18] sm:$0xff]  ;;  %v283_v8 = vld [vmem:[%s4777_s1 + $0x10] sm:$0xff] }
  0x12   : > { %v4025_v9 = vand.u32 4294901760, %v285_v6  ;;  %v4027_v10 = vand.u32 4294901760, %v284_v7  ;;  %v4029_v11 = vand.u32 4294901760, %v283_v8  ;;  %v282_v12 = vld [vmem:[%s4777_s1 + $0x8] sm:$0xff]  ;;  %v281_v13 = vld [vmem:[%s4777_s1] sm:$0xff]  ;;  %s3107_s30 = sshll.u32 %s260_s27, 3 }
  0x13   : > { %3358 = vmatprep.subr.mxu0 %v4010_v3  ;;  %v4040_v14 = vsub.f32 %v288_v0, %v4010_v3  ;;  %v4043_v15 = vsub.f32 %v287_v1, %v4012_v4  ;;  %v4046_v16 = vsub.f32 %v286_v2, %v4014_v5  ;;  %v4048_v17 = vand.u32 4294901760, %v282_v12  ;;  %s4099_s9 = scalar_lea.vmem %s4776_s0, %s3107_s30  ;;  %s2865_s11 = ssub.s32 (%p3994_p4), 13, %s4008_s12 }
  0x14   : > { %3359 = vmatpush3.msra.mxu0 %v4010_v3  ;;  %v4052_v18 = vsub.f32 %v285_v6, %v4025_v9  ;;  %v4054_v19 = vand.u32 4294901760, %v281_v13  ;;  %v4058_v20 = vsub.f32 %v284_v7, %v4027_v10  ;;  %v4061_v21 = vsub.f32 %v283_v8, %v4029_v11  ;;  %v273_v34 = vld [vmem:[%s4099_s9] sm:$0xff]  ;;  %v274_v36 = vld [vmem:[%s4099_s9 + $0x8] sm:$0xff]  ;;  %v275_v38 = vld [vmem:[%s4099_s9 + $0x10] sm:$0xff]  ;;  %s3127_s13 = sshll.u32 (%p3994_p4), %s3982_s24, 6  ;;  %p2866_p8 = scmp.lt.s32.totalorder (%p3994_p4), %s2865_s11, 8 }
  0x15   : > { %3360 = vmatprep.subr.mxu0 %v4012_v4  ;;  %v4065_v22 = vand.u32 4294901760, %v4040_v14  ;;  %v4068_v23 = vand.u32 4294901760, %v4043_v15  ;;  %v4071_v24 = vand.u32 4294901760, %v4046_v16  ;;  %v4074_v25 = vsub.f32 %v282_v12, %v4048_v17  ;;  %v276_v43 = vld [vmem:[%s4099_s9 + $0x18] sm:$0xff]  ;;  %v277_v48 = vld [vmem:[%s4099_s9 + $0x20] sm:$0xff]  ;;  %v278_v57 = vld [vmem:[%s4099_s9 + $0x28] sm:$0xff]  ;;  %s4722_s16 = scalar_lea.vmem (%p3994_p4), %s4782_s6, %s3127_s13  }
  0x16   : > { %3361 = vmatpush3.msra.mxu0 %v4012_v4  ;;  %v4078_v26 = vand.u32 4294901760, %v4052_v18  ;;  %v4081_v27 = vand.u32 4294901760, %v4058_v20  ;;  %v4084_v28 = vand.u32 4294901760, %v4061_v21  ;;  %v4087_v29 = vsub.f32 %v281_v13, %v4054_v19  ;;  %v279_v58 = vld [vmem:[%s4099_s9 + $0x30] sm:$0xff]  ;;  %v280_v6 = vld [vmem:[%s4099_s9 + $0x38] sm:$0xff]  ;;  %s251_s9 = sand.u32 1, %s3892_s21  }
  0x17   : > { %3362 = vmatprep.subr.mxu0 %v4014_v5  ;;  %v494_v30 = vsub.f32 %v4040_v14, %v4065_v22  ;;  %v501_v31 = vsub.f32 %v4043_v15, %v4068_v23  ;;  %v508_v32 = vsub.f32 %v4046_v16, %v4071_v24  ;;  %v298_v41 = vsel %vm296_vm0, %v273_v34, 0  ;;  %s3105_s10 = sshll.u32 %s251_s9, 6 }
  0x18   : > { %3363 = vmatpush3.msra.mxu0 %v4014_v5  ;;  %v515_v33 = vsub.f32 %v4052_v18, %v4078_v26  ;;  %v522_v35 = vsub.f32 %v4058_v20, %v4081_v27  ;;  %v529_v37 = vsub.f32 %v4061_v21, %v4084_v28  ;;  %v4114_v42 = vand.u32 4294901760, %v4074_v25  ;;  %s4696_s21 = scalar_lea.vmem [#allocation2], %s3105_s10  }
  0x19   : > { %3364 = vmatprep.subr.mxu0 %v4025_v9  ;;  %v495_v39 = vand.u32 4294901760, %v494_v30  ;;  %v502_v40 = vand.u32 4294901760, %v501_v31  ;;  %v509_v44 = vand.u32 4294901760, %v508_v32  ;;  %v4118_v45 = vand.u32 4294901760, %v298_v41 }
  0x1a   : > { %3365 = vmatpush3.msra.mxu0 %v4025_v9  ;;  %v301_v46 = vsel %vm296_vm0, %v274_v36, 0  ;;  %v4122_v47 = vand.u32 4294901760, %v4087_v29  ;;  %v516_v49 = vand.u32 4294901760, %v515_v33  ;;  %v523_v50 = vand.u32 4294901760, %v522_v35 }
  0x1b   : > { %3386 = vmatprep.subr.mxu1 %v495_v39  ;;  %3366 = vmatprep.subr.mxu0 %v4027_v10  ;;  %v4126_v51 = vand.u32 4294901760, %v301_v46  ;;  %v304_v52 = vsel %vm296_vm0, %v275_v38, 0  ;;  %v4131_v53 = vsub.f32 %v298_v41, %v4118_v45  ;;  %v530_v54 = vand.u32 4294901760, %v529_v37 }
  0x1c   : > { %3387 = vmatpush3.msra.mxu1 %v495_v39  ;;  %3367 = vmatpush3.msra.mxu0 %v4027_v10  ;;  %v4133_v55 = vand.u32 4294901760, %v304_v52  ;;  %v307_v56 = vsel %vm296_vm0, %v276_v43, 0  ;;  %v536_v60 = vsub.f32 %v4074_v25, %v4114_v42  ;;  %v310_v62 = vsel %vm296_vm0, %v277_v48, 0 }
  0x1d   : > { %3388 = vmatprep.subr.mxu1 %v502_v40  ;;  %3368 = vmatprep.subr.mxu0 %v4029_v11  ;;  %v4140_v59 = vsub.f32 %v301_v46, %v4126_v51  ;;  %v4144_v61 = vand.u32 4294901760, %v307_v56  ;;  %v396_v63 = vand.u32 4294901760, %v4131_v53  ;;  %v543_v1 = vsub.f32 %v4087_v29, %v4122_v47 }
  0x1e   : > { %3389 = vmatpush3.msra.mxu1 %v502_v40  ;;  %3369 = vmatpush3.msra.mxu0 %v4029_v11  ;;  %v4150_v0 = vsub.f32 %v304_v52, %v4133_v55  ;;  %v4154_v2 = vand.u32 4294901760, %v310_v62  ;;  %v313_v12 = vsel %vm296_vm0, %v278_v57, 0  ;;  %v316_v13 = vsel %vm296_vm0, %v279_v58, 0 }
  0x1f   : > { %3390 = vmatprep.subr.mxu1 %v509_v44  ;;  %3370 = vmatprep.subr.mxu0 %v4048_v17  ;;  %v406_v7 = vand.u32 4294901760, %v4140_v59  ;;  %v4160_v8 = vsub.f32 %v307_v56, %v4144_v61  ;;  %v397_v30 = vsub.f32 %v4131_v53, %v396_v63  ;;  %v4172_v33 = vand.u32 4294901760, %v313_v12 }
  0x20   : > { %3391 = vmatpush3.msra.mxu1 %v509_v44  ;;  %3371 = vmatpush3.msra.mxu0 %v4048_v17  ;;  %v416_v31 = vand.u32 4294901760, %v4150_v0  ;;  %v4170_v32 = vsub.f32 %v310_v62, %v4154_v2  ;;  %v4179_v36 = vand.u32 4294901760, %v316_v13  ;;  %v319_v37 = vsel %vm296_vm0, %v280_v6, 0 }
  0x21   : > { %3392 = vmatprep.subr.mxu1 %v516_v49  ;;  %3372 = vmatprep.subr.mxu0 %v4054_v19  ;;  %v407_v34 = vsub.f32 %v4140_v59, %v406_v7  ;;  %v426_v35 = vand.u32 4294901760, %v4160_v8  ;;  %v398_v38 = vand.u32 4294901760, %v397_v30  ;;  %v4188_v41 = vsub.f32 %v313_v12, %v4172_v33 }
  0x22   : > { %3393 = vmatpush3.msra.mxu1 %v516_v49  ;;  %3373 = vmatpush3.msra.mxu0 %v4054_v19  ;;  %v417_v39 = vsub.f32 %v4150_v0, %v416_v31  ;;  %v436_v40 = vand.u32 4294901760, %v4170_v32  ;;  %v4195_v46 = vsub.f32 %v316_v13, %v4179_v36  ;;  %v4197_v48 = vand.u32 4294901760, %v319_v37 }
  0x23   : > { %3394 = vmatprep.subr.mxu1 %v523_v50  ;;  %v408_v43 = vand.u32 4294901760, %v407_v34  ;;  %3414 = vmatprep.subr.mxu0 %v4040_v14  ;;  %v427_v44 = vsub.f32 %v4160_v8, %v426_v35  ;;  %v537_v52 = vand.u32 4294901760, %v536_v60  ;;  %v446_v56 = vand.u32 4294901760, %v4188_v41 }
  0x24   : > { %3374 = vmatprep.mubr.f32.mxu0 %v398_v38  ;;  %3395 = vmatpush3.msra.mxu1 %v523_v50  ;;  %v418_v49 = vand.u32 4294901760, %v417_v39  ;;  %v437_v58 = vsub.f32 %v4170_v32, %v436_v40  ;;  %v4204_v62 = vsub.f32 %v319_v37, %v4197_v48  ;;  %v544_v6 = vand.u32 4294901760, %v543_v1 }
  0x25   : > { %3375 = vmatmul.mubr.f32.vlgmr.msra.gmra.mxu0 %v408_v43  ;;  %3396 = vmatprep.subr.mxu1 %v530_v54  ;;  %v428_v57 = vand.u32 4294901760, %v427_v44  ;;  %v447_v50 = vsub.f32 %v4188_v41, %v446_v56  ;;  %v456_v60 = vand.u32 4294901760, %v4195_v46  ;;  %vm2013_vm4 = vcmask 130048  }
  0x26   : > { %3415 = vmatpush3.msra.mxu0 %v4040_v14  ;;  %3397 = vmatpush3.msra.mxu1 %v530_v54  ;;  %v438_v12 = vand.u32 4294901760, %v437_v58  ;;  %v466_v13 = vand.u32 4294901760, %v4204_v62  ;;  %vm2848_vm11 = vcmask 64512  }
  0x27   : > { %3416 = vmatprep.subr.mxu0 %v4043_v15  ;;  %3377 = vmatprep.mubr.f32.mxu0 %v418_v49  ;;  %v448_v14 = vand.u32 4294901760, %v447_v50  ;;  %v457_v54 = vsub.f32 %v4195_v46, %v456_v60 }
  0x28   : > { %3398 = vmatprep.subr.mxu1 %v537_v52  ;;  %3417 = vmatpush3.msra.mxu0 %v4043_v15  ;;  %v467_v15 = vsub.f32 %v4204_v62, %v466_v13 }
  0x29   : > { %3378 = vmatmul.mubr.f32.gmra.mxu0 %v428_v57  ;;  %3399 = vmatpush3.msra.mxu1 %v537_v52  ;;  %v3108_v52 = vld [vmem:[%s4778_s2] ss:$0 sm:$0xff] }
  0x2a   : > { %3418 = vmatprep.subr.mxu0 %v4046_v16  ;;  %3400 = vmatprep.subr.mxu1 %v544_v6  ;;  %v468_v1 = vand.u32 4294901760, %v467_v15 }
  0x2b   : > { %3419 = vmatpush3.msra.mxu0 %v4046_v16  ;;  %3401 = vmatpush3.msra.mxu1 %v544_v6  ;;  %v458_v16 = vand.u32 4294901760, %v457_v54 }
  0x2c   : > { %3402 = vmatprep.mubr.f32.mxu1 %v4118_v45  ;;  %3420 = vmatprep.subr.mxu0 %v4052_v18 }
  0x2d   : > { %3380 = vmatprep.mubr.f32.mxu0 %v438_v12  ;;  %3403 = vmatmul.mubr.f32.vlgmr.msra.gmra.mxu1 %v4126_v51 }
  0x2e   : > { %3421 = vmatpush3.msra.mxu0 %v4052_v18  ;;  %3442 = vmatprep.subr.mxu1 %v4010_v3 }
  0x2f   : > { %3381 = vmatmul.mubr.f32.gmra.mxu0 %v448_v14  ;;  %3422 = vmatprep.subr.mxu0 %v4058_v20 }
  0x30   : > { %3443 = vmatpush3.msra.mxu1 %v4010_v3  ;;  %3423 = vmatpush3.msra.mxu0 %v4058_v20  ;;  %v1159_v20 = vld [vmem:[%s4779_s3] sm:$0xff] }
  0x31   : > { %3444 = vmatprep.subr.mxu1 %v4012_v4  ;;  %3405 = vmatprep.mubr.f32.mxu1 %v4133_v55 }
  0x32   : > { %3424 = vmatprep.subr.mxu0 %v4061_v21  ;;  %3445 = vmatpush3.msra.mxu1 %v4012_v4 }
  0x33   : > { %3383 = vmatprep.mubr.f32.mxu0 %v458_v16  ;;  %3406 = vmatmul.mubr.f32.gmra.mxu1 %v4144_v61 }
  0x34   : > { %3425 = vmatpush3.msra.mxu0 %v4061_v21  ;;  %3446 = vmatprep.subr.mxu1 %v4014_v5 }
  0x35   : > { %3384 = vmatmul.mubr.f32.gmra.mxu0 %v468_v1  ;;  %3426 = vmatprep.subr.mxu0 %v4074_v25 }
  0x36   : > { %3447 = vmatpush3.msra.mxu1 %v4014_v5  ;;  %3427 = vmatpush3.msra.mxu0 %v4074_v25 }
  0x37   : > { %3448 = vmatprep.subr.mxu1 %v4025_v9  ;;  %3408 = vmatprep.mubr.f32.mxu1 %v4154_v2 }
  0x38   : > { %3428 = vmatprep.subr.mxu0 %v4087_v29  ;;  %3449 = vmatpush3.msra.mxu1 %v4025_v9 }
  0x39   : > { %3409 = vmatmul.mubr.f32.gmra.mxu1 %v4172_v33  ;;  %3429 = vmatpush3.msra.mxu0 %v4087_v29 }
  0x3a   : > { %3430 = vmatprep.mubr.f32.mxu0 %v4131_v53  ;;  %3450 = vmatprep.subr.mxu1 %v4027_v10 }
  0x3b   : > { %3431 = vmatmul.mubr.f32.vlgmr.msra.gmra.mxu0 %v4140_v59  ;;  %3451 = vmatpush3.msra.mxu1 %v4027_v10 }
  0x3c   : > { %3470 = vmatprep.subr.mxu0 %v4065_v22  ;;  %3452 = vmatprep.subr.mxu1 %v4029_v11 }
  0x3d   : > { %3471 = vmatpush3.msra.mxu0 %v4065_v22  ;;  %3411 = vmatprep.mubr.f32.mxu1 %v4179_v36 }
  0x3e   : > { %3453 = vmatpush3.msra.mxu1 %v4029_v11  ;;  %3472 = vmatprep.subr.mxu0 %v4068_v23 }
  0x3f   : > { %3412 = vmatmul.mubr.f32.gmra.mxu1 %v4197_v48  ;;  %3433 = vmatprep.mubr.f32.mxu0 %v4150_v0 }
  0x40   : > { %3454 = vmatprep.subr.mxu1 %v4048_v17  ;;  %3473 = vmatpush3.msra.mxu0 %v4068_v23 }
  0x41   : > { %3434 = vmatmul.mubr.f32.gmra.mxu0 %v4160_v8  ;;  %3455 = vmatpush3.msra.mxu1 %v4048_v17 }
  0x42   : > { %3474 = vmatprep.subr.mxu0 %v4071_v24  ;;  %3456 = vmatprep.subr.mxu1 %v4054_v19 }
  0x43   : > { %3475 = vmatpush3.msra.mxu0 %v4071_v24  ;;  %3457 = vmatpush3.msra.mxu1 %v4054_v19  ;;  %v4367_v24 = vand.u32 4294901760, %v1159_v20 }
  0x44   : > { %3458 = vmatprep.mubr.f32.mxu1 %v396_v63  ;;  %3476 = vmatprep.subr.mxu0 %v4078_v26 }
  0x45   : > { %3436 = vmatprep.mubr.f32.mxu0 %v4170_v32  ;;  %3459 = vmatmul.mubr.f32.vlgmr.msra.gmra.mxu1 %v406_v7 }
  0x46   : > { %3477 = vmatpush3.msra.mxu0 %v4078_v26  ;;  %3498 = vmatprep.subr.mxu1 %v4010_v3 }
  0x47   : > { %3437 = vmatmul.mubr.f32.gmra.mxu0 %v4188_v41  ;;  %3478 = vmatprep.subr.mxu0 %v4081_v27 }
  0x48   : > { %3499 = vmatpush3.msra.mxu1 %v4010_v3  ;;  %3479 = vmatpush3.msra.mxu0 %v4081_v27  ;;  %v1162_v3 = vld [vmem:[%s4779_s3 + $0x18] sm:$0xff] }
  0x49   : > { %3500 = vmatprep.subr.mxu1 %v4012_v4  ;;  %3461 = vmatprep.mubr.f32.mxu1 %v416_v31 }
  0x4a   : > { %3480 = vmatprep.subr.mxu0 %v4084_v28  ;;  %3501 = vmatpush3.msra.mxu1 %v4012_v4  ;;  %v4331_v4 = vand.u32 4294901760, %v1162_v3 }
  0x4b   : > { %3439 = vmatprep.mubr.f32.mxu0 %v4195_v46  ;;  %3462 = vmatmul.mubr.f32.gmra.mxu1 %v426_v35 }
  0x4c   : > { %3481 = vmatpush3.msra.mxu0 %v4084_v28  ;;  %3502 = vmatprep.subr.mxu1 %v4014_v5  ;;  %v4377_v28 = vsub.f32 %v1159_v20, %v4367_v24 }
  0x4d   : > { %3440 = vmatmul.mubr.f32.gmra.mxu0 %v4204_v62  ;;  %3482 = vmatprep.subr.mxu0 %v4114_v42 }
  0x4e   : > { %3503 = vmatpush3.msra.mxu1 %v4014_v5  ;;  %3483 = vmatpush3.msra.mxu0 %v4114_v42  ;;  %v1161_v5 = vld [vmem:[%s4779_s3 + $0x10] sm:$0xff] }
  0x4f   : > { %3504 = vmatprep.subr.mxu1 %v4025_v9  ;;  %3464 = vmatprep.mubr.f32.mxu1 %v436_v40 }
  0x50   : > { %3484 = vmatprep.subr.mxu0 %v4122_v47  ;;  %3505 = vmatpush3.msra.mxu1 %v4025_v9  ;;  %v4338_v9 = vsub.f32 %v1162_v3, %v4331_v4 }
  0x51   : > { %3465 = vmatmul.mubr.f32.gmra.mxu1 %v446_v56  ;;  %3485 = vmatpush3.msra.mxu0 %v4122_v47 }
  0x52   : > { %3486 = vmatprep.mubr.f32.mxu0 %v4118_v45  ;;  %3506 = vmatprep.subr.mxu1 %v4027_v10 }
  0x53   : > { %3487 = vmatmul.mubr.f32.vlgmr.msra.gmra.mxu0 %v4126_v51  ;;  %3507 = vmatpush3.msra.mxu1 %v4027_v10  ;;  %v4340_v10 = vand.u32 4294901760, %v1161_v5 }
  0x54   : > { %3508 = vmatprep.subr.mxu1 %v4029_v11  ;;  %3467 = vmatprep.mubr.f32.mxu1 %v456_v60 }
  0x55   : > { %3509 = vmatpush3.msra.mxu1 %v4029_v11  ;;  %3489 = vmatprep.mubr.f32.mxu0 %v4133_v55  ;;  %v1160_v11 = vld [vmem:[%s4779_s3 + $0x8] sm:$0xff]  ;;  %v4350_v18 = vsub.f32 %v1161_v5, %v4340_v10 }
  0x56   : > { %3468 = vmatmul.mubr.f32.gmra.mxu1 %v466_v13  ;;  %3510 = vmatprep.subr.mxu1 %v4048_v17 }
  0x57   : > { %3490 = vmatmul.mubr.f32.gmra.mxu0 %v4144_v61  ;;  %3511 = vmatpush3.msra.mxu1 %v4048_v17  ;;  %v4347_v17 = vand.u32 4294901760, %v4338_v9  ;;  %v4362_v22 = vand.u32 4294901760, %v4350_v18 }
  0x58   : > { %3512 = vmatprep.subr.mxu1 %v4054_v19  ;;  %3514 = vmatprep.mubr.f32.mxu1 %v4118_v45  ;;  %v4384_v45 = vand.u32 4294901760, %v4377_v28 }
  0x59   : > { %3513 = vmatpush3.msra.mxu1 %v4054_v19  ;;  %3492 = vmatprep.mubr.f32.mxu0 %v4154_v2  ;;  %v4353_v19 = vand.u32 4294901760, %v1160_v11  ;;  %v1372_v21 = vsub.f32 %v4338_v9, %v4347_v17  ;;  %v1379_v26 = vsub.f32 %v4350_v18, %v4362_v22 }
  0x5a   : > { %3515 = vmatmul.mubr.f32.vlgmr.msra.gmra.mxu1 %v4126_v51  ;;  %3526 = vmatprep.subr.mxu0 %v4331_v4  ;;  %v1393_v51 = vsub.f32 %v4377_v28, %v4384_v45 }
  0x5b   : > { %3493 = vmatmul.mubr.f32.gmra.mxu0 %v4172_v33  ;;  %3517 = vmatprep.mubr.f32.mxu1 %v4133_v55  ;;  %v4365_v23 = vsub.f32 %v1160_v11, %v4353_v19  ;;  %v1373_v25 = vand.u32 4294901760, %v1372_v21  ;;  %v1380_v29 = vand.u32 4294901760, %v1379_v26 }
  0x5c   : > { %3495 = vmatprep.mubr.f32.mxu0 %v4179_v36  ;;  %3527 = vmatpush3.msra.mxu0 %v4331_v4  ;;  %v1394_v53 = vand.u32 4294901760, %v1393_v51 }
  0x5d   : > { %3528 = vmatprep.subr.mxu0 %v4340_v10  ;;  %v4374_v27 = vand.u32 4294901760, %v4365_v23  ;;  %3546 = vmatprep.subr.mxu1 %v1373_v25 }
  0x5e   : > { %3518 = vmatmul.mubr.f32.gmra.mxu1 %v4144_v61  ;;  %3529 = vmatpush3.msra.mxu0 %v4340_v10 }
  0x5f   : > { %3496 = vmatmul.mubr.f32.gmra.mxu0 %v4197_v48  ;;  %3520 = vmatprep.mubr.f32.mxu1 %v4154_v2  ;;  %v1386_v42 = vsub.f32 %v4365_v23, %v4374_v27 }
  0x60   : > { %3530 = vmatprep.subr.mxu0 %v4353_v19  ;;  %3547 = vmatpush3.msra.mxu1 %v1373_v25 }
  0x61   : > { %3531 = vmatpush3.msra.mxu0 %v4353_v19  ;;  %3548 = vmatprep.subr.mxu1 %v1380_v29  ;;  %v1387_v47 = vand.u32 4294901760, %v1386_v42 }
  0x62   : > { %3521 = vmatmul.mubr.f32.gmra.mxu1 %v4172_v33  ;;  %3532 = vmatprep.subr.mxu0 %v4367_v24 }
  0x63   : > { %3523 = vmatprep.mubr.f32.mxu1 %v4179_v36  ;;  %3533 = vmatpush3.msra.mxu0 %v4367_v24 }
  0x64   : > { %3566 = vmatprep.subr.mxu0 %v4338_v9  ;;  %3549 = vmatpush3.msra.mxu1 %v1380_v29 }
  0x65   : > { %3550 = vmatprep.subr.mxu1 %v1387_v47 }
  0x66   : > { %3524 = vmatmul.mubr.f32.gmra.mxu1 %v4197_v48 }
  0x67   : > { %3551 = vmatpush3.msra.mxu1 %v1387_v47 }
  0x68   : > { %3552 = vmatprep.subr.mxu1 %v1394_v53 }
  0x69   : > { %3553 = vmatpush3.msra.mxu1 %v1394_v53 }
  0x6a   : > { %3586 = vmatprep.subr.mxu1 %v4331_v4 }
  0xe5   : > { %v3376_v55 = vpop.f32.mrf.mxu0 }
  0xe6   : > { %v411_v58 = vadd.f32 %v3376_v55, %v3108_v52 }
  0xe7   : > { %v400_v59 = vpop.f32.mrf.mxu0 }
  0xe8   : > { %v401_v50 = vadd.f32 %v3108_v52, %v400_v59 }
  0xe9   : > { %v3379_v61 = vpop.f32.mrf.mxu0 }
  0xea   : > { %v431_v60 = vadd.f32 %v3379_v61, %v3108_v52 }
  0xeb   : > { %v420_v63 = vpop.f32.mrf.mxu0 }
  0xec   : > { %v421_v5 = vadd.f32 %v3108_v52, %v420_v63 }
  0xed   : > { %v3404_v0 = vpop.f32.mrf.mxu1 }
  0xee   : > { %v588_v12 = vadd.f32 %v3404_v0, %v411_v58 }
  0xef   : > { %v3382_v2 = vpop.f32.mrf.mxu0  ;;  %v581_v7 = vpop.f32.mrf.mxu1 }
  0xf0   : > { %v582_v54 = vadd.f32 %v581_v7, %v401_v50  ;;  %v451_v1 = vadd.f32 %v3382_v2, %v3108_v52 }
  0xf1   : > { %v440_v8 = vpop.f32.mrf.mxu0 }
  0xf2   : > { %v441_v55 = vadd.f32 %v3108_v52, %v440_v8 }
  0xf3   : > { %v3407_v30 = vpop.f32.mrf.mxu1 }
  0xf4   : > { %v600_v11 = vadd.f32 %v3407_v30, %v431_v60 }
  0xf5   : > { %v3385_v31 = vpop.f32.mrf.mxu0  ;;  %v593_v32 = vpop.f32.mrf.mxu1 }
  0xf6   : > { %v594_v29 = vadd.f32 %v593_v32, %v421_v5  ;;  %v471_v59 = vadd.f32 %v3385_v31, %v3108_v52 }
  0xf7   : > { %v460_v33 = vpop.f32.mrf.mxu0 }
  0xf9   : > { %v3410_v34 = vpop.f32.mrf.mxu1 }
  0xfa   : > { %v612_v61 = vadd.f32 %v3410_v34, %v451_v1 }
  0xfb   : > { %v3432_v35 = vpop.f32.mrf.mxu0  ;;  %v605_v36 = vpop.f32.mrf.mxu1 }
  0xfc   : > { %v719_v15 = vadd.f32 %v3432_v35, %v588_v12  ;;  %v606_v30 = vadd.f32 %v605_v36, %v441_v55  ;;  %v461_v12 = vadd.f32 %v3108_v52, %v460_v33 }
  0xfd   : > { %v711_v37 = vpop.f32.mrf.mxu0 }
  0xfe   : > { %v712_v20 = vadd.f32 %v711_v37, %v582_v54 }
  0xff   : > { %v3413_v38 = vpop.f32.mrf.mxu1 }
 0x100   : > { %v624_v8 = vadd.f32 %v3413_v38, %v471_v59 }
 0x101   : > { %v3435_v39 = vpop.f32.mrf.mxu0  ;;  %v617_v40 = vpop.f32.mrf.mxu1 }
 0x102   : > { %v733_v42 = vadd.f32 %v3435_v39, %v600_v11  ;;  %v618_v36 = vadd.f32 %v617_v40, %v461_v12 }
 0x103   : > { %v725_v41 = vpop.f32.mrf.mxu0 }
 0x104   : > { %v726_v7 = vadd.f32 %v725_v41, %v594_v29 }
 0x105   : > { %v3460_v43 = vpop.f32.mrf.mxu1 }
 0x106   : > { %v850_v21 = vadd.f32 %v3460_v43, %v719_v15 }
 0x107   : > { %v3438_v44 = vpop.f32.mrf.mxu0  ;;  %v841_v46 = vpop.f32.mrf.mxu1 }
 0x108   : > { %v842_v47 = vadd.f32 %v841_v46, %v712_v20  ;;  %v747_v37 = vadd.f32 %v3438_v44, %v612_v61 }
 0x109   : > { %v739_v48 = vpop.f32.mrf.mxu0 }
 0x10a   : > { %v740_v31 = vadd.f32 %v739_v48, %v606_v30 }
 0x10b   : > { %v3463_v49 = vpop.f32.mrf.mxu1 }
 0x10c   : > { %v866_v35 = vadd.f32 %v3463_v49, %v733_v42 }
 0x10d   : > { %v3441_v56 = vpop.f32.mrf.mxu0  ;;  %v857_v57 = vpop.f32.mrf.mxu1 }
 0x10e   : > { %v858_v50 = vadd.f32 %v857_v57, %v726_v7  ;;  %v761_v44 = vadd.f32 %v3441_v56, %v624_v8 }
 0x10f   : > { %v753_v62 = vpop.f32.mrf.mxu0 }
 0x110   : > { %v754_v11 = vadd.f32 %v753_v62, %v618_v36 }
 0x111   : > { %v3466_v6 = vpop.f32.mrf.mxu1 }
 0x112   : > { %v882_v41 = vadd.f32 %v3466_v6, %v747_v37 }
 0x113   : > { %v3488_v13 = vpop.f32.mrf.mxu0  ;;  %v873_v14 = vpop.f32.mrf.mxu1 }
 0x114   : > { %v999_v51 = vadd.f32 %v3488_v13, %v850_v21  ;;  %v874_v33 = vadd.f32 %v873_v14, %v740_v31 }
 0x115   : > { %v992_v16 = vpop.f32.mrf.mxu0 }
 0x116   : > { %v3469_v3 = vpop.f32.mrf.mxu1  ;;  %v993_v2 = vadd.f32 %v992_v16, %v842_v47 }
 0x117   : > { %v3491_v25 = vpop.f32.mrf.mxu0  ;;  %v898_v21 = vadd.f32 %v3469_v3, %v761_v44 }
 0x118   : > { %v889_v26 = vpop.f32.mrf.mxu1  ;;  %v1011_v60 = vadd.f32 %v3491_v25, %v866_v35 }
 0x119   : > { %v1004_v53 = vpop.f32.mrf.mxu0  ;;  %v890_v42 = vadd.f32 %v889_v26, %v754_v11 }
 0x11a   : > { %v3516_v0 = vpop.f32.mrf.mxu1  ;;  %v1005_v49 = vadd.f32 %v1004_v53, %v858_v50 }
 0x11b   : > { %v1120_v58 = vadd.f32 %v3516_v0, %v999_v51  ;;  %v3494_v63 = vpop.f32.mrf.mxu0 }
 0x11c   : > { %v1113_v43 = vpop.f32.mrf.mxu1  ;;  %v1023_v38 = vadd.f32 %v3494_v63, %v882_v41 }
 0x11d   : > { %v1175_v32 = vsel %vm1170_vm1, %v1120_v58, 0  ;;  %v1114_v39 = vadd.f32 %v1113_v43, %v993_v2  ;;  %v1016_v46 = vpop.f32.mrf.mxu0 }
 0x11e   : > { %v4394_v34 = vand.u32 4294901760, %v1175_v32  ;;  %v3519_v13 = vpop.f32.mrf.mxu1  ;;  %v1017_v25 = vadd.f32 %v1016_v46, %v874_v33 }
 0x11f   : > { %v1172_v54 = vsel %vm1170_vm1, %v1114_v39, 0  ;;  %v1132_v15 = vadd.f32 %v3519_v13, %v1011_v60  ;;  %v3497_v1 = vpop.f32.mrf.mxu0 }
 0x120   : > { %v4398_v57 = vsub.f32 %v1175_v32, %v4394_v34  ;;  %v4400_v16 = vand.u32 4294901760, %v1172_v54  ;;  %v1125_v5 = vpop.f32.mrf.mxu1  ;;  %v1035_v59 = vadd.f32 %v3497_v1, %v898_v21 }
 0x121   : > { %v1181_v48 = vsel %vm1170_vm1, %v1132_v15, 0  ;;  %v1126_v52 = vadd.f32 %v1125_v5, %v1005_v49  ;;  %v1028_v51 = vpop.f32.mrf.mxu0 }
 0x122   : > { %v1276_v6 = vand.u32 4294901760, %v4398_v57  ;;  %v4405_v20 = vsub.f32 %v1172_v54, %v4400_v16  ;;  %v4407_v40 = vand.u32 4294901760, %v1181_v48  ;;  %v3522_v56 = vpop.f32.mrf.mxu1  ;;  %3554 = vmatprep.mubr.f32.mxu1 %v4400_v16  ;;  %v1029_v58 = vadd.f32 %v1028_v51, %v890_v42 }
 0x123   : > { %v1178_v29 = vsel %vm1170_vm1, %v1126_v52, 0  ;;  %v1144_v14 = vadd.f32 %v3522_v56, %v1023_v38  ;;  %3555 = vmatmul.mubr.f32.vlgmr.msra.gmra.mxu1 %v4394_v34 }
 0x124   : > { %v4413_v62 = vsub.f32 %v1181_v48, %v4407_v40  ;;  %v4415_v47 = vand.u32 4294901760, %v1178_v29  ;;  %v1137_v53 = vpop.f32.mrf.mxu1  ;;  %v1266_v55 = vand.u32 4294901760, %v4405_v20  ;;  %3587 = vmatpush3.msra.mxu1 %v4331_v4  ;;  %v1277_v3 = vsub.f32 %v4398_v57, %v1276_v6 }
 0x125   : > { %v1187_v61 = vsel %vm1170_vm1, %v1144_v14, 0  ;;  %v1138_v0 = vadd.f32 %v1137_v53, %v1017_v25  ;;  %3588 = vmatprep.subr.mxu1 %v4340_v10 }
 0x126   : > { %v4425_v26 = vsub.f32 %v1178_v29, %v4415_v47  ;;  %v4427_v7 = vand.u32 4294901760, %v1187_v61  ;;  %v3525_v35 = vpop.f32.mrf.mxu1  ;;  %3557 = vmatprep.mubr.f32.mxu1 %v4415_v47  ;;  %v1267_v2 = vsub.f32 %v4405_v20, %v1266_v55  ;;  %3589 = vmatpush3.msra.mxu1 %v4340_v10  ;;  %v1296_v37 = vand.u32 4294901760, %v4413_v62 }
 0x127   : > { %v1184_v63 = vsel %vm1170_vm1, %v1138_v0, 0  ;;  %v1156_v30 = vadd.f32 %v3525_v35, %v1035_v59  ;;  %3558 = vmatmul.mubr.f32.gmra.mxu1 %v4407_v40  ;;  %3590 = vmatprep.subr.mxu1 %v4353_v19  ;;  %v1278_v46 = vand.u32 4294901760, %v1277_v3  ;;  %v3109_v3 = vld [vmem:[%s4780_s4] ss:$0 sm:$0xff] }
 0x128   : > { %v4437_v43 = vsub.f32 %v1187_v61, %v4427_v7  ;;  %v4439_v50 = vand.u32 4294901760, %v1184_v63  ;;  %v1149_v60 = vpop.f32.mrf.mxu1  ;;  %v1268_v32 = vand.u32 4294901760, %v1267_v2  ;;  %v1286_v39 = vand.u32 4294901760, %v4425_v26  ;;  %3591 = vmatpush3.msra.mxu1 %v4353_v19 }
 0x129   : > { %v1193_v12 = vsel %vm1170_vm1, %v1156_v30, 0  ;;  %v1150_v8 = vadd.f32 %v1149_v60, %v1029_v58  ;;  %v1297_v31 = vsub.f32 %v4413_v62, %v1296_v37  ;;  %3592 = vmatprep.subr.mxu1 %v4367_v24 }
 0x12a   : > { %v1305_v13 = vsub.f32 %v1184_v63, %v4439_v50  ;;  %v4447_v41 = vand.u32 4294901760, %v1193_v12  ;;  %3534 = vmatprep.mubr.f32.mxu0 %v1268_v32  ;;  %3560 = vmatprep.mubr.f32.mxu1 %v4439_v50  ;;  %v1287_v49 = vsub.f32 %v4425_v26, %v1286_v39  ;;  %v1316_v54 = vand.u32 4294901760, %v4437_v43 }
 0x12b   : > { %v1190_v15 = vsel %vm1170_vm1, %v1150_v8, 0  ;;  %3535 = vmatmul.mubr.f32.vlgmr.msra.gmra.mxu0 %v1278_v46  ;;  %3561 = vmatmul.mubr.f32.gmra.mxu1 %v4427_v7  ;;  %v1298_v33 = vand.u32 4294901760, %v1297_v31 }
 0x12c   : > { %v4455_v36 = vsub.f32 %v1193_v12, %v4447_v41  ;;  %v4457_v44 = vand.u32 4294901760, %v1190_v15  ;;  %3567 = vmatpush3.msra.mxu0 %v4338_v9  ;;  %v1288_v1 = vand.u32 4294901760, %v1287_v49  ;;  %v1306_v5 = vand.u32 4294901760, %v1305_v13  ;;  %3593 = vmatpush3.msra.mxu1 %v4367_v24 }
 0x12d   : > { %3568 = vmatprep.subr.mxu0 %v4350_v18  ;;  %v1317_v38 = vsub.f32 %v4437_v43, %v1316_v54  ;;  %3626 = vmatprep.subr.mxu1 %v4331_v4 }
 0x12e   : > { %v1325_v48 = vsub.f32 %v1190_v15, %v4457_v44  ;;  %3537 = vmatprep.mubr.f32.mxu0 %v1288_v1  ;;  %3563 = vmatprep.mubr.f32.mxu1 %v4457_v44  ;;  %v1307_v52 = vsub.f32 %v1305_v13, %v1306_v5  ;;  %v1336_v11 = vand.u32 4294901760, %v4455_v36 }
 0x12f   : > { %3538 = vmatmul.mubr.f32.gmra.mxu0 %v1298_v33  ;;  %3564 = vmatmul.mubr.f32.gmra.mxu1 %v4447_v41  ;;  %v1318_v21 = vand.u32 4294901760, %v1317_v38 }
 0x130   : > { %3569 = vmatpush3.msra.mxu0 %v4350_v18  ;;  %3594 = vmatprep.mubr.f32.mxu1 %v1266_v55  ;;  %v1308_v9 = vand.u32 4294901760, %v1307_v52  ;;  %v1326_v56 = vand.u32 4294901760, %v1325_v48  ;;  %v1337_v25 = vsub.f32 %v4455_v36, %v1336_v11 }
 0x131   : > { %3570 = vmatprep.subr.mxu0 %v4365_v23 }
 0x132   : > { %3540 = vmatprep.mubr.f32.mxu0 %v1308_v9  ;;  %3571 = vmatpush3.msra.mxu0 %v4365_v23  ;;  %v1327_v29 = vsub.f32 %v1325_v48, %v1326_v56  ;;  %v1338_v18 = vand.u32 4294901760, %v1337_v25 }
 0x133   : > { %3541 = vmatmul.mubr.f32.gmra.mxu0 %v1318_v21  ;;  %3595 = vmatmul.mubr.f32.vlgmr.msra.gmra.mxu1 %v1276_v6 }
 0x134   : > { %3597 = vmatprep.mubr.f32.mxu1 %v1286_v39  ;;  %v1328_v14 = vand.u32 4294901760, %v1327_v29  ;;  %3572 = vmatprep.subr.mxu0 %v4377_v28 }
 0x135   : > { %3573 = vmatpush3.msra.mxu0 %v4377_v28  ;;  %3627 = vmatpush3.msra.mxu1 %v4331_v4 }
 0x136   : > { %3543 = vmatprep.mubr.f32.mxu0 %v1328_v14  ;;  %3606 = vmatprep.subr.mxu0 %v4347_v17 }
 0x137   : > { %3544 = vmatmul.mubr.f32.gmra.mxu0 %v1338_v18  ;;  %3598 = vmatmul.mubr.f32.gmra.mxu1 %v1296_v37 }
 0x138   : > { %3574 = vmatprep.mubr.f32.mxu0 %v4405_v20  ;;  %3600 = vmatprep.mubr.f32.mxu1 %v1306_v5 }
 0x139   : > { %3628 = vmatprep.subr.mxu1 %v4340_v10 }
 0x13a   : > { %3629 = vmatpush3.msra.mxu1 %v4340_v10 }
 0x13b   : > { %3575 = vmatmul.mubr.f32.vlgmr.msra.gmra.mxu0 %v4398_v57  ;;  %3601 = vmatmul.mubr.f32.gmra.mxu1 %v1316_v54 }
 0x13c   : > { %3577 = vmatprep.mubr.f32.mxu0 %v4425_v26  ;;  %3603 = vmatprep.mubr.f32.mxu1 %v1326_v56 }
 0x13d   : > { %3607 = vmatpush3.msra.mxu0 %v4347_v17  ;;  %3630 = vmatprep.subr.mxu1 %v4353_v19 }
 0x13e   : > { %3608 = vmatprep.subr.mxu0 %v4362_v22  ;;  %3631 = vmatpush3.msra.mxu1 %v4353_v19 }
 0x13f   : > { %3578 = vmatmul.mubr.f32.gmra.mxu0 %v4413_v62  ;;  %3604 = vmatmul.mubr.f32.gmra.mxu1 %v1336_v11 }
 0x140   : > { %3580 = vmatprep.mubr.f32.mxu0 %v1305_v13  ;;  %3609 = vmatpush3.msra.mxu0 %v4362_v22 }
 0x141   : > { %3634 = vmatprep.mubr.f32.mxu1 %v4400_v16  ;;  %3632 = vmatprep.subr.mxu1 %v4367_v24 }
 0x142   : > { %3633 = vmatpush3.msra.mxu1 %v4367_v24  ;;  %3610 = vmatprep.subr.mxu0 %v4374_v27 }
 0x143   : > { %3581 = vmatmul.mubr.f32.gmra.mxu0 %v4437_v43  ;;  %3635 = vmatmul.mubr.f32.vlgmr.msra.gmra.mxu1 %v4394_v34 }
 0x144   : > { %3583 = vmatprep.mubr.f32.mxu0 %v1325_v48  ;;  %3611 = vmatpush3.msra.mxu0 %v4374_v27 }
 0x145   : > { %3637 = vmatprep.mubr.f32.mxu1 %v4415_v47  ;;  %3612 = vmatprep.subr.mxu0 %v4384_v45 }
 0x146   : > { %3613 = vmatpush3.msra.mxu0 %v4384_v45 }
 0x147   : > { %3584 = vmatmul.mubr.f32.gmra.mxu0 %v4455_v36  ;;  %3638 = vmatmul.mubr.f32.gmra.mxu1 %v4407_v40 }
 0x148   : > { %3614 = vmatprep.mubr.f32.mxu0 %v4400_v16  ;;  %3640 = vmatprep.mubr.f32.mxu1 %v4439_v50 }
 0x14b   : > { %3615 = vmatmul.mubr.f32.vlgmr.msra.gmra.mxu0 %v4394_v34  ;;  %3641 = vmatmul.mubr.f32.gmra.mxu1 %v4427_v7 }
 0x14c   : > { %3617 = vmatprep.mubr.f32.mxu0 %v4415_v47  ;;  %3643 = vmatprep.mubr.f32.mxu1 %v4457_v44 }
 0x14f   : > { %3618 = vmatmul.mubr.f32.gmra.mxu0 %v4407_v40  ;;  %3644 = vmatmul.mubr.f32.gmra.mxu1 %v4447_v41 }
 0x150   : > { %3620 = vmatprep.mubr.f32.mxu0 %v4439_v50 }
 0x153   : > { %3621 = vmatmul.mubr.f32.gmra.mxu0 %v4427_v7 }
 0x154   : > { %3623 = vmatprep.mubr.f32.mxu0 %v4457_v44 }
 0x157   : > { %3624 = vmatmul.mubr.f32.gmra.mxu0 %v4447_v41 }
 0x1e3   : > { %v3556_v4 = vpop.f32.mrf.mxu1 }
 0x1e5   : > { %v1431_v10 = vpop.f32.mrf.mxu1 }
 0x1e7   : > { %v3559_v17 = vpop.f32.mrf.mxu1 }
 0x1e9   : > { %v1443_v19 = vpop.f32.mrf.mxu1 }
 0x1eb   : > { %v3536_v22 = vpop.f32.mrf.mxu0  ;;  %v3562_v23 = vpop.f32.mrf.mxu1 }
 0x1ec   : > { %v1281_v7 = vadd.f32 %v3536_v22, %v3109_v3 }
 0x1ed   : > { %v1270_v24 = vpop.f32.mrf.mxu0  ;;  %v1455_v27 = vpop.f32.mrf.mxu1 }
 0x1ee   : > { %v1271_v58 = vadd.f32 %v3109_v3, %v1270_v24  ;;  %v1438_v43 = vadd.f32 %v3556_v4, %v1281_v7 }
 0x1ef   : > { %v3539_v28 = vpop.f32.mrf.mxu0  ;;  %v3565_v45 = vpop.f32.mrf.mxu1 }
 0x1f0   : > { %v1301_v37 = vadd.f32 %v3539_v28, %v3109_v3  ;;  %v1432_v46 = vadd.f32 %v1431_v10, %v1271_v58 }
 0x1f1   : > { %v1290_v34 = vpop.f32.mrf.mxu0  ;;  %v4513_v57 = vpop.f32.mrf.mxu1 }
 0x1f2   : > { %v1291_v50 = vadd.f32 %v3109_v3, %v1290_v34  ;;  %v1450_v41 = vadd.f32 %v3559_v17, %v1301_v37 }
 0x1f3   : > { %v3542_v16 = vpop.f32.mrf.mxu0  ;;  %v3596_v6 = vpop.f32.mrf.mxu1 }
 0x1f4   : > { %v1321_v12 = vadd.f32 %v3542_v16, %v3109_v3  ;;  %v1444_v54 = vadd.f32 %v1443_v19, %v1291_v50 }
 0x1f5   : > { %v1310_v20 = vpop.f32.mrf.mxu0  ;;  %v1679_v40 = vpop.f32.mrf.mxu1 }
 0x1f6   : > { %v1311_v49 = vadd.f32 %v3109_v3, %v1310_v20  ;;  %v1462_v33 = vadd.f32 %v3562_v23, %v1321_v12 }
 0x1f7   : > { %v3545_v42 = vpop.f32.mrf.mxu0  ;;  %v3599_v62 = vpop.f32.mrf.mxu1 }
 0x1f8   : > { %v1341_v1 = vadd.f32 %v3545_v42, %v3109_v3  ;;  %v1456_v21 = vadd.f32 %v1455_v27, %v1311_v49 }
 0x1f9   : > { %v1330_v47 = vpop.f32.mrf.mxu0  ;;  %v1695_v51 = vpop.f32.mrf.mxu1 }
 0x1fa   : > { %v1331_v9 = vadd.f32 %v3109_v3, %v1330_v47  ;;  %v1474_v10 = vadd.f32 %v3565_v45, %v1341_v1 }
 0x1fb   : > { %v3576_v53 = vpop.f32.mrf.mxu0  ;;  %v3602_v55 = vpop.f32.mrf.mxu1 }
 0x1fc   : > { %v1561_v39 = vadd.f32 %v3576_v53, %v1438_v43  ;;  %v1468_v16 = vadd.f32 %v4513_v57, %v1331_v9 }
 0x1fd   : > { %v1553_v59 = vpop.f32.mrf.mxu0  ;;  %v1711_v61 = vpop.f32.mrf.mxu1 }
 0x1fe   : > { %v1554_v13 = vadd.f32 %v1553_v59, %v1432_v46  ;;  %v1688_v44 = vadd.f32 %v3596_v6, %v1561_v39 }
 0x1ff   : > { %v3579_v0 = vpop.f32.mrf.mxu0  ;;  %v4518_v26 = vpop.f32.mrf.mxu1 }
 0x200   : > { %v1575_v36 = vadd.f32 %v3579_v0, %v1450_v41  ;;  %v1680_v11 = vadd.f32 %v1679_v40, %v1554_v13 }
 0x201   : > { %v1567_v35 = vpop.f32.mrf.mxu0  ;;  %v4520_v2 = vpop.f32.mrf.mxu1 }
 0x202   : > { %v1568_v5 = vadd.f32 %v1567_v35, %v1444_v54  ;;  %v1704_v18 = vadd.f32 %v3599_v62, %v1575_v36 }
 0x203   : > { %v3582_v63 = vpop.f32.mrf.mxu0  ;;  %v3636_v30 = vpop.f32.mrf.mxu1 }
 0x204   : > { %v1589_v56 = vadd.f32 %v3582_v63, %v1462_v33  ;;  %v1696_v22 = vadd.f32 %v1695_v51, %v1568_v5 }
 0x205   : > { %v1581_v60 = vpop.f32.mrf.mxu0  ;;  %v1935_v32 = vpop.f32.mrf.mxu1 }
 0x206   : > { %v1582_v4 = vadd.f32 %v1581_v60, %v1456_v21  ;;  %v1720_v20 = vadd.f32 %v3602_v55, %v1589_v56 }
 0x207   : > { %v3585_v8 = vpop.f32.mrf.mxu0  ;;  %v3639_v31 = vpop.f32.mrf.mxu1 }
 0x208   : > { %v1603_v23 = vadd.f32 %v3585_v8, %v1474_v10  ;;  %v1712_v45 = vadd.f32 %v1711_v61, %v1582_v4  ;;  %v2063_v10 = vld [vmem:[%s4781_s5 + $0x8] sm:$0xff] }
 0x209   : > { %v1595_v15 = vpop.f32.mrf.mxu0  ;;  %v1947_v38 = vpop.f32.mrf.mxu1 }
 0x20a   : > { %v1596_v47 = vadd.f32 %v1595_v15, %v1468_v16  ;;  %v1736_v57 = vadd.f32 %v4518_v26, %v1603_v23 }
 0x20b   : > { %v3616_v48 = vpop.f32.mrf.mxu0  ;;  %v3642_v17 = vpop.f32.mrf.mxu1 }
 0x20c   : > { %v1825_v52 = vadd.f32 %v3616_v48, %v1688_v44  ;;  %v1728_v50 = vadd.f32 %v4520_v2, %v1596_v47 }
 0x20d   : > { %v1818_v25 = vpop.f32.mrf.mxu0  ;;  %v1959_v62 = vpop.f32.mrf.mxu1 }
 0x20e   : > { %v1942_v29 = vadd.f32 %v3636_v30, %v1825_v52  ;;  %v1819_v14 = vadd.f32 %v1818_v25, %v1680_v11 }
 0x20f   : > { %v3619_v19 = vpop.f32.mrf.mxu0  ;;  %v3645_v61 = vpop.f32.mrf.mxu1 }
 0x210   : > { %v1990_v24 = vmul.f32 0.01, %v1942_v29  ;;  %v1936_v28 = vadd.f32 %v1935_v32, %v1819_v14  ;;  %v1837_v34 = vadd.f32 %v3619_v19, %v1704_v18  ;;  %vm1982_vm2 = vcmp.ge.f32.partialorder %v1942_v29, 0.0  ;;  %v2062_v19 = vld [vmem:[%s4781_s5] sm:$0xff] }
 0x211   : > { %v1830_v6 = vpop.f32.mrf.mxu0  ;;  %v1971_v2 = vpop.f32.mrf.mxu1 }
 0x212   : > { %v1989_v40 = vmul.f32 0.01, %v1936_v28  ;;  %v1954_v27 = vadd.f32 %v3639_v31, %v1837_v34  ;;  %v1831_v42 = vadd.f32 %v1830_v6, %v1696_v22  ;;  %vm1981_vm3 = vcmp.ge.f32.partialorder %v1936_v28, 0.0 }
 0x213   : > { %v3622_v53 = vpop.f32.mrf.mxu0  ;;  %v4523_v3 = vsel %vm1982_vm2, %v1942_v29, %v1990_v24  ;;  %v4577_v24 = vand.u32 4294901760, %v2062_v19 }
 0x214   : > { %v1992_v51 = vmul.f32 0.01, %v1954_v27  ;;  %v1948_v59 = vadd.f32 %v1947_v38, %v1831_v42  ;;  %v1849_v0 = vadd.f32 %v3622_v53, %v1720_v20  ;;  %v4525_v7 = vsel %vm1981_vm3, %v1936_v28, %v1989_v40 }
 0x215   : > { %v1842_v35 = vpop.f32.mrf.mxu0  ;;  %v2005_v55 = vmul.f32 %v4525_v7, %v4525_v7  ;;  %vm1984_vm5 = vcmp.ge.f32.partialorder %v1954_v27, 0.0  ;;  %v2006_v60 = vmul.f32 %v4523_v3, %v4523_v3  ;;  %v4584_v34 = vsub.f32 %v2062_v19, %v4577_v24 }
 0x216   : > { %v1991_v58 = vmul.f32 0.01, %v1948_v59  ;;  %v1966_v63 = vadd.f32 %v3642_v17, %v1849_v0  ;;  %v1843_v30 = vadd.f32 %v1842_v35, %v1712_v45  ;;  %vm1983_vm6 = vcmp.ge.f32.partialorder %v1948_v59, 0.0 }
 0x217   : > { %v3625_v37 = vpop.f32.mrf.mxu0  ;;  %v2014_v43 = vsel %vm2013_vm4, %v2005_v55, 0.0  ;;  %v4534_v32 = vsel %vm1984_vm5, %v1954_v27, %v1992_v51  ;;  %v2017_v15 = vsel %vm2013_vm4, %v2006_v60, 0.0  ;;  %v4568_v17 = vand.u32 4294901760, %v2063_v10 }
 0x218   : > { %v1994_v26 = vmul.f32 0.01, %v1966_v63  ;;  %v1960_v39 = vadd.f32 %v1959_v62, %v1843_v30  ;;  %v1861_v46 = vadd.f32 %v3625_v37, %v1736_v57  ;;  %2015 = vadd.xlane.f32.xlu0 %v2014_v43  ;;  %v4536_v12 = vsel %vm1983_vm6, %v1948_v59, %v1991_v58 }
 0x219   : > { %v1854_v8 = vpop.f32.mrf.mxu0  ;;  %v2007_v31 = vmul.f32 %v4536_v12, %v4536_v12  ;;  %vm1986_vm7 = vcmp.ge.f32.partialorder %v1966_v63, 0.0  ;;  %v2008_v36 = vmul.f32 %v4534_v32, %v4534_v32  ;;  %3646 = vmatprep.subr.mxu0 %v4568_v17  ;;  %v4575_v22 = vsub.f32 %v2063_v10, %v4568_v17 }
 0x21a   : > { %v1993_v13 = vmul.f32 0.01, %v1960_v39  ;;  %v1978_v41 = vadd.f32 %v3645_v61, %v1861_v46  ;;  %v1855_v49 = vadd.f32 %v1854_v8, %v1728_v50  ;;  %vm1985_vm8 = vcmp.ge.f32.partialorder %v1960_v39, 0.0  ;;  %3647 = vmatpush3.msra.mxu0 %v4568_v17 }
 0x21b   : > { %v2020_v54 = vsel %vm2013_vm4, %v2007_v31, 0.0  ;;  %v4546_v33 = vsel %vm1986_vm7, %v1966_v63, %v1994_v26  ;;  %v2023_v52 = vsel %vm2013_vm4, %v2008_v36, 0.0  ;;  %v4581_v28 = vand.u32 4294901760, %v4575_v22  ;;  %3648 = vmatprep.subr.mxu0 %v4577_v24 }
 0x21c   : > { %v1996_v44 = vmul.f32 0.01, %v1978_v41  ;;  %v1972_v1 = vadd.f32 %v1971_v2, %v1855_v49  ;;  %2021 = vadd.xlane.f32.xlu1 %v2020_v54  ;;  %2018 = vadd.xlane.f32.xlu0 %v2017_v15  ;;  %v4544_v5 = vsel %vm1985_vm8, %v1960_v39, %v1993_v13  ;;  %vm1988_vm9 = vcmp.ge.f32.partialorder %v1978_v41, 0.0 }
 0x21d   : > { %v2009_v38 = vmul.f32 %v4544_v5, %v4544_v5  ;;  %v2010_v9 = vmul.f32 %v4546_v33, %v4546_v33  ;;  %3649 = vmatpush3.msra.mxu0 %v4577_v24  ;;  %v2267_v23 = vsub.f32 %v4575_v22, %v4581_v28  ;;  %v4591_v16 = vand.u32 4294901760, %v4584_v34 }
 0x21e   : > { %v1995_v48 = vmul.f32 0.01, %v1972_v1  ;;  %vm1987_vm10 = vcmp.ge.f32.partialorder %v1972_v1, 0.0  ;;  %v4556_v21 = vsel %vm1988_vm9, %v1978_v41, %v1996_v44  ;;  %3678 = vmatprep.subr.mxu0 %v4575_v22 }
 0x21f   : > { %v2026_v11 = vsel %vm2013_vm4, %v2009_v38, 0.0  ;;  %v2029_v29 = vsel %vm2013_vm4, %v2010_v9, 0.0  ;;  %v2012_v18 = vmul.f32 %v4556_v21, %v4556_v21  ;;  %v2268_v6 = vand.u32 4294901760, %v2267_v23 }
 0x220   : > { %2024 = vadd.xlane.f32.xlu1 %v2023_v52  ;;  %2027 = vadd.xlane.f32.xlu0 %v2026_v11  ;;  %v4554_v56 = vsel %vm1987_vm10, %v1972_v1, %v1995_v48  ;;  %v2274_v20 = vsub.f32 %v4584_v34, %v4591_v16 }
 0x221   : > { %v2011_v25 = vmul.f32 %v4554_v56, %v4554_v56  ;;  %v2035_v4 = vsel %vm2013_vm4, %v2012_v18, 0.0  ;;  %3662 = vmatprep.subr.mxu1 %v2268_v6 }
 0x222   : > { %v2275_v40 = vand.u32 4294901760, %v2274_v20  ;;  %3663 = vmatpush3.msra.mxu1 %v2268_v6 }
 0x223   : > { %v2032_v14 = vsel %vm2013_vm4, %v2011_v25, 0.0 }
 0x224   : > { %2030 = vadd.xlane.f32.xlu1 %v2029_v29  ;;  %2033 = vadd.xlane.f32.xlu0 %v2032_v14 }
 0x225   : > { %3664 = vmatprep.subr.mxu1 %v2275_v40 }
 0x226   : > { %3665 = vmatpush3.msra.mxu1 %v2275_v40 }
 0x227   : > { %3694 = vmatprep.subr.mxu1 %v4568_v17 }
 0x228   : > { %2036 = vadd.xlane.f32.xlu1 %v2035_v4 }
 0x2a1   : > { %v2016_v27 = vpop.xlane.xlu0 %2015 }
 0x2a2   : > { %v2038_v42 = vmax.f32 %v2016_v27, 1e-24 }
 0x2a4   : > { %3830 = vrsqrt.f32 %v2038_v42 }
 0x2a5   : > { %v2022_v47 = vpop.xlane.xlu1 %2021  ;;  %v2019_v62 = vpop.xlane.xlu0 %2018 }
 0x2a6   : > { %v2040_v53 = vmax.f32 %v2022_v47, 1e-24  ;;  %v2039_v45 = vmax.f32 %v2019_v62, 1e-24 }
 0x2a8   : > { %3832 = vrsqrt.f32 %v2040_v53 }
 0x2a9   : > { %3834 = vrsqrt.f32 %v2039_v45  ;;  %v2025_v51 = vpop.xlane.xlu1 %2024  ;;  %v2028_v59 = vpop.xlane.xlu0 %2027 }
 0x2aa   : > { %v2041_v0 = vmax.f32 %v2025_v51, 1e-24  ;;  %v2042_v35 = vmax.f32 %v2028_v59, 1e-24 }
 0x2ac   : > { %3836 = vrsqrt.f32 %v2041_v0 }
 0x2ad   : > { %3838 = vrsqrt.f32 %v2042_v35  ;;  %v2031_v57 = vpop.xlane.xlu1 %2030  ;;  %v2034_v55 = vpop.xlane.xlu0 %2033 }
 0x2ae   : > { %v2043_v58 = vmax.f32 %v2031_v57, 1e-24  ;;  %v2044_v63 = vmax.f32 %v2034_v55, 1e-24 }
 0x2b0   : > { %3840 = vrsqrt.f32 %v2043_v58 }
 0x2b1   : > { %v3831_v30 = vpop.eup %3830  ;;  %3842 = vrsqrt.f32 %v2044_v63  ;;  %v2037_v61 = vpop.xlane.xlu1 %2036 }
 0x2b2   : > { %v2045_v37 = vmax.f32 %v2037_v61, 1e-24  ;;  %v2054_v43 = vmul.f32 %v3831_v30, %v4525_v7 }
 0x2b4   : > { %3844 = vrsqrt.f32 %v2045_v37  ;;  %v2065_v50 = vsel %vm2013_vm4, %v2054_v43, 0 }
 0x2b5   : > { %v3833_v60 = vpop.eup %3832  ;;  %v4599_v26 = vand.u32 4294901760, %v2065_v50 }
 0x2b6   : > { %v3835_v39 = vpop.eup %3834  ;;  %v2056_v46 = vmul.f32 %v3833_v60, %v4536_v12 }
 0x2b7   : > { %3666 = vmatprep.mubr.f32.mxu1 %v4599_v26  ;;  %v2055_v8 = vmul.f32 %v3835_v39, %v4523_v3  ;;  %v4605_v31 = vsub.f32 %v2065_v50, %v4599_v26 }
 0x2b8   : > { %v2071_v13 = vsel %vm2013_vm4, %v2056_v46, 0 }
 0x2b9   : > { %v3837_v41 = vpop.eup %3836  ;;  %v2068_v7 = vsel %vm2013_vm4, %v2055_v8, 0  ;;  %v4609_v49 = vand.u32 4294901760, %v2071_v13  ;;  %v2157_v2 = vand.u32 4294901760, %v4605_v31 }
 0x2ba   : > { %v3839_v54 = vpop.eup %3838  ;;  %v4612_v15 = vand.u32 4294901760, %v2068_v7  ;;  %v2057_v12 = vmul.f32 %v3837_v41, %v4534_v32 }
 0x2bb   : > { %v2158_v3 = vsub.f32 %v4605_v31, %v2157_v2  ;;  %v2058_v36 = vmul.f32 %v3839_v54, %v4544_v5  ;;  %v4620_v44 = vsub.f32 %v2071_v13, %v4609_v49 }
 0x2bc   : > { %v4623_v1 = vsub.f32 %v2068_v7, %v4612_v15  ;;  %3667 = vmatmul.mubr.f32.vlgmr.msra.gmra.mxu1 %v4612_v15  ;;  %v2074_v38 = vsel %vm2013_vm4, %v2057_v12, 0 }
 0x2bd   : > { %v3841_v48 = vpop.eup %3840  ;;  %3669 = vmatprep.mubr.f32.mxu1 %v4609_v49  ;;  %v2159_v32 = vand.u32 4294901760, %v2158_v3  ;;  %v4628_v52 = vand.u32 4294901760, %v2074_v38  ;;  %v2077_v11 = vsel %vm2013_vm4, %v2058_v36, 0  ;;  %v2177_v5 = vand.u32 4294901760, %v4620_v44  ;;  %3695 = vmatpush3.msra.mxu1 %v4568_v17 }
 0x2be   : > { %v3843_v9 = vpop.eup %3842  ;;  %v4633_v25 = vand.u32 4294901760, %v2077_v11  ;;  %v2167_v29 = vand.u32 4294901760, %v4623_v1  ;;  %v2059_v14 = vmul.f32 %v3841_v48, %v4546_v33  ;;  %3696 = vmatprep.subr.mxu1 %v4577_v24 }
 0x2bf   : > { %3650 = vmatprep.mubr.f32.mxu0 %v2159_v32  ;;  %v2178_v18 = vsub.f32 %v4620_v44, %v2177_v5  ;;  %v2060_v4 = vmul.f32 %v3843_v9, %v4554_v56  ;;  %v4641_v10 = vsub.f32 %v2074_v38, %v4628_v52  ;;  %3697 = vmatpush3.msra.mxu1 %v4577_v24 }
 0x2c0   : > { %3670 = vmatmul.mubr.f32.gmra.mxu1 %v4628_v52  ;;  %v2168_v19 = vsub.f32 %v4623_v1, %v2167_v29  ;;  %v2080_v23 = vsel %vm2013_vm4, %v2059_v14, 0  ;;  %v2196_v33 = vsub.f32 %v2077_v11, %v4633_v25  ;;  %3726 = vmatprep.subr.mxu1 %v4568_v17 }
 0x2c1   : > { %v3845_v6 = vpop.eup %3844  ;;  %3672 = vmatprep.mubr.f32.mxu1 %v4633_v25  ;;  %v4650_v20 = vand.u32 4294901760, %v2080_v23  ;;  %v2179_v56 = vand.u32 4294901760, %v2178_v18  ;;  %v2083_v40 = vsel %vm2013_vm4, %v2060_v4, 0  ;;  %v2187_v27 = vand.u32 4294901760, %v4641_v10 }
 0x2c2   : > { %v2169_v42 = vand.u32 4294901760, %v2168_v19  ;;  %v4654_v47 = vand.u32 4294901760, %v2083_v40  ;;  %v2061_v62 = vmul.f32 %v3845_v6, %v4556_v21  ;;  %v2197_v53 = vand.u32 4294901760, %v2196_v33 }
 0x2c3   : > { %v2188_v45 = vsub.f32 %v4641_v10, %v2187_v27  ;;  %v2206_v51 = vsub.f32 %v2080_v23, %v4650_v20 }
 0x2c4   : > { %3651 = vmatmul.mubr.f32.vlgmr.msra.gmra.mxu0 %v2169_v42  ;;  %3673 = vmatmul.mubr.f32.gmra.mxu1 %v4650_v20  ;;  %v2086_v59 = vsel %vm2013_vm4, %v2061_v62, 0  ;;  %v2198_v0 = vsub.f32 %v2196_v33, %v2197_v53  ;;  %v2216_v35 = vsub.f32 %v2083_v40, %v4654_v47 }
 0x2c5   : > { %3653 = vmatprep.mubr.f32.mxu0 %v2179_v56  ;;  %3675 = vmatprep.mubr.f32.mxu1 %v4654_v47  ;;  %v2189_v57 = vand.u32 4294901760, %v2188_v45  ;;  %v2225_v55 = vand.u32 4294901760, %v2086_v59  ;;  %v2207_v58 = vand.u32 4294901760, %v2206_v51 }
 0x2c6   : > { %3679 = vmatpush3.msra.mxu0 %v4575_v22  ;;  %v2199_v21 = vand.u32 4294901760, %v2198_v0  ;;  %v2217_v63 = vand.u32 4294901760, %v2216_v35 }
 0x2c7   : > { %v2208_v30 = vsub.f32 %v2206_v51, %v2207_v58  ;;  %3680 = vmatprep.subr.mxu0 %v4584_v34  ;;  %v2226_v61 = vsub.f32 %v2086_v59, %v2225_v55 }
 0x2c8   : > { %3654 = vmatmul.mubr.f32.gmra.mxu0 %v2189_v57  ;;  %3676 = vmatmul.mubr.f32.gmra.mxu1 %v2225_v55  ;;  %v2218_v37 = vsub.f32 %v2216_v35, %v2217_v63 }
 0x2c9   : > { %3656 = vmatprep.mubr.f32.mxu0 %v2199_v21  ;;  %3698 = vmatprep.mubr.f32.mxu1 %v2157_v2  ;;  %v2209_v43 = vand.u32 4294901760, %v2208_v30  ;;  %v2227_v50 = vand.u32 4294901760, %v2226_v61 }
 0x2ca   : > { %v2219_v60 = vand.u32 4294901760, %v2218_v37  ;;  %3681 = vmatpush3.msra.mxu0 %v4584_v34 }
 0x2cb   : > { %v2228_v39 = vsub.f32 %v2226_v61, %v2227_v50  ;;  %3710 = vmatprep.subr.mxu0 %v4581_v28 }
 0x2cc   : > { %3657 = vmatmul.mubr.f32.gmra.mxu0 %v2209_v43  ;;  %3699 = vmatmul.mubr.f32.vlgmr.msra.gmra.mxu1 %v2167_v29 }
 0x2cd   : > { %3659 = vmatprep.mubr.f32.mxu0 %v2219_v60  ;;  %3701 = vmatprep.mubr.f32.mxu1 %v2177_v5  ;;  %v2229_v22 = vand.u32 4294901760, %v2228_v39 }
 0x2ce   : > { %3727 = vmatpush3.msra.mxu1 %v4568_v17 }
 0x2cf   : > { %3728 = vmatprep.subr.mxu1 %v4577_v24 }
 0x2d0   : > { %3660 = vmatmul.mubr.f32.gmra.mxu0 %v2229_v22  ;;  %3702 = vmatmul.mubr.f32.gmra.mxu1 %v2187_v27 }
 0x2d1   : > { %3682 = vmatprep.mubr.f32.mxu0 %v4605_v31  ;;  %3704 = vmatprep.mubr.f32.mxu1 %v2197_v53 }
 0x2d2   : > { %3729 = vmatpush3.msra.mxu1 %v4577_v24 }
 0x2d4   : > { %3683 = vmatmul.mubr.f32.vlgmr.msra.gmra.mxu0 %v4623_v1  ;;  %3705 = vmatmul.mubr.f32.gmra.mxu1 %v2207_v58 }
 0x2d5   : > { %3685 = vmatprep.mubr.f32.mxu0 %v4620_v44  ;;  %3707 = vmatprep.mubr.f32.mxu1 %v2217_v63 }
 0x2d6   : > { %3711 = vmatpush3.msra.mxu0 %v4581_v28 }
 0x2d7   : > { %3712 = vmatprep.subr.mxu0 %v4591_v16 }
 0x2d8   : > { %3686 = vmatmul.mubr.f32.gmra.mxu0 %v4641_v10  ;;  %3708 = vmatmul.mubr.f32.gmra.mxu1 %v2227_v50 }
 0x2d9   : > { %3688 = vmatprep.mubr.f32.mxu0 %v2196_v33  ;;  %3730 = vmatprep.mubr.f32.mxu1 %v4599_v26 }
 0x2da   : > { %3713 = vmatpush3.msra.mxu0 %v4591_v16 }
 0x2dc   : > { %3689 = vmatmul.mubr.f32.gmra.mxu0 %v2206_v51  ;;  %3731 = vmatmul.mubr.f32.vlgmr.msra.gmra.mxu1 %v4612_v15 }
 0x2dd   : > { %3691 = vmatprep.mubr.f32.mxu0 %v2216_v35  ;;  %3733 = vmatprep.mubr.f32.mxu1 %v4609_v49 }
 0x2e0   : > { %3692 = vmatmul.mubr.f32.gmra.mxu0 %v2226_v61  ;;  %3734 = vmatmul.mubr.f32.gmra.mxu1 %v4628_v52 }
 0x2e1   : > { %3714 = vmatprep.mubr.f32.mxu0 %v4599_v26  ;;  %3736 = vmatprep.mubr.f32.mxu1 %v4633_v25 }
 0x2e4   : > { %3715 = vmatmul.mubr.f32.vlgmr.msra.gmra.mxu0 %v4612_v15  ;;  %3737 = vmatmul.mubr.f32.gmra.mxu1 %v4650_v20 }
 0x2e5   : > { %3717 = vmatprep.mubr.f32.mxu0 %v4609_v49  ;;  %3739 = vmatprep.mubr.f32.mxu1 %v4654_v47 }
 0x2e8   : > { %3718 = vmatmul.mubr.f32.gmra.mxu0 %v4628_v52  ;;  %3740 = vmatmul.mubr.f32.gmra.mxu1 %v2225_v55 }
 0x2e9   : > { %3720 = vmatprep.mubr.f32.mxu0 %v4633_v25 }
 0x2ec   : > { %3721 = vmatmul.mubr.f32.gmra.mxu0 %v4650_v20 }
 0x2ed   : > { %3723 = vmatprep.mubr.f32.mxu0 %v4654_v47 }
 0x2f0   : > { %3724 = vmatmul.mubr.f32.gmra.mxu0 %v2225_v55 }
 0x37c   : > { %v3668_v17 = vpop.f32.mrf.mxu1 }
 0x37e   : > { %v2312_v24 = vpop.f32.mrf.mxu1 }
 0x380   : > { %v3671_v28 = vpop.f32.mrf.mxu1 }
 0x382   : > { %v2324_v34 = vpop.f32.mrf.mxu1 }
 0x384   : > { %v3652_v16 = vpop.f32.mrf.mxu0  ;;  %v3674_v26 = vpop.f32.mrf.mxu1 }
 0x385   : > { %v2319_v14 = vadd.f32 %v3668_v17, %v3652_v16 }
 0x386   : > { %v2161_v46 = vpop.f32.mrf.mxu0  ;;  %v2336_v8 = vpop.f32.mrf.mxu1 }
 0x387   : > { %v2313_v10 = vadd.f32 %v2312_v24, %v2161_v46 }
 0x388   : > { %v3655_v31 = vpop.f32.mrf.mxu0  ;;  %v3677_v13 = vpop.f32.mrf.mxu1 }
 0x389   : > { %v2331_v6 = vadd.f32 %v3671_v28, %v3655_v31 }
 0x38a   : > { %v2181_v41 = vpop.f32.mrf.mxu0  ;;  %v2348_v7 = vpop.f32.mrf.mxu1 }
 0x38b   : > { %v2325_v40 = vadd.f32 %v2324_v34, %v2181_v41 }
 0x38c   : > { %v3658_v49 = vpop.f32.mrf.mxu0  ;;  %v3700_v2 = vpop.f32.mrf.mxu1 }
 0x38d   : > { %v2343_v53 = vadd.f32 %v3674_v26, %v3658_v49 }
 0x38e   : > { %v2201_v54 = vpop.f32.mrf.mxu0  ;;  %v2554_v15 = vpop.f32.mrf.mxu1 }
 0x38f   : > { %v2337_v0 = vadd.f32 %v2336_v8, %v2201_v54 }
 0x390   : > { %v3661_v12 = vpop.f32.mrf.mxu0  ;;  %v3703_v3 = vpop.f32.mrf.mxu1 }
 0x391   : > { %v2355_v63 = vadd.f32 %v3677_v13, %v3661_v12 }
 0x392   : > { %v2221_v36 = vpop.f32.mrf.mxu0  ;;  %v2570_v44 = vpop.f32.mrf.mxu1 }
 0x393   : > { %v2349_v39 = vadd.f32 %v2348_v7, %v2221_v36 }
 0x394   : > { %v3684_v1 = vpop.f32.mrf.mxu0  ;;  %v3706_v38 = vpop.f32.mrf.mxu1 }
 0x395   : > { %v2438_v19 = vadd.f32 %v3684_v1, %v2319_v14 }
 0x396   : > { %v2430_v48 = vpop.f32.mrf.mxu0  ;;  %v2586_v32 = vpop.f32.mrf.mxu1 }
 0x397   : > { %v2431_v20 = vadd.f32 %v2430_v48, %v2313_v10  ;;  %v2563_v42 = vadd.f32 %v3700_v2, %v2438_v19 }
 0x398   : > { %v3687_v52 = vpop.f32.mrf.mxu0  ;;  %v3709_v11 = vpop.f32.mrf.mxu1 }
 0x399   : > { %v2452_v27 = vadd.f32 %v3687_v52, %v2331_v6  ;;  %v2555_v59 = vadd.f32 %v2554_v15, %v2431_v20 }
 0x39a   : > { %v2444_v5 = vpop.f32.mrf.mxu0  ;;  %v4693_v9 = vpop.f32.mrf.mxu1 }
 0x39b   : > { %v2445_v45 = vadd.f32 %v2444_v5, %v2325_v40  ;;  %v2579_v21 = vadd.f32 %v3703_v3, %v2452_v27 }
 0x39c   : > { %v3690_v25 = vpop.f32.mrf.mxu0  ;;  %v3732_v29 = vpop.f32.mrf.mxu1 }
 0x39d   : > { %v2466_v57 = vadd.f32 %v3690_v25, %v2343_v53  ;;  %v2571_v60 = vadd.f32 %v2570_v44, %v2445_v45 }
 0x39e   : > { %v2458_v18 = vpop.f32.mrf.mxu0  ;;  %v2802_v4 = vpop.f32.mrf.mxu1 }
 0x39f   : > { %v2459_v37 = vadd.f32 %v2458_v18, %v2337_v0  ;;  %v2595_v34 = vadd.f32 %v3706_v38, %v2466_v57 }
 0x3a0   : > { %v3693_v23 = vpop.f32.mrf.mxu0  ;;  %v3735_v33 = vpop.f32.mrf.mxu1 }
 0x3a1   : > { %v2480_v17 = vadd.f32 %v3693_v23, %v2355_v63  ;;  %v2587_v13 = vadd.f32 %v2586_v32, %v2459_v37 }
 0x3a2   : > { %v2472_v56 = vpop.f32.mrf.mxu0  ;;  %v2814_v47 = vpop.f32.mrf.mxu1 }
 0x3a3   : > { %v2473_v46 = vadd.f32 %v2472_v56, %v2349_v39  ;;  %v2611_v2 = vadd.f32 %v3709_v11, %v2480_v17 }
 0x3a4   : > { %v3716_v62 = vpop.f32.mrf.mxu0  ;;  %v3738_v30 = vpop.f32.mrf.mxu1 }
 0x3a5   : > { %v2694_v51 = vadd.f32 %v3716_v62, %v2563_v42  ;;  %v2603_v36 = vadd.f32 %v4693_v9, %v2473_v46 }
 0x3a6   : > { %v2687_v35 = vpop.f32.mrf.mxu0  ;;  %v2826_v16 = vpop.f32.mrf.mxu1 }
 0x3a7   : > { %v2809_v55 = vadd.f32 %v3732_v29, %v2694_v51  ;;  %v2688_v58 = vadd.f32 %v2687_v35, %v2555_v59 }
 0x3a8   : > { %v3719_v61 = vpop.f32.mrf.mxu0  ;;  %v3741_v54 = vpop.f32.mrf.mxu1 }
 0x3a9   : > { %2850 = vst.msk [vmem:[%s4696_s21 + $0x8] sm:$0xff] %vm2848_vm11, %v2809_v55  ;;  %v2803_v43 = vadd.f32 %v2802_v4, %v2688_v58  ;;  %v2706_v50 = vadd.f32 %v3719_v61, %v2579_v21 }
 0x3aa   : > { %v2699_v22 = vpop.f32.mrf.mxu0  ;;  %v2838_v48 = vpop.f32.mrf.mxu1 }
 0x3ab   : > { %2849 = vst.msk [vmem:[%s4696_s21] sm:$0xff] %vm2848_vm11, %v2803_v43  ;;  %v2821_v24 = vadd.f32 %v3735_v33, %v2706_v50  ;;  %v2700_v28 = vadd.f32 %v2699_v22, %v2571_v60 }
 0x3ac   : > { %v3722_v26 = vpop.f32.mrf.mxu0 }
 0x3ad   : > { %2852 = vst.msk [vmem:[%s4696_s21 + $0x18] sm:$0xff] %vm2848_vm11, %v2821_v24  ;;  %v2815_v8 = vadd.f32 %v2814_v47, %v2700_v28  ;;  %v2718_v31 = vadd.f32 %v3722_v26, %v2595_v34 }
 0x3ae   : > { %v2711_v41 = vpop.f32.mrf.mxu0 }
 0x3af   : > { %2851 = vst.msk [vmem:[%s4696_s21 + $0x10] sm:$0xff] %vm2848_vm11, %v2815_v8  ;;  %v2833_v7 = vadd.f32 %v3738_v30, %v2718_v31  ;;  %v2712_v49 = vadd.f32 %v2711_v41, %v2587_v13 }
 0x3b0   : > { %v3725_v15 = vpop.f32.mrf.mxu0 }
 0x3b1   : > { %2854 = vst.msk [vmem:[%s4696_s21 + $0x28] sm:$0xff] %vm2848_vm11, %v2833_v7  ;;  %v2827_v12 = vadd.f32 %v2826_v16, %v2712_v49  ;;  %v2730_v3 = vadd.f32 %v3725_v15, %v2611_v2 }
 0x3b2   : > { %v2723_v44 = vpop.f32.mrf.mxu0 }
 0x3b3   : > { %2853 = vst.msk [vmem:[%s4696_s21 + $0x20] sm:$0xff] %vm2848_vm11, %v2827_v12  ;;  %v2845_v1 = vadd.f32 %v3741_v54, %v2730_v3  ;;  %v2724_v38 = vadd.f32 %v2723_v44, %v2603_v36  ;;  %2863 = sbr.rel (!%p3994_p4) target bundleno = 991 (0x3df), region = 48 }
 0x3b5   : > { %2856 = vst.msk [vmem:[%s4696_s21 + $0x38] sm:$0xff] %vm2848_vm11, %v2845_v1  ;;  %v2839_v32 = vadd.f32 %v2838_v48, %v2724_v38 }
 0x3b7   : > { %2855 = vst.msk [vmem:[%s4696_s21 + $0x30] sm:$0xff] %vm2848_vm11, %v2839_v32 }
 0x3b8   : > { %s4791_s11 = smov (!%p2866_p8, %s2865_s11), 8 }
 0x3b9   : > { %s3112_s17 = sshll.u32 %s4791_s11, 7 }
 0x3ba   : > { %p3115_p9 = scmp.eq.s32.totalorder %s3112_s17, 0 }
 0x3bb   : > { %s4728_s18 = sshrl.u32 (!%p3115_p9), %s4791_s11, 3 }
 0x3bc   : > { %2874 = sbr.rel (%p3115_p9) target bundleno = 991 (0x3df), region = 52  ;;  %p3116_p10 = scmp.le.s32.totalorder (!%p3115_p9), %s4728_s18, 0 }
 0x3c1   : > { %3057 = sbr.rel (%p3116_p10) target bundleno = 974 (0x3ce), region = 128  ;;  %s4784_s24 = smov (!%p3116_p10), %s4722_s16 }
 0x3c2   : > { %s4785_s29 = smov (!%p3116_p10), %s4696_s21  ;;  %s4737_s12 = smov (!%p3116_p10), 0  }
 0x3c3   : > { %s4739_s19 = smov (!%p3116_p10), 0  }
 0x3c6 LB: >> { %v2951_v52 = vld [vmem:[%s3908_s29] sm:$0xff]  ;;  %v2953_v11 = vld [vmem:[%s3908_s29 + $0x8] sm:$0xff]  ;;  %v2955_v5 = vld [vmem:[%s3908_s29 + $0x10] sm:$0xff]  ;;  %s2967_s20 = sadd.s32 1, %s3912_s12  ;;  %s2945_s19 = sadd.s32 1, %s3916_s19   ;;  %s3916_s19 = sphi %s4739_s19, %s2945_s19   ;;  %s3912_s12 = sphi %s4737_s12, %s4786_s12   ;;  %s3908_s29 = sphi %s4785_s29, %s2972_s29   ;;  %s3904_s24 = sphi %s4784_s24, %s2973_s24  }
 0x3c7   : >> { %2952 = vst [vmem:[%s3904_s24] sm:$0xff] %v2951_v52  ;;  %2954 = vst [vmem:[%s3904_s24 + $0x8] sm:$0xff] %v2953_v11  ;;  %v2957_v9 = vld [vmem:[%s3908_s29 + $0x18] sm:$0xff]  ;;  %v2959_v25 = vld [vmem:[%s3908_s29 + $0x20] sm:$0xff]  ;;  %p2968_p11 = scmp.ge.s32.totalorder %s2967_s20, %s4728_s18  ;;  %p2944_p12 = scmp.ge.s32.totalorder %s2945_s19, %s4728_s18 }
 0x3c8   : >> { %2956 = vst [vmem:[%s3904_s24 + $0x10] sm:$0xff] %v2955_v5  ;;  %v2961_v29 = vld [vmem:[%s3908_s29 + $0x28] sm:$0xff]  ;;  %2958 = vst [vmem:[%s3904_s24 + $0x18] sm:$0xff] %v2957_v9  ;;  %v2963_v14 = vld [vmem:[%s3908_s29 + $0x30] sm:$0xff] }
 0x3c9   : >> { %2960 = vst [vmem:[%s3904_s24 + $0x20] sm:$0xff] %v2959_v25  ;;  %2962 = vst [vmem:[%s3904_s24 + $0x28] sm:$0xff] %v2961_v29  ;;  %v2965_v18 = vld [vmem:[%s3908_s29 + $0x38] sm:$0xff]  ;;  %s4793_s20 = smov (%p2968_p11, %s2967_s20), 0  ;;  %2947 = sbr.rel (!%p2944_p12) target bundleno = 966 (0x3c6), region = 134 }
 0x3ca   : >> { %2964 = vst [vmem:[%s3904_s24 + $0x30] sm:$0xff] %v2963_v14  ;;  %2966 = vst [vmem:[%s3904_s24 + $0x38] sm:$0xff] %v2965_v18  ;;  %s3117_s23 = sshll.u32 %s4793_s20, 6  ;;  %s4786_s12 = smov %s4793_s20 }
 0x3cb   : >> { %s2972_s29 = scalar_lea.vmem %s4696_s21, %s3117_s23 [#allocation2]   ;;  %s2973_s24 = scalar_lea.vmem %s4722_s16, %s3117_s23  }
 0x3ce PF: > { %s4758_s26 = sand.u32 7, %s4791_s11   ;;  %s3128_s27 = sshll.u32 %s4728_s18, 6 }
 0x3cf   : > { %s2978_s30 = scalar_lea.vmem %s4696_s21, %s3128_s27 [#allocation2]   ;;  %s2980_s7 = scalar_lea.vmem %s4722_s16, %s3128_s27  }
 0x3d0   : > { %p3122_p13 = scmp.le.s32.totalorder %s4758_s26, 0 }
 0x3d1   : > { %s3918_s8 = smov (!%p3122_p13), %s2980_s7   ;;  %s3922_s9 = smov (!%p3122_p13), %s2978_s30  }
 0x3d2   : > { %3071 = sbr.rel (%p3122_p13) target bundleno = 991 (0x3df), region = 139  ;;  %s3926_s10 = smov (!%p3122_p13), 0  }
 0x3d3   : > { %s3930_s13 = smov (!%p3122_p13), 0  }
 0x3d7 LB: >> { %v2990_v4 = vld [vmem:[%s3924_s9] sm:$0xff]  ;;  %s2992_s11 = sadd.s32 1, %s3928_s10  ;;  %s2984_s13 = sadd.s32 1, %s3932_s13   ;;  %s3932_s13 = sphi %s3930_s13, %s2984_s13   ;;  %s3928_s10 = sphi %s3926_s10, %s3927_s10   ;;  %s3924_s9 = sphi %s3922_s9, %s2997_s9   ;;  %s3920_s8 = sphi %s3918_s8, %s2998_s8  }
 0x3d8   : >> { %2991 = vst [vmem:[%s3920_s8] sm:$0xff] %v2990_v4  ;;  %p2993_p0 = scmp.ge.s32.totalorder %s2992_s11, %s4758_s26  ;;  %p2983_p1 = scmp.ge.s32.totalorder %s2984_s13, %s4758_s26 }
 0x3da   : >> { %s4795_s11 = smov (%p2993_p0, %s2992_s11), 0  ;;  %2986 = sbr.rel (!%p2983_p1) target bundleno = 983 (0x3d7), region = 145 }
 0x3db   : >> { %s3123_s21 = sshll.u32 %s4795_s11, 3  ;;  %s3927_s10 = smov %s4795_s11  }
 0x3dc   : >> { %s2997_s9 = scalar_lea.vmem %s2978_s30, %s3123_s21 [#allocation2]   ;;  %s2998_s8 = scalar_lea.vmem %s2980_s7, %s3123_s21  }
 0x3df PF: > { %p13_p2 = scmp.ge.s32.totalorder %s3984_s25, 4   ;;  %s4787_s21 = smov %s3896_s22 }
 0x3e0   : > { %s4788_s22 = smov %s3992_s28  ;;  %s4789_s23 = smov %s3984_s25 }
 0x3e1   :  { %15 = sbr.rel (!%p13_p2) target bundleno = 2 (0x2), region = 156 }

// kernel: pna_imc_forward.4
= control target key start
LH: loop header
LB: loop body
LE: loop exit
PB: predicated region body
PF: predicated region fallthrough
CT: control target
= control target key end

     0   :  { %s4097_s21 = smov 0   ;;  %s4099_s22 = smov 0   ;;  %s4996_s0 = inlined_call_operand.vmem [shape: f32[200,96], index: 0, kind: input, shape index: {}]   ;;  %s4997_s1 = inlined_call_operand.vmem [shape: f32[96,32], index: 1, kind: input, shape index: {}]   ;;  %s4998_s2 = inlined_call_operand.vmem [shape: f32[1,32], index: 2, kind: input, shape index: {}]   ;;  %s4999_s3 = inlined_call_operand.vmem [shape: f32[32,16], index: 3, kind: input, shape index: {}]   ;;  %s5000_s4 = inlined_call_operand.vmem [shape: f32[1,16], index: 4, kind: input, shape index: {}]   ;;  %s5001_s5 = inlined_call_operand.vmem [shape: f32[16,8], index: 5, kind: input, shape index: {}]   ;;  %s5002_s6 = inlined_call_operand.vmem [shape: f32[200,8], index: 6, kind: output, shape index: {}]  }
   0x1   :  { %s4101_s23 = smov 0  }
   0x2 LB: > { %s4110_s24 = sadd.s32 4294967295, %s4028_s23   ;;  %s4112_s25 = sadd.s32 1, %s4028_s23   ;;  %s4028_s23 = sphi %s4101_s23, %s5009_s23   ;;  %s4024_s22 = sphi %s4099_s22, %s5008_s22   ;;  %s4020_s21 = sphi %s4097_s21, %s5007_s21  }
   0x3   : > { %s151_s26 = ssub.s32 %s4028_s23, %s4112_s25  ;;  %s154_s27 = sadd.s32 1, %s4024_s22 }
   0x4   : > { %p152_p0 = scmp.eq.s32.totalorder %s151_s26, 0  ;;  %p164_p1 = scmp.ne.s32.totalorder %s4024_s22, %s4020_s21 }
   0x5   : > { %p165_p2 = scmp.eq.s32.totalorder %s4110_s24, 3  ;;  %p3160_p3 = scmp.ge.s32.totalorder %s4028_s23, 1 }
   0x6   : > { %s4120_s28 = scalar_select %p152_p0, %s4024_s22, %s154_s27  }
   0x7   : > { %p4122_p4 = por %p165_p2, %p164_p1  ;;  %p221_p5 = scmp.lt.s32.totalorder %s4028_s23, 5 }
   0x9   : > { %p222_p6 = pnand %p3160_p3, %p221_p5 }
   0xa   : > { %s4136_s12 = sshll.u32 (!%p222_p6), %s4110_s24, 3  ;;  %s251_s18 = sand.u32 (!%p222_p6), 1, %s4020_s21  }
   0xb   : > { %225 = sbr.rel (%p222_p6) target bundleno = 1017 (0x3f9), region = 44  ;;  %p259_p7 = scmp.lt.s32.totalorder (!%p222_p6), %s4136_s12, 24 }
   0xc   : > { %s3161_s19 = sshll.u32 (!%p222_p6), %s251_s18, 6 }
   0xd   : > { %s4916_s21 = scalar_lea.vmem (!%p222_p6), [#allocation2], %s3161_s19  }
  0x10   : > { %v292_v0 = vld [vmem:[%s4997_s1 + $0x58] sm:$0xff]  ;;  %v291_v1 = vld [vmem:[%s4997_s1 + $0x50] sm:$0xff]  ;;  %v290_v2 = vld [vmem:[%s4997_s1 + $0x48] sm:$0xff]  ;;  %s260_s7 = scalar_select %p259_p7, %s4136_s12, 24  ;;  %vm300_vm0 = vcmask 785408   ;;  %vm1226_vm1 = vcmask 261120  }
  0x11   : > { %v4138_v3 = vand.u32 4294901760, %v292_v0  ;;  %v4140_v4 = vand.u32 4294901760, %v291_v1  ;;  %v4142_v5 = vand.u32 4294901760, %v290_v2  ;;  %v289_v6 = vld [vmem:[%s4997_s1 + $0x40] sm:$0xff]  ;;  %v288_v7 = vld [vmem:[%s4997_s1 + $0x38] sm:$0xff]  ;;  %v287_v8 = vld [vmem:[%s4997_s1 + $0x30] sm:$0xff] }
  0x12   : > { %v4153_v9 = vand.u32 4294901760, %v289_v6  ;;  %v4155_v10 = vand.u32 4294901760, %v288_v7  ;;  %v4157_v11 = vand.u32 4294901760, %v287_v8  ;;  %v286_v12 = vld [vmem:[%s4997_s1 + $0x28] sm:$0xff]  ;;  %v285_v13 = vld [vmem:[%s4997_s1 + $0x20] sm:$0xff]  ;;  %v284_v18 = vld [vmem:[%s4997_s1 + $0x18] sm:$0xff] }
  0x13   : > { %3438 = vmatprep.subr.mxu0 %v4138_v3  ;;  %v4167_v14 = vsub.f32 %v292_v0, %v4138_v3  ;;  %v4170_v15 = vsub.f32 %v291_v1, %v4140_v4  ;;  %v4172_v16 = vand.u32 4294901760, %v286_v12  ;;  %v4175_v17 = vsub.f32 %v290_v2, %v4142_v5  ;;  %v283_v32 = vld [vmem:[%s4997_s1 + $0x10] sm:$0xff]  ;;  %s3163_s10 = sshll.u32 %s260_s7, 3  ;;  %v282_v38 = vld [vmem:[%s4997_s1 + $0x8] sm:$0xff]  ;;  %v281_v46 = vld [vmem:[%s4997_s1] sm:$0xff]  ;;  %s2921_s20 = ssub.s32 (%p4122_p4), 25, %s4136_s12 }
  0x14   : > { %3439 = vmatpush3.msra.mxu0 %v4138_v3  ;;  %v4183_v19 = vsub.f32 %v289_v6, %v4153_v9  ;;  %v4186_v20 = vsub.f32 %v288_v7, %v4155_v10  ;;  %v4198_v24 = vand.u32 4294901760, %v285_v13  ;;  %v4205_v26 = vand.u32 4294901760, %v284_v18  ;;  %s4230_s14 = scalar_lea.vmem %s4996_s0, %s3163_s10  ;;  %s3183_s23 = sshll.u32 (%p4122_p4), %s4110_s24, 6 }
  0x15   : > { %3440 = vmatprep.subr.mxu0 %v4140_v4  ;;  %v4190_v21 = vand.u32 4294901760, %v4167_v14  ;;  %v4193_v22 = vand.u32 4294901760, %v4170_v15  ;;  %v4196_v23 = vand.u32 4294901760, %v4175_v17  ;;  %v4211_v28 = vsub.f32 %v287_v8, %v4157_v11  ;;  %v273_v39 = vld [vmem:[%s4230_s14] sm:$0xff]  ;;  %v274_v40 = vld [vmem:[%s4230_s14 + $0x8] sm:$0xff]  ;;  %v275_v60 = vld [vmem:[%s4230_s14 + $0x10] sm:$0xff]  ;;  %s4942_s30 = scalar_lea.vmem (%p4122_p4), %s5002_s6, %s3183_s23  }
  0x16   : > { %3441 = vmatpush3.msra.mxu0 %v4140_v4  ;;  %v4203_v25 = vand.u32 4294901760, %v4183_v19  ;;  %v4208_v27 = vand.u32 4294901760, %v4186_v20  ;;  %v4224_v33 = vsub.f32 %v286_v12, %v4172_v16  ;;  %v4246_v43 = vand.u32 4294901760, %v283_v32  ;;  %v276_v0 = vld [vmem:[%s4230_s14 + $0x18] sm:$0xff]  ;;  %p2922_p8 = scmp.lt.s32.totalorder (%p4122_p4), %s2921_s20, 8 }
  0x17   : > { %3442 = vmatprep.subr.mxu0 %v4142_v5  ;;  %v494_v29 = vsub.f32 %v4167_v14, %v4190_v21  ;;  %v501_v30 = vsub.f32 %v4170_v15, %v4193_v22  ;;  %v508_v31 = vsub.f32 %v4175_v17, %v4196_v23  ;;  %v4236_v37 = vand.u32 4294901760, %v4211_v28 }
  0x18   : > { %3443 = vmatpush3.msra.mxu0 %v4142_v5  ;;  %v515_v36 = vsub.f32 %v4183_v19, %v4203_v25  ;;  %v522_v42 = vsub.f32 %v4186_v20, %v4208_v27  ;;  %v4249_v44 = vsub.f32 %v285_v13, %v4198_v24  ;;  %v4253_v45 = vand.u32 4294901760, %v4224_v33 }
  0x19   : > { %3444 = vmatprep.subr.mxu0 %v4153_v9  ;;  %v495_v34 = vand.u32 4294901760, %v494_v29  ;;  %v502_v35 = vand.u32 4294901760, %v501_v30  ;;  %v509_v41 = vand.u32 4294901760, %v508_v31  ;;  %v302_v47 = vsel %vm300_vm0, %v273_v39, 0  ;;  %v278_v39 = vld [vmem:[%s4230_s14 + $0x28] sm:$0xff] }
  0x1a   : > { %3445 = vmatpush3.msra.mxu0 %v4153_v9  ;;  %v4260_v48 = vsub.f32 %v284_v18, %v4205_v26  ;;  %v305_v49 = vsel %vm300_vm0, %v274_v40, 0  ;;  %v4264_v50 = vand.u32 4294901760, %v282_v38  ;;  %v4266_v51 = vand.u32 4294901760, %v302_v47 }
  0x1b   : > { %3446 = vmatprep.subr.mxu0 %v4155_v10  ;;  %3474 = vmatprep.subr.mxu1 %v495_v34  ;;  %v4268_v52 = vand.u32 4294901760, %v305_v49  ;;  %v516_v53 = vand.u32 4294901760, %v515_v36  ;;  %v529_v54 = vsub.f32 %v4211_v28, %v4236_v37  ;;  %v4274_v55 = vand.u32 4294901760, %v4249_v44 }
  0x1c   : > { %3447 = vmatpush3.msra.mxu0 %v4155_v10  ;;  %3475 = vmatpush3.msra.mxu1 %v495_v34  ;;  %v4277_v56 = vand.u32 4294901760, %v281_v46  ;;  %v4280_v57 = vsub.f32 %v302_v47, %v4266_v51  ;;  %v4286_v59 = vsub.f32 %v283_v32, %v4246_v43  ;;  %v523_v61 = vand.u32 4294901760, %v522_v42  ;;  %v277_v34 = vld [vmem:[%s4230_s14 + $0x20] sm:$0xff] }
  0x1d   : > { %3448 = vmatprep.subr.mxu0 %v4157_v11  ;;  %3476 = vmatprep.subr.mxu1 %v502_v35  ;;  %v4283_v58 = vsub.f32 %v305_v49, %v4268_v52  ;;  %v536_v62 = vsub.f32 %v4224_v33, %v4253_v45  ;;  %v4293_v63 = vand.u32 4294901760, %v4260_v48  ;;  %v4300_v6 = vsub.f32 %v282_v38, %v4264_v50 }
  0x1e   : > { %3449 = vmatpush3.msra.mxu0 %v4157_v11  ;;  %3477 = vmatpush3.msra.mxu1 %v502_v35  ;;  %v404_v1 = vand.u32 4294901760, %v4280_v57  ;;  %v530_v7 = vand.u32 4294901760, %v529_v54  ;;  %v543_v8 = vsub.f32 %v4249_v44, %v4274_v55  ;;  %v308_v12 = vsel %vm300_vm0, %v275_v60, 0 }
  0x1f   : > { %3450 = vmatprep.subr.mxu0 %v4172_v16  ;;  %3478 = vmatprep.subr.mxu1 %v509_v41  ;;  %v414_v2 = vand.u32 4294901760, %v4283_v58  ;;  %v4308_v13 = vand.u32 4294901760, %v4286_v59  ;;  %v4311_v18 = vsub.f32 %v281_v46, %v4277_v56  ;;  %v311_v29 = vsel %vm300_vm0, %v276_v0, 0  ;;  %v279_v0 = vld [vmem:[%s4230_s14 + $0x30] sm:$0xff] }
  0x20   : > { %3451 = vmatpush3.msra.mxu0 %v4172_v16  ;;  %3479 = vmatpush3.msra.mxu1 %v509_v41  ;;  %v537_v30 = vand.u32 4294901760, %v536_v62  ;;  %v405_v31 = vsub.f32 %v4280_v57, %v404_v1  ;;  %v550_v32 = vsub.f32 %v4260_v48, %v4293_v63  ;;  %v4326_v36 = vand.u32 4294901760, %v4300_v6 }
  0x21   : > { %3452 = vmatprep.subr.mxu0 %v4198_v24  ;;  %3480 = vmatprep.subr.mxu1 %v516_v53  ;;  %v415_v35 = vsub.f32 %v4283_v58, %v414_v2  ;;  %v4328_v38 = vand.u32 4294901760, %v308_v12  ;;  %v544_v40 = vand.u32 4294901760, %v543_v8  ;;  %v4332_v41 = vand.u32 4294901760, %v311_v29 }
  0x22   : > { %3453 = vmatpush3.msra.mxu0 %v4198_v24  ;;  %3481 = vmatpush3.msra.mxu1 %v516_v53  ;;  %v557_v42 = vsub.f32 %v4286_v59, %v4308_v13  ;;  %v4338_v46 = vand.u32 4294901760, %v4311_v18  ;;  %v314_v47 = vsel %vm300_vm0, %v277_v34, 0  ;;  %v406_v49 = vand.u32 4294901760, %v405_v31 }
  0x23   : > { %3454 = vmatprep.subr.mxu0 %v4205_v26  ;;  %3482 = vmatprep.subr.mxu1 %v523_v61  ;;  %v551_v53 = vand.u32 4294901760, %v550_v32  ;;  %v317_v54 = vsel %vm300_vm0, %v278_v39, 0  ;;  %v416_v60 = vand.u32 4294901760, %v415_v35  ;;  %v4347_v62 = vsub.f32 %v308_v12, %v4328_v38  ;;  %v280_v12 = vld [vmem:[%s4230_s14 + $0x38] sm:$0xff] }
  0x24   : > { %3455 = vmatpush3.msra.mxu0 %v4205_v26  ;;  %3483 = vmatpush3.msra.mxu1 %v523_v61  ;;  %v564_v61 = vsub.f32 %v4300_v6, %v4326_v36  ;;  %v4354_v8 = vand.u32 4294901760, %v314_v47  ;;  %v571_v31 = vsub.f32 %v4311_v18, %v4338_v46  ;;  %v4359_v32 = vand.u32 4294901760, %v317_v54 }
  0x25   : > { %3456 = vmatprep.subr.mxu0 %v4246_v43  ;;  %3484 = vmatprep.subr.mxu1 %v530_v7  ;;  %v320_v34 = vsel %vm300_vm0, %v279_v0, 0  ;;  %v424_v35 = vand.u32 4294901760, %v4347_v62  ;;  %vm2069_vm4 = vcmask 130048   ;;  %vm2904_vm11 = vcmask 64512  }
  0x26   : > { %3457 = vmatpush3.msra.mxu0 %v4246_v43  ;;  %3485 = vmatpush3.msra.mxu1 %v530_v7  ;;  %v4352_v7 = vsub.f32 %v311_v29, %v4332_v41  ;;  %v565_v29 = vand.u32 4294901760, %v564_v61  ;;  %v4373_v0 = vsub.f32 %v317_v54, %v4359_v32 }
  0x27   : > { %3458 = vmatprep.subr.mxu0 %v4264_v50  ;;  %3486 = vmatprep.subr.mxu1 %v537_v30 }
  0x28   : > { %3459 = vmatpush3.msra.mxu0 %v4264_v50  ;;  %3487 = vmatpush3.msra.mxu1 %v537_v30  ;;  %v558_v30 = vand.u32 4294901760, %v557_v42  ;;  %v434_v39 = vand.u32 4294901760, %v4352_v7  ;;  %v323_v42 = vsel %vm300_vm0, %v280_v12, 0 }
  0x29   : > { %3460 = vmatprep.subr.mxu0 %v4277_v56  ;;  %3488 = vmatprep.subr.mxu1 %v544_v40 }
  0x2a   : > { %3461 = vmatpush3.msra.mxu0 %v4277_v56  ;;  %3489 = vmatpush3.msra.mxu1 %v544_v40  ;;  %v4368_v40 = vsub.f32 %v314_v47, %v4354_v8  ;;  %v4382_v47 = vand.u32 4294901760, %v323_v42 }
  0x2b   : > { %3462 = vmatprep.mubr.f32.mxu0 %v406_v49  ;;  %3490 = vmatprep.subr.mxu1 %v551_v53  ;;  %v572_v49 = vand.u32 4294901760, %v571_v31 }
  0x2c   : > { %3510 = vmatprep.subr.mxu0 %v4167_v14  ;;  %3463 = vmatmul.mubr.f32.vlgmr.msra.gmra.mxu0 %v416_v60  ;;  %v4375_v60 = vand.u32 4294901760, %v320_v34  ;;  %v444_v54 = vand.u32 4294901760, %v4368_v40 }
  0x2d   : > { %3491 = vmatpush3.msra.mxu1 %v551_v53  ;;  %3511 = vmatpush3.msra.mxu0 %v4167_v14  ;;  %v425_v14 = vsub.f32 %v4347_v62, %v424_v35  ;;  %v435_v53 = vsub.f32 %v4352_v7, %v434_v39 }
  0x2e   : > { %3492 = vmatprep.subr.mxu1 %v558_v30  ;;  %3512 = vmatprep.subr.mxu0 %v4170_v15  ;;  %v4392_v61 = vsub.f32 %v320_v34, %v4375_v60  ;;  %v445_v12 = vsub.f32 %v4368_v40, %v444_v54 }
  0x2f   : > { %3493 = vmatpush3.msra.mxu1 %v558_v30  ;;  %3513 = vmatpush3.msra.mxu0 %v4170_v15  ;;  %v454_v15 = vand.u32 4294901760, %v4373_v0  ;;  %v4398_v30 = vsub.f32 %v323_v42, %v4382_v47  ;;  %v436_v31 = vand.u32 4294901760, %v435_v53 }
  0x30   : > { %3494 = vmatprep.subr.mxu1 %v565_v29  ;;  %3514 = vmatprep.subr.mxu0 %v4175_v17  ;;  %v464_v34 = vand.u32 4294901760, %v4392_v61 }
  0x31   : > { %3495 = vmatpush3.msra.mxu1 %v565_v29  ;;  %3515 = vmatpush3.msra.mxu0 %v4175_v17  ;;  %v426_v17 = vand.u32 4294901760, %v425_v14  ;;  %v474_v29 = vand.u32 4294901760, %v4398_v30 }
  0x32   : > { %3496 = vmatprep.subr.mxu1 %v572_v49  ;;  %3516 = vmatprep.subr.mxu0 %v4183_v19 }
  0x33   : > { %3497 = vmatpush3.msra.mxu1 %v572_v49  ;;  %3498 = vmatprep.mubr.f32.mxu1 %v4266_v51  ;;  %v465_v49 = vsub.f32 %v4392_v61, %v464_v34 }
  0x34   : > { %3517 = vmatpush3.msra.mxu0 %v4183_v19  ;;  %3499 = vmatmul.mubr.f32.vlgmr.msra.gmra.mxu1 %v4268_v52  ;;  %v455_v19 = vsub.f32 %v4373_v0, %v454_v15 }
  0x35   : > { %3518 = vmatprep.subr.mxu0 %v4186_v20  ;;  %3546 = vmatprep.subr.mxu1 %v4138_v3  ;;  %v466_v14 = vand.u32 4294901760, %v465_v49 }
  0x36   : > { %3519 = vmatpush3.msra.mxu0 %v4186_v20  ;;  %3547 = vmatpush3.msra.mxu1 %v4138_v3  ;;  %v446_v20 = vand.u32 4294901760, %v445_v12  ;;  %v456_v42 = vand.u32 4294901760, %v455_v19 }
  0x37   : > { %3520 = vmatprep.subr.mxu0 %v4211_v28  ;;  %3548 = vmatprep.subr.mxu1 %v4140_v4 }
  0x38   : > { %3465 = vmatprep.mubr.f32.mxu0 %v426_v17  ;;  %3521 = vmatpush3.msra.mxu0 %v4211_v28  ;;  %v475_v28 = vsub.f32 %v4398_v30, %v474_v29  ;;  %v3164_v17 = vld [vmem:[%s4998_s2] ss:$0 sm:$0xff] }
  0x39   : > { %3549 = vmatpush3.msra.mxu1 %v4140_v4  ;;  %3466 = vmatmul.mubr.f32.gmra.mxu0 %v436_v31 }
  0x3a   : > { %3522 = vmatprep.subr.mxu0 %v4224_v33  ;;  %3550 = vmatprep.subr.mxu1 %v4142_v5 }
  0x3b   : > { %3523 = vmatpush3.msra.mxu0 %v4224_v33  ;;  %3551 = vmatpush3.msra.mxu1 %v4142_v5  ;;  %v476_v33 = vand.u32 4294901760, %v475_v28 }
  0x3c   : > { %3524 = vmatprep.subr.mxu0 %v4249_v44  ;;  %3552 = vmatprep.subr.mxu1 %v4153_v9 }
  0x3d   : > { %3468 = vmatprep.mubr.f32.mxu0 %v446_v20  ;;  %3525 = vmatpush3.msra.mxu0 %v4249_v44 }
  0x3e   : > { %3553 = vmatpush3.msra.mxu1 %v4153_v9  ;;  %3469 = vmatmul.mubr.f32.gmra.mxu0 %v456_v42 }
  0x3f   : > { %3526 = vmatprep.subr.mxu0 %v4260_v48  ;;  %3554 = vmatprep.subr.mxu1 %v4155_v10 }
  0x40   : > { %3527 = vmatpush3.msra.mxu0 %v4260_v48  ;;  %3555 = vmatpush3.msra.mxu1 %v4155_v10 }
  0x41   : > { %3501 = vmatprep.mubr.f32.mxu1 %v4328_v38  ;;  %3528 = vmatprep.subr.mxu0 %v4286_v59 }
  0x42   : > { %3556 = vmatprep.subr.mxu1 %v4157_v11  ;;  %3471 = vmatprep.mubr.f32.mxu0 %v466_v14 }
  0x43   : > { %3502 = vmatmul.mubr.f32.gmra.mxu1 %v4332_v41  ;;  %3529 = vmatpush3.msra.mxu0 %v4286_v59 }
  0x44   : > { %3557 = vmatpush3.msra.mxu1 %v4157_v11  ;;  %3472 = vmatmul.mubr.f32.gmra.mxu0 %v476_v33 }
  0x45   : > { %3530 = vmatprep.subr.mxu0 %v4300_v6  ;;  %3558 = vmatprep.subr.mxu1 %v4172_v16 }
  0x46   : > { %3531 = vmatpush3.msra.mxu0 %v4300_v6  ;;  %3559 = vmatpush3.msra.mxu1 %v4172_v16 }
  0x47   : > { %3504 = vmatprep.mubr.f32.mxu1 %v4354_v8  ;;  %3532 = vmatprep.subr.mxu0 %v4311_v18 }
  0x48   : > { %3560 = vmatprep.subr.mxu1 %v4198_v24  ;;  %3505 = vmatmul.mubr.f32.gmra.mxu1 %v4359_v32 }
  0x49   : > { %3533 = vmatpush3.msra.mxu0 %v4311_v18  ;;  %3534 = vmatprep.mubr.f32.mxu0 %v4280_v57 }
  0x4a   : > { %3561 = vmatpush3.msra.mxu1 %v4198_v24  ;;  %3535 = vmatmul.mubr.f32.vlgmr.msra.gmra.mxu0 %v4283_v58 }
  0x4b   : > { %3562 = vmatprep.subr.mxu1 %v4205_v26  ;;  %3582 = vmatprep.subr.mxu0 %v4190_v21 }
  0x4c   : > { %3563 = vmatpush3.msra.mxu1 %v4205_v26  ;;  %3583 = vmatpush3.msra.mxu0 %v4190_v21 }
  0x4d   : > { %3507 = vmatprep.mubr.f32.mxu1 %v4375_v60  ;;  %3564 = vmatprep.subr.mxu1 %v4246_v43 }
  0x4e   : > { %3584 = vmatprep.subr.mxu0 %v4193_v22  ;;  %3508 = vmatmul.mubr.f32.gmra.mxu1 %v4382_v47 }
  0x4f   : > { %3537 = vmatprep.mubr.f32.mxu0 %v4347_v62  ;;  %3565 = vmatpush3.msra.mxu1 %v4246_v43 }
  0x50   : > { %3585 = vmatpush3.msra.mxu0 %v4193_v22  ;;  %3566 = vmatprep.subr.mxu1 %v4264_v50 }
  0x51   : > { %3538 = vmatmul.mubr.f32.gmra.mxu0 %v4352_v7  ;;  %3586 = vmatprep.subr.mxu0 %v4196_v23 }
  0x52   : > { %3567 = vmatpush3.msra.mxu1 %v4264_v50  ;;  %3587 = vmatpush3.msra.mxu0 %v4196_v23  ;;  %v1215_v23 = vld [vmem:[%s4999_s3] sm:$0xff] }
  0x53   : > { %3568 = vmatprep.subr.mxu1 %v4277_v56  ;;  %3588 = vmatprep.subr.mxu0 %v4203_v25 }
  0x54   : > { %3540 = vmatprep.mubr.f32.mxu0 %v4368_v40  ;;  %3569 = vmatpush3.msra.mxu1 %v4277_v56 }
  0x55   : > { %3570 = vmatprep.mubr.f32.mxu1 %v404_v1  ;;  %3589 = vmatpush3.msra.mxu0 %v4203_v25 }
  0x56   : > { %3541 = vmatmul.mubr.f32.gmra.mxu0 %v4373_v0  ;;  %3571 = vmatmul.mubr.f32.vlgmr.msra.gmra.mxu1 %v414_v2 }
  0x57   : > { %3590 = vmatprep.subr.mxu0 %v4208_v27  ;;  %3618 = vmatprep.subr.mxu1 %v4138_v3 }
  0x58   : > { %3591 = vmatpush3.msra.mxu0 %v4208_v27  ;;  %3619 = vmatpush3.msra.mxu1 %v4138_v3  ;;  %v1218_v3 = vld [vmem:[%s4999_s3 + $0x18] sm:$0xff]  ;;  %v4587_v27 = vand.u32 4294901760, %v1215_v23 }
  0x59   : > { %3592 = vmatprep.subr.mxu0 %v4236_v37  ;;  %3620 = vmatprep.subr.mxu1 %v4140_v4 }
  0x5a   : > { %3543 = vmatprep.mubr.f32.mxu0 %v4392_v61  ;;  %3573 = vmatprep.mubr.f32.mxu1 %v424_v35 }
  0x5b   : > { %3593 = vmatpush3.msra.mxu0 %v4236_v37  ;;  %3621 = vmatpush3.msra.mxu1 %v4140_v4  ;;  %v4551_v4 = vand.u32 4294901760, %v1218_v3 }
  0x5c   : > { %3544 = vmatmul.mubr.f32.gmra.mxu0 %v4398_v30  ;;  %3574 = vmatmul.mubr.f32.gmra.mxu1 %v434_v39 }
  0x5d   : > { %3594 = vmatprep.subr.mxu0 %v4253_v45  ;;  %3622 = vmatprep.subr.mxu1 %v4142_v5 }
  0x5e   : > { %3595 = vmatpush3.msra.mxu0 %v4253_v45  ;;  %3623 = vmatpush3.msra.mxu1 %v4142_v5  ;;  %v1217_v5 = vld [vmem:[%s4999_s3 + $0x10] sm:$0xff]  ;;  %v4597_v45 = vsub.f32 %v1215_v23, %v4587_v27 }
  0x5f   : > { %3596 = vmatprep.subr.mxu0 %v4274_v55  ;;  %3624 = vmatprep.subr.mxu1 %v4153_v9 }
  0x60   : > { %3576 = vmatprep.mubr.f32.mxu1 %v444_v54  ;;  %3597 = vmatpush3.msra.mxu0 %v4274_v55 }
  0x61   : > { %3625 = vmatpush3.msra.mxu1 %v4153_v9  ;;  %3598 = vmatprep.subr.mxu0 %v4293_v63  ;;  %v4558_v9 = vsub.f32 %v1218_v3, %v4551_v4 }
  0x62   : > { %3577 = vmatmul.mubr.f32.gmra.mxu1 %v454_v15  ;;  %3626 = vmatprep.subr.mxu1 %v4155_v10 }
  0x63   : > { %3599 = vmatpush3.msra.mxu0 %v4293_v63  ;;  %3627 = vmatpush3.msra.mxu1 %v4155_v10  ;;  %v4560_v10 = vand.u32 4294901760, %v1217_v5 }
  0x64   : > { %3600 = vmatprep.subr.mxu0 %v4308_v13  ;;  %3628 = vmatprep.subr.mxu1 %v4157_v11 }
  0x65   : > { %3579 = vmatprep.mubr.f32.mxu1 %v464_v34  ;;  %3601 = vmatpush3.msra.mxu0 %v4308_v13  ;;  %v4570_v21 = vsub.f32 %v1217_v5, %v4560_v10 }
  0x66   : > { %3629 = vmatpush3.msra.mxu1 %v4157_v11  ;;  %3602 = vmatprep.subr.mxu0 %v4326_v36  ;;  %v1216_v11 = vld [vmem:[%s4999_s3 + $0x8] sm:$0xff] }
  0x67   : > { %3580 = vmatmul.mubr.f32.gmra.mxu1 %v474_v29  ;;  %3630 = vmatprep.subr.mxu1 %v4172_v16  ;;  %v4573_v22 = vand.u32 4294901760, %v1216_v11  ;;  %v4582_v25 = vand.u32 4294901760, %v4570_v21 }
  0x68   : > { %3603 = vmatpush3.msra.mxu0 %v4326_v36  ;;  %3631 = vmatpush3.msra.mxu1 %v4172_v16  ;;  %v4567_v16 = vand.u32 4294901760, %v4558_v9 }
  0x69   : > { %3604 = vmatprep.subr.mxu0 %v4338_v46  ;;  %3632 = vmatprep.subr.mxu1 %v4198_v24 }
  0x6a   : > { %3605 = vmatpush3.msra.mxu0 %v4338_v46  ;;  %3606 = vmatprep.mubr.f32.mxu0 %v4266_v51 }
  0x6b   : > { %3633 = vmatpush3.msra.mxu1 %v4198_v24  ;;  %3607 = vmatmul.mubr.f32.vlgmr.msra.gmra.mxu0 %v4268_v52  ;;  %v1428_v24 = vsub.f32 %v4558_v9, %v4567_v16 }
  0x6c   : > { %3634 = vmatprep.subr.mxu1 %v4205_v26  ;;  %3609 = vmatprep.mubr.f32.mxu0 %v4328_v38 }
  0x6d   : > { %3635 = vmatpush3.msra.mxu1 %v4205_v26  ;;  %3642 = vmatprep.mubr.f32.mxu1 %v4266_v51  ;;  %v4585_v26 = vsub.f32 %v1216_v11, %v4573_v22  ;;  %v1429_v37 = vand.u32 4294901760, %v1428_v24  ;;  %v4604_v51 = vand.u32 4294901760, %v4597_v45 }
  0x6e   : > { %3636 = vmatprep.subr.mxu1 %v4246_v43  ;;  %3654 = vmatprep.subr.mxu0 %v4551_v4 }
  0x6f   : > { %3637 = vmatpush3.msra.mxu1 %v4246_v43  ;;  %3610 = vmatmul.mubr.f32.gmra.mxu0 %v4332_v41  ;;  %v1435_v43 = vsub.f32 %v4570_v21, %v4582_v25  ;;  %v4594_v44 = vand.u32 4294901760, %v4585_v26  ;;  %v1449_v55 = vsub.f32 %v4597_v45, %v4604_v51 }
  0x70   : > { %3638 = vmatprep.subr.mxu1 %v4264_v50  ;;  %3612 = vmatprep.mubr.f32.mxu0 %v4354_v8 }
  0x71   : > { %3639 = vmatpush3.msra.mxu1 %v4264_v50  ;;  %3655 = vmatpush3.msra.mxu0 %v4551_v4  ;;  %v1436_v48 = vand.u32 4294901760, %v1435_v43  ;;  %v1442_v50 = vsub.f32 %v4585_v26, %v4594_v44 }
  0x72   : > { %3640 = vmatprep.subr.mxu1 %v4277_v56  ;;  %3656 = vmatprep.subr.mxu0 %v4560_v10 }
  0x73   : > { %3641 = vmatpush3.msra.mxu1 %v4277_v56  ;;  %3613 = vmatmul.mubr.f32.gmra.mxu0 %v4359_v32  ;;  %v1450_v56 = vand.u32 4294901760, %v1449_v55 }
  0x74   : > { %3643 = vmatmul.mubr.f32.vlgmr.msra.gmra.mxu1 %v4268_v52  ;;  %3615 = vmatprep.mubr.f32.mxu0 %v4375_v60  ;;  %v1443_v52 = vand.u32 4294901760, %v1442_v50 }
  0x75   : > { %3645 = vmatprep.mubr.f32.mxu1 %v4328_v38  ;;  %3657 = vmatpush3.msra.mxu0 %v4560_v10 }
  0x76   : > { %3658 = vmatprep.subr.mxu0 %v4573_v22  ;;  %3674 = vmatprep.subr.mxu1 %v1429_v37 }
  0x77   : > { %3616 = vmatmul.mubr.f32.gmra.mxu0 %v4382_v47  ;;  %3675 = vmatpush3.msra.mxu1 %v1429_v37 }
  0x78   : > { %3646 = vmatmul.mubr.f32.gmra.mxu1 %v4332_v41  ;;  %3659 = vmatpush3.msra.mxu0 %v4573_v22 }
  0x79   : > { %3648 = vmatprep.mubr.f32.mxu1 %v4354_v8  ;;  %3660 = vmatprep.subr.mxu0 %v4587_v27 }
  0x7a   : > { %3661 = vmatpush3.msra.mxu0 %v4587_v27  ;;  %3676 = vmatprep.subr.mxu1 %v1436_v48 }
  0x7b   : > { %3694 = vmatprep.subr.mxu0 %v4558_v9  ;;  %3677 = vmatpush3.msra.mxu1 %v1436_v48 }
  0x7c   : > { %3649 = vmatmul.mubr.f32.gmra.mxu1 %v4359_v32  ;;  %3678 = vmatprep.subr.mxu1 %v1443_v52 }
  0x7d   : > { %3651 = vmatprep.mubr.f32.mxu1 %v4375_v60  ;;  %3679 = vmatpush3.msra.mxu1 %v1443_v52 }
  0x7e   : > { %3680 = vmatprep.subr.mxu1 %v1450_v56 }
  0x7f   : > { %3681 = vmatpush3.msra.mxu1 %v1450_v56 }
  0x80   : > { %3652 = vmatmul.mubr.f32.gmra.mxu1 %v4382_v47  ;;  %3714 = vmatprep.subr.mxu1 %v4551_v4 }
  0xec   : > { %v3464_v57 = vpop.f32.mrf.mxu0 }
  0xed   : > { %v419_v31 = vadd.f32 %v3464_v57, %v3164_v17 }
  0xee   : > { %v408_v58 = vpop.f32.mrf.mxu0 }
  0xef   : > { %v409_v34 = vadd.f32 %v3164_v17, %v408_v58 }
  0xf4   : > { %v3500_v1 = vpop.f32.mrf.mxu1 }
  0xf5   : > { %v616_v20 = vadd.f32 %v3500_v1, %v419_v31 }
  0xf6   : > { %v609_v6 = vpop.f32.mrf.mxu1 }
  0xf7   : > { %v610_v14 = vadd.f32 %v609_v6, %v409_v34 }
  0xf9   : > { %v3467_v59 = vpop.f32.mrf.mxu0 }
  0xfa   : > { %v439_v42 = vadd.f32 %v3467_v59, %v3164_v17 }
  0xfb   : > { %v428_v63 = vpop.f32.mrf.mxu0 }
  0xfc   : > { %v429_v33 = vadd.f32 %v3164_v17, %v428_v63 }
  0xfe   : > { %v3470_v2 = vpop.f32.mrf.mxu0 }
  0xff   : > { %v459_v11 = vadd.f32 %v3470_v2, %v3164_v17 }
 0x100   : > { %v448_v13 = vpop.f32.mrf.mxu0 }
 0x101   : > { %v449_v48 = vadd.f32 %v3164_v17, %v448_v13 }
 0x103   : > { %v3503_v18 = vpop.f32.mrf.mxu1 }
 0x104   : > { %v3473_v36 = vpop.f32.mrf.mxu0  ;;  %v628_v23 = vadd.f32 %v3503_v18, %v439_v42 }
 0x105   : > { %v621_v38 = vpop.f32.mrf.mxu1  ;;  %v479_v1 = vadd.f32 %v3473_v36, %v3164_v17 }
 0x106   : > { %v468_v46 = vpop.f32.mrf.mxu0  ;;  %v622_v52 = vadd.f32 %v621_v38, %v429_v33 }
 0x107   : > { %v469_v2 = vadd.f32 %v3164_v17, %v468_v46 }
 0x108   : > { %v3506_v41 = vpop.f32.mrf.mxu1 }
 0x109   : > { %v640_v59 = vadd.f32 %v3506_v41, %v459_v11 }
 0x10a   : > { %v633_v62 = vpop.f32.mrf.mxu1  ;;  %v3536_v7 = vpop.f32.mrf.mxu0 }
 0x10b   : > { %v755_v3 = vadd.f32 %v3536_v7, %v616_v20  ;;  %v634_v18 = vadd.f32 %v633_v62, %v449_v48 }
 0x10c   : > { %v747_v32 = vpop.f32.mrf.mxu0 }
 0x10d   : > { %v748_v24 = vadd.f32 %v747_v32, %v610_v14 }
 0x10e   : > { %v3509_v8 = vpop.f32.mrf.mxu1 }
 0x110   : > { %v645_v35 = vpop.f32.mrf.mxu1 }
 0x111   : > { %v3539_v39 = vpop.f32.mrf.mxu0  ;;  %v646_v46 = vadd.f32 %v645_v35, %v469_v2 }
 0x112   : > { %v769_v55 = vadd.f32 %v3539_v39, %v628_v23 }
 0x113   : > { %v761_v0 = vpop.f32.mrf.mxu0 }
 0x114   : > { %v762_v6 = vadd.f32 %v761_v0, %v622_v52 }
 0x116   : > { %v3572_v40 = vpop.f32.mrf.mxu1  ;;  %v3542_v47 = vpop.f32.mrf.mxu0 }
 0x117   : > { %v890_v37 = vadd.f32 %v3572_v40, %v755_v3  ;;  %v783_v32 = vadd.f32 %v3542_v47, %v640_v59 }
 0x118   : > { %v881_v60 = vpop.f32.mrf.mxu1  ;;  %v775_v54 = vpop.f32.mrf.mxu0 }
 0x119   : > { %v882_v56 = vadd.f32 %v881_v60, %v748_v24  ;;  %v652_v60 = vadd.f32 %v3509_v8, %v479_v1 }
 0x11c   : > { %v3575_v53 = vpop.f32.mrf.mxu1  ;;  %v3545_v61 = vpop.f32.mrf.mxu0 }
 0x11d   : > { %v906_v63 = vadd.f32 %v3575_v53, %v769_v55  ;;  %v797_v62 = vadd.f32 %v3545_v61, %v652_v60 }
 0x11e   : > { %v897_v15 = vpop.f32.mrf.mxu1  ;;  %v789_v12 = vpop.f32.mrf.mxu0 }
 0x11f   : > { %v898_v13 = vadd.f32 %v897_v15, %v762_v6  ;;  %v790_v11 = vadd.f32 %v789_v12, %v646_v46 }
 0x122   : > { %v3578_v30 = vpop.f32.mrf.mxu1 }
 0x123   : > { %v922_v14 = vadd.f32 %v3578_v30, %v783_v32 }
 0x124   : > { %v913_v19 = vpop.f32.mrf.mxu1 }
 0x127   : > { %v3581_v28 = vpop.f32.mrf.mxu1 }
 0x128   : > { %v938_v24 = vadd.f32 %v3581_v28, %v797_v62 }
 0x129   : > { %v929_v50 = vpop.f32.mrf.mxu1 }
 0x12a   : > { %v930_v48 = vadd.f32 %v929_v50, %v790_v11 }
 0x12b   : > { %v3608_v29 = vpop.f32.mrf.mxu0 }
 0x12c   : > { %v1051_v57 = vadd.f32 %v3608_v29, %v890_v37  ;;  %v776_v29 = vadd.f32 %v775_v54, %v634_v18 }
 0x12d   : > { %v1044_v49 = vpop.f32.mrf.mxu0 }
 0x12e   : > { %v1045_v7 = vadd.f32 %v1044_v49, %v882_v56  ;;  %v914_v3 = vadd.f32 %v913_v19, %v776_v29 }
 0x12f   : > { %v3611_v5 = vpop.f32.mrf.mxu0 }
 0x130   : > { %v1063_v42 = vadd.f32 %v3611_v5, %v906_v63 }
 0x131   : > { %v1056_v43 = vpop.f32.mrf.mxu0 }
 0x132   : > { %v1057_v0 = vadd.f32 %v1056_v43, %v898_v13 }
 0x133   : > { %v3614_v58 = vpop.f32.mrf.mxu0 }
 0x134   : > { %v3644_v31 = vpop.f32.mrf.mxu1  ;;  %v1075_v8 = vadd.f32 %v3614_v58, %v922_v14 }
 0x135   : > { %v1176_v34 = vadd.f32 %v3644_v31, %v1051_v57  ;;  %v1068_v40 = vpop.f32.mrf.mxu0 }
 0x136   : > { %v1169_v20 = vpop.f32.mrf.mxu1  ;;  %v1069_v37 = vadd.f32 %v1068_v40, %v914_v3 }
 0x137   : > { %v1231_v38 = vsel %vm1226_vm1, %v1176_v34, 0  ;;  %v1170_v39 = vadd.f32 %v1169_v20, %v1045_v7  ;;  %v3617_v17 = vpop.f32.mrf.mxu0 }
 0x138   : > { %v4614_v36 = vand.u32 4294901760, %v1231_v38  ;;  %v3647_v41 = vpop.f32.mrf.mxu1  ;;  %v1087_v58 = vadd.f32 %v3617_v17, %v938_v24 }
 0x139   : > { %v1228_v53 = vsel %vm1226_vm1, %v1170_v39, 0  ;;  %v1188_v49 = vadd.f32 %v3647_v41, %v1063_v42  ;;  %v1080_v52 = vpop.f32.mrf.mxu0 }
 0x13a   : > { %v4618_v47 = vsub.f32 %v1231_v38, %v4614_v36  ;;  %v4620_v15 = vand.u32 4294901760, %v1228_v53  ;;  %v1181_v33 = vpop.f32.mrf.mxu1  ;;  %v1081_v7 = vadd.f32 %v1080_v52, %v930_v48 }
 0x13b   : > { %v1237_v54 = vsel %vm1226_vm1, %v1188_v49, 0  ;;  %v1182_v5 = vadd.f32 %v1181_v33, %v1057_v0 }
 0x13c   : > { %v1332_v30 = vand.u32 4294901760, %v4618_v47  ;;  %v4625_v23 = vsub.f32 %v1228_v53, %v4620_v15  ;;  %v4627_v35 = vand.u32 4294901760, %v1237_v54  ;;  %v3650_v61 = vpop.f32.mrf.mxu1  ;;  %3682 = vmatprep.mubr.f32.mxu1 %v4620_v15 }
 0x13d   : > { %v1234_v43 = vsel %vm1226_vm1, %v1182_v5, 0  ;;  %v1200_v19 = vadd.f32 %v3650_v61, %v1075_v8  ;;  %3683 = vmatmul.mubr.f32.vlgmr.msra.gmra.mxu1 %v4614_v36 }
 0x13e   : > { %v4633_v12 = vsub.f32 %v1237_v54, %v4627_v35  ;;  %v4635_v55 = vand.u32 4294901760, %v1234_v43  ;;  %v1193_v56 = vpop.f32.mrf.mxu1  ;;  %v1322_v57 = vand.u32 4294901760, %v4625_v23  ;;  %3715 = vmatpush3.msra.mxu1 %v4551_v4  ;;  %v1333_v28 = vsub.f32 %v4618_v47, %v1332_v30 }
 0x13f   : > { %v1243_v1 = vsel %vm1226_vm1, %v1200_v19, 0  ;;  %v1194_v59 = vadd.f32 %v1193_v56, %v1069_v37  ;;  %3716 = vmatprep.subr.mxu1 %v4560_v10 }
 0x140   : > { %v4645_v50 = vsub.f32 %v1234_v43, %v4635_v55  ;;  %v4647_v31 = vand.u32 4294901760, %v1243_v1  ;;  %v3653_v6 = vpop.f32.mrf.mxu1  ;;  %3685 = vmatprep.mubr.f32.mxu1 %v4635_v55  ;;  %v1323_v63 = vsub.f32 %v4625_v23, %v1322_v57  ;;  %3717 = vmatpush3.msra.mxu1 %v4560_v10  ;;  %v1352_v18 = vand.u32 4294901760, %v4633_v12 }
 0x141   : > { %v1240_v34 = vsel %vm1226_vm1, %v1194_v59, 0  ;;  %v1212_v2 = vadd.f32 %v3653_v6, %v1087_v58  ;;  %3686 = vmatmul.mubr.f32.gmra.mxu1 %v4627_v35  ;;  %3718 = vmatprep.subr.mxu1 %v4573_v22  ;;  %v1334_v38 = vand.u32 4294901760, %v1333_v28  ;;  %v3165_v28 = vld [vmem:[%s5000_s4] ss:$0 sm:$0xff] }
 0x142   : > { %v4657_v32 = vsub.f32 %v1243_v1, %v4647_v31  ;;  %v4659_v40 = vand.u32 4294901760, %v1240_v34  ;;  %v1205_v20 = vpop.f32.mrf.mxu1  ;;  %v1324_v13 = vand.u32 4294901760, %v1323_v63  ;;  %v1342_v42 = vand.u32 4294901760, %v4645_v50  ;;  %3719 = vmatpush3.msra.mxu1 %v4573_v22 }
 0x143   : > { %v1249_v39 = vsel %vm1226_vm1, %v1212_v2, 0  ;;  %v1206_v60 = vadd.f32 %v1205_v20, %v1081_v7  ;;  %v1353_v29 = vsub.f32 %v4633_v12, %v1352_v18  ;;  %3720 = vmatprep.subr.mxu1 %v4587_v27 }
 0x144   : > { %v1361_v41 = vsub.f32 %v1240_v34, %v4659_v40  ;;  %v4667_v14 = vand.u32 4294901760, %v1249_v39  ;;  %3662 = vmatprep.mubr.f32.mxu0 %v1324_v13  ;;  %3688 = vmatprep.mubr.f32.mxu1 %v4659_v40  ;;  %v1343_v0 = vsub.f32 %v4645_v50, %v1342_v42  ;;  %v1372_v53 = vand.u32 4294901760, %v4657_v32 }
 0x145   : > { %v1246_v49 = vsel %vm1226_vm1, %v1206_v60, 0  ;;  %3663 = vmatmul.mubr.f32.vlgmr.msra.gmra.mxu0 %v1334_v38  ;;  %3689 = vmatmul.mubr.f32.gmra.mxu1 %v4647_v31  ;;  %v1354_v3 = vand.u32 4294901760, %v1353_v29 }
 0x146   : > { %v4675_v46 = vsub.f32 %v1249_v39, %v4667_v14  ;;  %v4677_v62 = vand.u32 4294901760, %v1246_v49  ;;  %3695 = vmatpush3.msra.mxu0 %v4558_v9  ;;  %v1344_v17 = vand.u32 4294901760, %v1343_v0  ;;  %v1362_v33 = vand.u32 4294901760, %v1361_v41  ;;  %3721 = vmatpush3.msra.mxu1 %v4587_v27 }
 0x147   : > { %3696 = vmatprep.subr.mxu0 %v4570_v21  ;;  %v1373_v8 = vsub.f32 %v4657_v32, %v1372_v53  ;;  %3754 = vmatprep.subr.mxu1 %v4551_v4 }
 0x148   : > { %v1381_v54 = vsub.f32 %v1246_v49, %v4677_v62  ;;  %3665 = vmatprep.mubr.f32.mxu0 %v1344_v17  ;;  %3691 = vmatprep.mubr.f32.mxu1 %v4677_v62  ;;  %v1363_v5 = vsub.f32 %v1361_v41, %v1362_v33  ;;  %v1392_v11 = vand.u32 4294901760, %v4675_v46 }
 0x149   : > { %3666 = vmatmul.mubr.f32.gmra.mxu0 %v1354_v3  ;;  %3692 = vmatmul.mubr.f32.gmra.mxu1 %v4667_v14  ;;  %v1374_v24 = vand.u32 4294901760, %v1373_v8 }
 0x14a   : > { %3697 = vmatpush3.msra.mxu0 %v4570_v21  ;;  %3722 = vmatprep.mubr.f32.mxu1 %v1322_v57  ;;  %v1364_v9 = vand.u32 4294901760, %v1363_v5  ;;  %v1382_v61 = vand.u32 4294901760, %v1381_v54  ;;  %v1393_v37 = vsub.f32 %v4675_v46, %v1392_v11 }
 0x14b   : > { %3698 = vmatprep.subr.mxu0 %v4585_v26 }
 0x14c   : > { %3668 = vmatprep.mubr.f32.mxu0 %v1364_v9  ;;  %3699 = vmatpush3.msra.mxu0 %v4585_v26  ;;  %v1383_v43 = vsub.f32 %v1381_v54, %v1382_v61  ;;  %v1394_v21 = vand.u32 4294901760, %v1393_v37 }
 0x14d   : > { %3669 = vmatmul.mubr.f32.gmra.mxu0 %v1374_v24  ;;  %3723 = vmatmul.mubr.f32.vlgmr.msra.gmra.mxu1 %v1332_v30 }
 0x14e   : > { %3725 = vmatprep.mubr.f32.mxu1 %v1342_v42  ;;  %v1384_v19 = vand.u32 4294901760, %v1383_v43  ;;  %3700 = vmatprep.subr.mxu0 %v4597_v45 }
 0x14f   : > { %3701 = vmatpush3.msra.mxu0 %v4597_v45  ;;  %3755 = vmatpush3.msra.mxu1 %v4551_v4 }
 0x150   : > { %3671 = vmatprep.mubr.f32.mxu0 %v1384_v19  ;;  %3734 = vmatprep.subr.mxu0 %v4567_v16 }
 0x151   : > { %3672 = vmatmul.mubr.f32.gmra.mxu0 %v1394_v21  ;;  %3726 = vmatmul.mubr.f32.gmra.mxu1 %v1352_v18 }
 0x152   : > { %3702 = vmatprep.mubr.f32.mxu0 %v4625_v23  ;;  %3728 = vmatprep.mubr.f32.mxu1 %v1362_v33 }
 0x153   : > { %3756 = vmatprep.subr.mxu1 %v4560_v10 }
 0x154   : > { %3757 = vmatpush3.msra.mxu1 %v4560_v10 }
 0x155   : > { %3703 = vmatmul.mubr.f32.vlgmr.msra.gmra.mxu0 %v4618_v47  ;;  %3729 = vmatmul.mubr.f32.gmra.mxu1 %v1372_v53 }
 0x156   : > { %3735 = vmatpush3.msra.mxu0 %v4567_v16  ;;  %3705 = vmatprep.mubr.f32.mxu0 %v4645_v50 }
 0x157   : > { %3731 = vmatprep.mubr.f32.mxu1 %v1382_v61  ;;  %3736 = vmatprep.subr.mxu0 %v4582_v25 }
 0x158   : > { %3737 = vmatpush3.msra.mxu0 %v4582_v25  ;;  %3758 = vmatprep.subr.mxu1 %v4573_v22 }
 0x159   : > { %3706 = vmatmul.mubr.f32.gmra.mxu0 %v4633_v12  ;;  %3732 = vmatmul.mubr.f32.gmra.mxu1 %v1392_v11 }
 0x15a   : > { %3708 = vmatprep.mubr.f32.mxu0 %v1361_v41  ;;  %3759 = vmatpush3.msra.mxu1 %v4573_v22 }
 0x15b   : > { %3762 = vmatprep.mubr.f32.mxu1 %v4620_v15  ;;  %3760 = vmatprep.subr.mxu1 %v4587_v27 }
 0x15c   : > { %3738 = vmatprep.subr.mxu0 %v4594_v44  ;;  %3761 = vmatpush3.msra.mxu1 %v4587_v27 }
 0x15d   : > { %3709 = vmatmul.mubr.f32.gmra.mxu0 %v4657_v32  ;;  %3763 = vmatmul.mubr.f32.vlgmr.msra.gmra.mxu1 %v4614_v36 }
 0x15e   : > { %3739 = vmatpush3.msra.mxu0 %v4594_v44  ;;  %3711 = vmatprep.mubr.f32.mxu0 %v1381_v54 }
 0x15f   : > { %3765 = vmatprep.mubr.f32.mxu1 %v4635_v55  ;;  %3740 = vmatprep.subr.mxu0 %v4604_v51 }
 0x160   : > { %3741 = vmatpush3.msra.mxu0 %v4604_v51 }
 0x161   : > { %3712 = vmatmul.mubr.f32.gmra.mxu0 %v4675_v46  ;;  %3766 = vmatmul.mubr.f32.gmra.mxu1 %v4627_v35 }
 0x162   : > { %3742 = vmatprep.mubr.f32.mxu0 %v4620_v15  ;;  %3768 = vmatprep.mubr.f32.mxu1 %v4659_v40 }
 0x165   : > { %3743 = vmatmul.mubr.f32.vlgmr.msra.gmra.mxu0 %v4614_v36  ;;  %3769 = vmatmul.mubr.f32.gmra.mxu1 %v4647_v31 }
 0x166   : > { %3745 = vmatprep.mubr.f32.mxu0 %v4635_v55  ;;  %3771 = vmatprep.mubr.f32.mxu1 %v4677_v62 }
 0x169   : > { %3746 = vmatmul.mubr.f32.gmra.mxu0 %v4627_v35  ;;  %3772 = vmatmul.mubr.f32.gmra.mxu1 %v4667_v14 }
 0x16a   : > { %3748 = vmatprep.mubr.f32.mxu0 %v4659_v40 }
 0x16d   : > { %3749 = vmatmul.mubr.f32.gmra.mxu0 %v4647_v31 }
 0x16e   : > { %3751 = vmatprep.mubr.f32.mxu0 %v4677_v62 }
 0x171   : > { %3752 = vmatmul.mubr.f32.gmra.mxu0 %v4667_v14 }
 0x1fd   : > { %v3684_v4 = vpop.f32.mrf.mxu1 }
 0x1ff   : > { %v1487_v10 = vpop.f32.mrf.mxu1 }
 0x201   : > { %v3687_v16 = vpop.f32.mrf.mxu1 }
 0x203   : > { %v1499_v22 = vpop.f32.mrf.mxu1 }
 0x205   : > { %v3664_v25 = vpop.f32.mrf.mxu0  ;;  %v3690_v26 = vpop.f32.mrf.mxu1 }
 0x206   : > { %v1337_v31 = vadd.f32 %v3664_v25, %v3165_v28 }
 0x207   : > { %v1326_v27 = vpop.f32.mrf.mxu0  ;;  %v1511_v44 = vpop.f32.mrf.mxu1 }
 0x208   : > { %v1327_v7 = vadd.f32 %v3165_v28, %v1326_v27  ;;  %v1494_v32 = vadd.f32 %v3684_v4, %v1337_v31 }
 0x209   : > { %v3667_v45 = vpop.f32.mrf.mxu0  ;;  %v3693_v51 = vpop.f32.mrf.mxu1 }
 0x20a   : > { %v1357_v18 = vadd.f32 %v3667_v45, %v3165_v28  ;;  %v1488_v38 = vadd.f32 %v1487_v10, %v1327_v7 }
 0x20b   : > { %v1346_v36 = vpop.f32.mrf.mxu0  ;;  %v4733_v47 = vpop.f32.mrf.mxu1 }
 0x20c   : > { %v1347_v40 = vadd.f32 %v3165_v28, %v1346_v36  ;;  %v1506_v14 = vadd.f32 %v3687_v16, %v1357_v18 }
 0x20d   : > { %v3670_v15 = vpop.f32.mrf.mxu0  ;;  %v3724_v30 = vpop.f32.mrf.mxu1 }
 0x20e   : > { %v1377_v39 = vadd.f32 %v3670_v15, %v3165_v28  ;;  %v1500_v53 = vadd.f32 %v1499_v22, %v1347_v40 }
 0x20f   : > { %v1366_v23 = vpop.f32.mrf.mxu0  ;;  %v1735_v35 = vpop.f32.mrf.mxu1 }
 0x210   : > { %v1367_v0 = vadd.f32 %v3165_v28, %v1366_v23  ;;  %v1518_v3 = vadd.f32 %v3690_v26, %v1377_v39 }
 0x211   : > { %v3673_v48 = vpop.f32.mrf.mxu0  ;;  %v3727_v12 = vpop.f32.mrf.mxu1 }
 0x212   : > { %v1397_v17 = vadd.f32 %v3673_v48, %v3165_v28  ;;  %v1512_v24 = vadd.f32 %v1511_v44, %v1367_v0 }
 0x213   : > { %v1386_v52 = vpop.f32.mrf.mxu0  ;;  %v1751_v55 = vpop.f32.mrf.mxu1 }
 0x214   : > { %v1387_v9 = vadd.f32 %v3165_v28, %v1386_v52  ;;  %v1530_v10 = vadd.f32 %v3693_v51, %v1397_v17 }
 0x215   : > { %v3704_v56 = vpop.f32.mrf.mxu0  ;;  %v3730_v57 = vpop.f32.mrf.mxu1 }
 0x216   : > { %v1617_v42 = vadd.f32 %v3704_v56, %v1494_v32  ;;  %v1524_v15 = vadd.f32 %v4733_v47, %v1387_v9 }
 0x217   : > { %v1609_v58 = vpop.f32.mrf.mxu0  ;;  %v1767_v1 = vpop.f32.mrf.mxu1 }
 0x218   : > { %v1610_v41 = vadd.f32 %v1609_v58, %v1488_v38  ;;  %v1744_v62 = vadd.f32 %v3724_v30, %v1617_v42 }
 0x219   : > { %v3707_v59 = vpop.f32.mrf.mxu0  ;;  %v4738_v50 = vpop.f32.mrf.mxu1 }
 0x21a   : > { %v1631_v46 = vadd.f32 %v3707_v59, %v1506_v14  ;;  %v1736_v11 = vadd.f32 %v1735_v35, %v1610_v41 }
 0x21b   : > { %v1623_v6 = vpop.f32.mrf.mxu0  ;;  %v4740_v63 = vpop.f32.mrf.mxu1 }
 0x21c   : > { %v1624_v33 = vadd.f32 %v1623_v6, %v1500_v53  ;;  %v1760_v21 = vadd.f32 %v3727_v12, %v1631_v46 }
 0x21d   : > { %v3710_v34 = vpop.f32.mrf.mxu0  ;;  %v3764_v2 = vpop.f32.mrf.mxu1 }
 0x21e   : > { %v1645_v61 = vadd.f32 %v3710_v34, %v1518_v3  ;;  %v1752_v25 = vadd.f32 %v1751_v55, %v1624_v33 }
 0x21f   : > { %v1637_v20 = vpop.f32.mrf.mxu0  ;;  %v1991_v13 = vpop.f32.mrf.mxu1 }
 0x220   : > { %v1638_v4 = vadd.f32 %v1637_v20, %v1512_v24  ;;  %v1776_v23 = vadd.f32 %v3730_v57, %v1645_v61 }
 0x221   : > { %v3713_v60 = vpop.f32.mrf.mxu0  ;;  %v3767_v29 = vpop.f32.mrf.mxu1 }
 0x222   : > { %v1659_v26 = vadd.f32 %v3713_v60, %v1530_v10  ;;  %v1768_v51 = vadd.f32 %v1767_v1, %v1638_v4  ;;  %v2119_v10 = vld [vmem:[%s5001_s5 + $0x8] sm:$0xff] }
 0x223   : > { %v1651_v49 = vpop.f32.mrf.mxu0  ;;  %v2003_v8 = vpop.f32.mrf.mxu1 }
 0x224   : > { %v1652_v52 = vadd.f32 %v1651_v49, %v1524_v15  ;;  %v1792_v47 = vadd.f32 %v4738_v50, %v1659_v26 }
 0x225   : > { %v3744_v54 = vpop.f32.mrf.mxu0  ;;  %v3770_v16 = vpop.f32.mrf.mxu1 }
 0x226   : > { %v1881_v5 = vadd.f32 %v3744_v54, %v1744_v62  ;;  %v1784_v40 = vadd.f32 %v4740_v63, %v1652_v52 }
 0x227   : > { %v1874_v37 = vpop.f32.mrf.mxu0  ;;  %v2015_v12 = vpop.f32.mrf.mxu1 }
 0x228   : > { %v1998_v43 = vadd.f32 %v3764_v2, %v1881_v5  ;;  %v1875_v19 = vadd.f32 %v1874_v37, %v1736_v11 }
 0x229   : > { %v3747_v22 = vpop.f32.mrf.mxu0  ;;  %v3773_v1 = vpop.f32.mrf.mxu1 }
 0x22a   : > { %v2046_v27 = vmul.f32 0.01, %v1998_v43  ;;  %v1992_v45 = vadd.f32 %v1991_v13, %v1875_v19  ;;  %v1893_v36 = vadd.f32 %v3747_v22, %v1760_v21  ;;  %vm2038_vm2 = vcmp.ge.f32.partialorder %v1998_v43, 0.0  ;;  %v2118_v22 = vld [vmem:[%s5001_s5] sm:$0xff] }
 0x22b   : > { %v1886_v30 = vpop.f32.mrf.mxu0  ;;  %v2027_v63 = vpop.f32.mrf.mxu1 }
 0x22c   : > { %v2045_v35 = vmul.f32 0.01, %v1992_v45  ;;  %v2010_v44 = vadd.f32 %v3767_v29, %v1893_v36  ;;  %v1887_v48 = vadd.f32 %v1886_v30, %v1752_v25  ;;  %vm2037_vm3 = vcmp.ge.f32.partialorder %v1992_v45, 0.0 }
 0x22d   : > { %v3750_v56 = vpop.f32.mrf.mxu0  ;;  %v4743_v28 = vsel %vm2038_vm2, %v1998_v43, %v2046_v27  ;;  %v4797_v27 = vand.u32 4294901760, %v2118_v22 }
 0x22e   : > { %v2048_v55 = vmul.f32 0.01, %v2010_v44  ;;  %v2004_v58 = vadd.f32 %v2003_v8, %v1887_v48  ;;  %v1905_v59 = vadd.f32 %v3750_v56, %v1776_v23  ;;  %v4745_v31 = vsel %vm2037_vm3, %v1992_v45, %v2045_v35 }
 0x22f   : > { %v1898_v6 = vpop.f32.mrf.mxu0  ;;  %v2061_v57 = vmul.f32 %v4745_v31, %v4745_v31  ;;  %vm2040_vm5 = vcmp.ge.f32.partialorder %v2010_v44, 0.0  ;;  %v2062_v20 = vmul.f32 %v4743_v28, %v4743_v28  ;;  %v4804_v36 = vsub.f32 %v2118_v22, %v4797_v27 }
 0x230   : > { %v2047_v7 = vmul.f32 0.01, %v2004_v58  ;;  %v2022_v34 = vadd.f32 %v3770_v16, %v1905_v59  ;;  %v1899_v2 = vadd.f32 %v1898_v6, %v1768_v51  ;;  %vm2039_vm6 = vcmp.ge.f32.partialorder %v2004_v58, 0.0 }
 0x231   : > { %v3753_v18 = vpop.f32.mrf.mxu0  ;;  %v2070_v32 = vsel %vm2069_vm4, %v2061_v57, 0.0  ;;  %v4754_v13 = vsel %vm2040_vm5, %v2010_v44, %v2048_v55  ;;  %v2073_v49 = vsel %vm2069_vm4, %v2062_v20, 0.0  ;;  %v4788_v16 = vand.u32 4294901760, %v2119_v10 }
 0x232   : > { %v2050_v50 = vmul.f32 0.01, %v2022_v34  ;;  %v2016_v42 = vadd.f32 %v2015_v12, %v1899_v2  ;;  %v1917_v38 = vadd.f32 %v3753_v18, %v1792_v47  ;;  %2071 = vadd.xlane.f32.xlu0 %v2070_v32  ;;  %v4756_v39 = vsel %vm2039_vm6, %v2004_v58, %v2047_v7 }
 0x233   : > { %v1910_v60 = vpop.f32.mrf.mxu0  ;;  %v2063_v29 = vmul.f32 %v4756_v39, %v4756_v39  ;;  %vm2042_vm7 = vcmp.ge.f32.partialorder %v2022_v34, 0.0  ;;  %v2064_v46 = vmul.f32 %v4754_v13, %v4754_v13  ;;  %3774 = vmatprep.subr.mxu0 %v4788_v16  ;;  %v4795_v25 = vsub.f32 %v2119_v10, %v4788_v16 }
 0x234   : > { %v2049_v41 = vmul.f32 0.01, %v2016_v42  ;;  %v2034_v14 = vadd.f32 %v3773_v1, %v1917_v38  ;;  %v1911_v0 = vadd.f32 %v1910_v60, %v1784_v40  ;;  %vm2041_vm8 = vcmp.ge.f32.partialorder %v2016_v42, 0.0  ;;  %3775 = vmatpush3.msra.mxu0 %v4788_v16 }
 0x235   : > { %v2076_v53 = vsel %vm2069_vm4, %v2063_v29, 0.0  ;;  %v4766_v3 = vsel %vm2042_vm7, %v2022_v34, %v2050_v50  ;;  %v2079_v5 = vsel %vm2069_vm4, %v2064_v46, 0.0  ;;  %v4801_v45 = vand.u32 4294901760, %v4795_v25  ;;  %3776 = vmatprep.subr.mxu0 %v4797_v27 }
 0x236   : > { %v2052_v62 = vmul.f32 0.01, %v2034_v14  ;;  %v2028_v17 = vadd.f32 %v2027_v63, %v1911_v0  ;;  %2077 = vadd.xlane.f32.xlu1 %v2076_v53  ;;  %2074 = vadd.xlane.f32.xlu0 %v2073_v49  ;;  %v4764_v33 = vsel %vm2041_vm8, %v2016_v42, %v2049_v41  ;;  %vm2044_vm9 = vcmp.ge.f32.partialorder %v2034_v14, 0.0 }
 0x237   : > { %v2065_v8 = vmul.f32 %v4764_v33, %v4764_v33  ;;  %v2066_v9 = vmul.f32 %v4766_v3, %v4766_v3  ;;  %3777 = vmatpush3.msra.mxu0 %v4797_v27  ;;  %v2323_v26 = vsub.f32 %v4795_v25, %v4801_v45  ;;  %v4811_v15 = vand.u32 4294901760, %v4804_v36 }
 0x238   : > { %v2051_v54 = vmul.f32 0.01, %v2028_v17  ;;  %vm2043_vm10 = vcmp.ge.f32.partialorder %v2028_v17, 0.0  ;;  %v4776_v24 = vsel %vm2044_vm9, %v2034_v14, %v2052_v62  ;;  %3806 = vmatprep.subr.mxu0 %v4795_v25 }
 0x239   : > { %v2082_v11 = vsel %vm2069_vm4, %v2065_v8, 0.0  ;;  %v2085_v43 = vsel %vm2069_vm4, %v2066_v9, 0.0  ;;  %v2068_v21 = vmul.f32 %v4776_v24, %v4776_v24  ;;  %v2324_v30 = vand.u32 4294901760, %v2323_v26 }
 0x23a   : > { %2080 = vadd.xlane.f32.xlu1 %v2079_v5  ;;  %2083 = vadd.xlane.f32.xlu0 %v2082_v11  ;;  %v4774_v61 = vsel %vm2043_vm10, %v2028_v17, %v2051_v54  ;;  %v2330_v23 = vsub.f32 %v4804_v36, %v4811_v15 }
 0x23b   : > { %v2067_v37 = vmul.f32 %v4774_v61, %v4774_v61  ;;  %v2091_v4 = vsel %vm2069_vm4, %v2068_v21, 0.0  ;;  %3790 = vmatprep.subr.mxu1 %v2324_v30 }
 0x23c   : > { %v2331_v35 = vand.u32 4294901760, %v2330_v23  ;;  %3791 = vmatpush3.msra.mxu1 %v2324_v30 }
 0x23d   : > { %v2088_v19 = vsel %vm2069_vm4, %v2067_v37, 0.0 }
 0x23e   : > { %2086 = vadd.xlane.f32.xlu1 %v2085_v43  ;;  %2089 = vadd.xlane.f32.xlu0 %v2088_v19 }
 0x23f   : > { %3792 = vmatprep.subr.mxu1 %v2331_v35 }
 0x240   : > { %3793 = vmatpush3.msra.mxu1 %v2331_v35 }
 0x241   : > { %3822 = vmatprep.subr.mxu1 %v4788_v16 }
 0x242   : > { %2092 = vadd.xlane.f32.xlu1 %v2091_v4 }
 0x2bb   : > { %v2072_v44 = vpop.xlane.xlu0 %2071 }
 0x2bc   : > { %v2094_v48 = vmax.f32 %v2072_v44, 1e-24 }
 0x2be   : > { %3958 = vrsqrt.f32 %v2094_v48 }
 0x2bf   : > { %v2078_v52 = vpop.xlane.xlu1 %2077  ;;  %v2075_v12 = vpop.xlane.xlu0 %2074 }
 0x2c0   : > { %v2096_v56 = vmax.f32 %v2078_v52, 1e-24  ;;  %v2095_v51 = vmax.f32 %v2075_v12, 1e-24 }
 0x2c2   : > { %3960 = vrsqrt.f32 %v2096_v56 }
 0x2c3   : > { %3962 = vrsqrt.f32 %v2095_v51  ;;  %v2081_v55 = vpop.xlane.xlu1 %2080  ;;  %v2084_v58 = vpop.xlane.xlu0 %2083 }
 0x2c4   : > { %v2097_v59 = vmax.f32 %v2081_v55, 1e-24  ;;  %v2098_v6 = vmax.f32 %v2084_v58, 1e-24 }
 0x2c6   : > { %3964 = vrsqrt.f32 %v2097_v59 }
 0x2c7   : > { %3966 = vrsqrt.f32 %v2098_v6  ;;  %v2087_v47 = vpop.xlane.xlu1 %2086  ;;  %v2090_v57 = vpop.xlane.xlu0 %2089 }
 0x2c8   : > { %v2099_v7 = vmax.f32 %v2087_v47, 1e-24  ;;  %v2100_v34 = vmax.f32 %v2090_v57, 1e-24 }
 0x2ca   : > { %3968 = vrsqrt.f32 %v2099_v7 }
 0x2cb   : > { %v3959_v2 = vpop.eup %3958  ;;  %3970 = vrsqrt.f32 %v2100_v34  ;;  %v2093_v1 = vpop.xlane.xlu1 %2092 }
 0x2cc   : > { %v2101_v18 = vmax.f32 %v2093_v1, 1e-24  ;;  %v2110_v32 = vmul.f32 %v3959_v2, %v4745_v31 }
 0x2ce   : > { %3972 = vrsqrt.f32 %v2101_v18  ;;  %v2121_v40 = vsel %vm2069_vm4, %v2110_v32, 0 }
 0x2cf   : > { %v3961_v20 = vpop.eup %3960  ;;  %v4819_v50 = vand.u32 4294901760, %v2121_v40 }
 0x2d0   : > { %v3963_v42 = vpop.eup %3962  ;;  %v2112_v38 = vmul.f32 %v3961_v20, %v4756_v39 }
 0x2d1   : > { %3794 = vmatprep.mubr.f32.mxu1 %v4819_v50  ;;  %v2111_v60 = vmul.f32 %v3963_v42, %v4743_v28  ;;  %v4825_v29 = vsub.f32 %v2121_v40, %v4819_v50 }
 0x2d2   : > { %v2127_v41 = vsel %vm2069_vm4, %v2112_v38, 0 }
 0x2d3   : > { %v3965_v14 = vpop.eup %3964  ;;  %v2124_v31 = vsel %vm2069_vm4, %v2111_v60, 0  ;;  %v4829_v0 = vand.u32 4294901760, %v2127_v41  ;;  %v2213_v63 = vand.u32 4294901760, %v4825_v29 }
 0x2d4   : > { %v3967_v53 = vpop.eup %3966  ;;  %v4832_v49 = vand.u32 4294901760, %v2124_v31  ;;  %v2113_v39 = vmul.f32 %v3965_v14, %v4754_v13 }
 0x2d5   : > { %v2214_v28 = vsub.f32 %v4825_v29, %v2213_v63  ;;  %v2114_v46 = vmul.f32 %v3967_v53, %v4764_v33  ;;  %v4840_v62 = vsub.f32 %v2127_v41, %v4829_v0 }
 0x2d6   : > { %v4843_v17 = vsub.f32 %v2124_v31, %v4832_v49  ;;  %3795 = vmatmul.mubr.f32.vlgmr.msra.gmra.mxu1 %v4832_v49  ;;  %v2130_v8 = vsel %vm2069_vm4, %v2113_v39, 0 }
 0x2d7   : > { %v3969_v54 = vpop.eup %3968  ;;  %3797 = vmatprep.mubr.f32.mxu1 %v4829_v0  ;;  %v2215_v13 = vand.u32 4294901760, %v2214_v28  ;;  %v4848_v5 = vand.u32 4294901760, %v2130_v8  ;;  %v2133_v11 = vsel %vm2069_vm4, %v2114_v46, 0  ;;  %v2233_v33 = vand.u32 4294901760, %v4840_v62  ;;  %3823 = vmatpush3.msra.mxu1 %v4788_v16 }
 0x2d8   : > { %v3971_v9 = vpop.eup %3970  ;;  %v4853_v37 = vand.u32 4294901760, %v2133_v11  ;;  %v2223_v43 = vand.u32 4294901760, %v4843_v17  ;;  %v2115_v19 = vmul.f32 %v3969_v54, %v4766_v3  ;;  %3824 = vmatprep.subr.mxu1 %v4797_v27 }
 0x2d9   : > { %3778 = vmatprep.mubr.f32.mxu0 %v2215_v13  ;;  %v2234_v21 = vsub.f32 %v4840_v62, %v2233_v33  ;;  %v2116_v4 = vmul.f32 %v3971_v9, %v4774_v61  ;;  %v4861_v10 = vsub.f32 %v2130_v8, %v4848_v5  ;;  %3825 = vmatpush3.msra.mxu1 %v4797_v27 }
 0x2da   : > { %3798 = vmatmul.mubr.f32.gmra.mxu1 %v4848_v5  ;;  %v2224_v22 = vsub.f32 %v4843_v17, %v2223_v43  ;;  %v2136_v26 = vsel %vm2069_vm4, %v2115_v19, 0  ;;  %v2252_v3 = vsub.f32 %v2133_v11, %v4853_v37  ;;  %3854 = vmatprep.subr.mxu1 %v4788_v16 }
 0x2db   : > { %v3973_v30 = vpop.eup %3972  ;;  %3800 = vmatprep.mubr.f32.mxu1 %v4853_v37  ;;  %v4870_v23 = vand.u32 4294901760, %v2136_v26  ;;  %v2235_v61 = vand.u32 4294901760, %v2234_v21  ;;  %v2139_v35 = vsel %vm2069_vm4, %v2116_v4, 0  ;;  %v2243_v44 = vand.u32 4294901760, %v4861_v10 }
 0x2dc   : > { %v2225_v48 = vand.u32 4294901760, %v2224_v22  ;;  %v4874_v52 = vand.u32 4294901760, %v2139_v35  ;;  %v2117_v12 = vmul.f32 %v3973_v30, %v4776_v24  ;;  %v2253_v56 = vand.u32 4294901760, %v2252_v3 }
 0x2dd   : > { %v2244_v51 = vsub.f32 %v4861_v10, %v2243_v44  ;;  %v2262_v55 = vsub.f32 %v2136_v26, %v4870_v23 }
 0x2de   : > { %3779 = vmatmul.mubr.f32.vlgmr.msra.gmra.mxu0 %v2225_v48  ;;  %3801 = vmatmul.mubr.f32.gmra.mxu1 %v4870_v23  ;;  %v2142_v58 = vsel %vm2069_vm4, %v2117_v12, 0  ;;  %v2254_v59 = vsub.f32 %v2252_v3, %v2253_v56  ;;  %v2272_v6 = vsub.f32 %v2139_v35, %v4874_v52 }
 0x2df   : > { %3807 = vmatpush3.msra.mxu0 %v4795_v25  ;;  %3781 = vmatprep.mubr.f32.mxu0 %v2235_v61  ;;  %v2245_v47 = vand.u32 4294901760, %v2244_v51  ;;  %v2281_v57 = vand.u32 4294901760, %v2142_v58  ;;  %v2263_v7 = vand.u32 4294901760, %v2262_v55 }
 0x2e0   : > { %3803 = vmatprep.mubr.f32.mxu1 %v4874_v52  ;;  %v2255_v24 = vand.u32 4294901760, %v2254_v59  ;;  %3808 = vmatprep.subr.mxu0 %v4804_v36  ;;  %v2273_v34 = vand.u32 4294901760, %v2272_v6 }
 0x2e1   : > { %v2264_v2 = vsub.f32 %v2262_v55, %v2263_v7  ;;  %3809 = vmatpush3.msra.mxu0 %v4804_v36  ;;  %v2282_v1 = vsub.f32 %v2142_v58, %v2281_v57 }
 0x2e2   : > { %3782 = vmatmul.mubr.f32.gmra.mxu0 %v2245_v47  ;;  %3804 = vmatmul.mubr.f32.gmra.mxu1 %v2281_v57  ;;  %v2274_v18 = vsub.f32 %v2272_v6, %v2273_v34 }
 0x2e3   : > { %3784 = vmatprep.mubr.f32.mxu0 %v2255_v24  ;;  %3826 = vmatprep.mubr.f32.mxu1 %v2213_v63  ;;  %v2265_v25 = vand.u32 4294901760, %v2264_v2  ;;  %v2283_v32 = vand.u32 4294901760, %v2282_v1 }
 0x2e4   : > { %v2275_v40 = vand.u32 4294901760, %v2274_v18  ;;  %3838 = vmatprep.subr.mxu0 %v4801_v45 }
 0x2e5   : > { %v2284_v20 = vsub.f32 %v2282_v1, %v2283_v32 }
 0x2e6   : > { %3785 = vmatmul.mubr.f32.gmra.mxu0 %v2265_v25  ;;  %3827 = vmatmul.mubr.f32.vlgmr.msra.gmra.mxu1 %v2223_v43 }
 0x2e7   : > { %3787 = vmatprep.mubr.f32.mxu0 %v2275_v40  ;;  %3829 = vmatprep.mubr.f32.mxu1 %v2233_v33  ;;  %v2285_v42 = vand.u32 4294901760, %v2284_v20 }
 0x2e8   : > { %3855 = vmatpush3.msra.mxu1 %v4788_v16 }
 0x2e9   : > { %3856 = vmatprep.subr.mxu1 %v4797_v27 }
 0x2ea   : > { %3788 = vmatmul.mubr.f32.gmra.mxu0 %v2285_v42  ;;  %3830 = vmatmul.mubr.f32.gmra.mxu1 %v2243_v44 }
 0x2eb   : > { %3810 = vmatprep.mubr.f32.mxu0 %v4825_v29  ;;  %3832 = vmatprep.mubr.f32.mxu1 %v2253_v56 }
 0x2ec   : > { %3857 = vmatpush3.msra.mxu1 %v4797_v27 }
 0x2ee   : > { %3811 = vmatmul.mubr.f32.vlgmr.msra.gmra.mxu0 %v4843_v17  ;;  %3833 = vmatmul.mubr.f32.gmra.mxu1 %v2263_v7 }
 0x2ef   : > { %3839 = vmatpush3.msra.mxu0 %v4801_v45  ;;  %3813 = vmatprep.mubr.f32.mxu0 %v4840_v62 }
 0x2f0   : > { %3835 = vmatprep.mubr.f32.mxu1 %v2273_v34  ;;  %3840 = vmatprep.subr.mxu0 %v4811_v15 }
 0x2f1   : > { %3841 = vmatpush3.msra.mxu0 %v4811_v15 }
 0x2f2   : > { %3814 = vmatmul.mubr.f32.gmra.mxu0 %v4861_v10  ;;  %3836 = vmatmul.mubr.f32.gmra.mxu1 %v2283_v32 }
 0x2f3   : > { %3816 = vmatprep.mubr.f32.mxu0 %v2252_v3  ;;  %3858 = vmatprep.mubr.f32.mxu1 %v4819_v50 }
 0x2f6   : > { %3817 = vmatmul.mubr.f32.gmra.mxu0 %v2262_v55  ;;  %3859 = vmatmul.mubr.f32.vlgmr.msra.gmra.mxu1 %v4832_v49 }
 0x2f7   : > { %3819 = vmatprep.mubr.f32.mxu0 %v2272_v6  ;;  %3861 = vmatprep.mubr.f32.mxu1 %v4829_v0 }
 0x2fa   : > { %3820 = vmatmul.mubr.f32.gmra.mxu0 %v2282_v1  ;;  %3862 = vmatmul.mubr.f32.gmra.mxu1 %v4848_v5 }
 0x2fb   : > { %3842 = vmatprep.mubr.f32.mxu0 %v4819_v50  ;;  %3864 = vmatprep.mubr.f32.mxu1 %v4853_v37 }
 0x2fe   : > { %3843 = vmatmul.mubr.f32.vlgmr.msra.gmra.mxu0 %v4832_v49  ;;  %3865 = vmatmul.mubr.f32.gmra.mxu1 %v4870_v23 }
 0x2ff   : > { %3845 = vmatprep.mubr.f32.mxu0 %v4829_v0  ;;  %3867 = vmatprep.mubr.f32.mxu1 %v4874_v52 }
 0x302   : > { %3846 = vmatmul.mubr.f32.gmra.mxu0 %v4848_v5  ;;  %3868 = vmatmul.mubr.f32.gmra.mxu1 %v2281_v57 }
 0x303   : > { %3848 = vmatprep.mubr.f32.mxu0 %v4853_v37 }
 0x306   : > { %3849 = vmatmul.mubr.f32.gmra.mxu0 %v4870_v23 }
 0x307   : > { %3851 = vmatprep.mubr.f32.mxu0 %v4874_v52 }
 0x30a   : > { %3852 = vmatmul.mubr.f32.gmra.mxu0 %v2281_v57 }
 0x396   : > { %v3796_v16 = vpop.f32.mrf.mxu1 }
 0x398   : > { %v2368_v27 = vpop.f32.mrf.mxu1 }
 0x39a   : > { %v3799_v45 = vpop.f32.mrf.mxu1 }
 0x39c   : > { %v2380_v36 = vpop.f32.mrf.mxu1 }
 0x39e   : > { %v3780_v15 = vpop.f32.mrf.mxu0  ;;  %v3802_v50 = vpop.f32.mrf.mxu1 }
 0x39f   : > { %v2375_v19 = vadd.f32 %v3796_v16, %v3780_v15 }
 0x3a0   : > { %v2217_v38 = vpop.f32.mrf.mxu0  ;;  %v2392_v60 = vpop.f32.mrf.mxu1 }
 0x3a1   : > { %v2369_v10 = vadd.f32 %v2368_v27, %v2217_v38 }
 0x3a2   : > { %v3783_v29 = vpop.f32.mrf.mxu0  ;;  %v3805_v41 = vpop.f32.mrf.mxu1 }
 0x3a3   : > { %v2387_v30 = vadd.f32 %v3799_v45, %v3783_v29 }
 0x3a4   : > { %v2237_v14 = vpop.f32.mrf.mxu0  ;;  %v2404_v31 = vpop.f32.mrf.mxu1 }
 0x3a5   : > { %v2381_v35 = vadd.f32 %v2380_v36, %v2237_v14 }
 0x3a6   : > { %v3786_v0 = vpop.f32.mrf.mxu0  ;;  %v3828_v63 = vpop.f32.mrf.mxu1 }
 0x3a7   : > { %v2399_v56 = vadd.f32 %v3802_v50, %v3786_v0 }
 0x3a8   : > { %v2257_v53 = vpop.f32.mrf.mxu0  ;;  %v2610_v49 = vpop.f32.mrf.mxu1 }
 0x3a9   : > { %v2393_v59 = vadd.f32 %v2392_v60, %v2257_v53 }
 0x3aa   : > { %v3789_v39 = vpop.f32.mrf.mxu0  ;;  %v3831_v28 = vpop.f32.mrf.mxu1 }
 0x3ab   : > { %v2411_v34 = vadd.f32 %v3805_v41, %v3789_v39 }
 0x3ac   : > { %v2277_v46 = vpop.f32.mrf.mxu0  ;;  %v2626_v62 = vpop.f32.mrf.mxu1 }
 0x3ad   : > { %v2405_v20 = vadd.f32 %v2404_v31, %v2277_v46 }
 0x3ae   : > { %v3812_v17 = vpop.f32.mrf.mxu0  ;;  %v3834_v8 = vpop.f32.mrf.mxu1 }
 0x3af   : > { %v2494_v22 = vadd.f32 %v3812_v17, %v2375_v19 }
 0x3b0   : > { %v2486_v54 = vpop.f32.mrf.mxu0  ;;  %v2642_v13 = vpop.f32.mrf.mxu1 }
 0x3b1   : > { %v2487_v23 = vadd.f32 %v2486_v54, %v2369_v10  ;;  %v2619_v48 = vadd.f32 %v3828_v63, %v2494_v22 }
 0x3b2   : > { %v3815_v5 = vpop.f32.mrf.mxu0  ;;  %v3837_v11 = vpop.f32.mrf.mxu1 }
 0x3b3   : > { %v2508_v44 = vadd.f32 %v3815_v5, %v2387_v30  ;;  %v2611_v58 = vadd.f32 %v2610_v49, %v2487_v23 }
 0x3b4   : > { %v2500_v33 = vpop.f32.mrf.mxu0  ;;  %v4913_v9 = vpop.f32.mrf.mxu1 }
 0x3b5   : > { %v2501_v51 = vadd.f32 %v2500_v33, %v2381_v35  ;;  %v2635_v24 = vadd.f32 %v3831_v28, %v2508_v44 }
 0x3b6   : > { %v3818_v37 = vpop.f32.mrf.mxu0  ;;  %v3860_v43 = vpop.f32.mrf.mxu1 }
 0x3b7   : > { %v2522_v47 = vadd.f32 %v3818_v37, %v2399_v56  ;;  %v2627_v40 = vadd.f32 %v2626_v62, %v2501_v51 }
 0x3b8   : > { %v2514_v21 = vpop.f32.mrf.mxu0  ;;  %v2858_v4 = vpop.f32.mrf.mxu1 }
 0x3b9   : > { %v2515_v18 = vadd.f32 %v2514_v21, %v2393_v59  ;;  %v2651_v36 = vadd.f32 %v3834_v8, %v2522_v47 }
 0x3ba   : > { %v3821_v26 = vpop.f32.mrf.mxu0  ;;  %v3863_v3 = vpop.f32.mrf.mxu1 }
 0x3bb   : > { %v2536_v16 = vadd.f32 %v3821_v26, %v2411_v34  ;;  %v2643_v41 = vadd.f32 %v2642_v13, %v2515_v18 }
 0x3bc   : > { %v2528_v61 = vpop.f32.mrf.mxu0  ;;  %v2870_v52 = vpop.f32.mrf.mxu1 }
 0x3bd   : > { %v2529_v38 = vadd.f32 %v2528_v61, %v2405_v20  ;;  %v2667_v63 = vadd.f32 %v3837_v11, %v2536_v16 }
 0x3be   : > { %v3844_v12 = vpop.f32.mrf.mxu0  ;;  %v3866_v2 = vpop.f32.mrf.mxu1 }
 0x3bf   : > { %v2750_v55 = vadd.f32 %v3844_v12, %v2619_v48  ;;  %v2659_v46 = vadd.f32 %v4913_v9, %v2529_v38 }
 0x3c0   : > { %v2743_v6 = vpop.f32.mrf.mxu0  ;;  %v2882_v15 = vpop.f32.mrf.mxu1 }
 0x3c1   : > { %v2865_v57 = vadd.f32 %v3860_v43, %v2750_v55  ;;  %v2744_v7 = vadd.f32 %v2743_v6, %v2611_v58 }
 0x3c2   : > { %v3847_v1 = vpop.f32.mrf.mxu0  ;;  %v3869_v53 = vpop.f32.mrf.mxu1 }
 0x3c3   : > { %2906 = vst.msk [vmem:[%s4916_s21 + $0x8] sm:$0xff] %vm2904_vm11, %v2865_v57  ;;  %v2859_v25 = vadd.f32 %v2858_v4, %v2744_v7  ;;  %v2762_v32 = vadd.f32 %v3847_v1, %v2635_v24 }
 0x3c4   : > { %v2755_v42 = vpop.f32.mrf.mxu0  ;;  %v2894_v54 = vpop.f32.mrf.mxu1 }
 0x3c5   : > { %2905 = vst.msk [vmem:[%s4916_s21] sm:$0xff] %vm2904_vm11, %v2859_v25  ;;  %v2877_v27 = vadd.f32 %v3863_v3, %v2762_v32  ;;  %v2756_v45 = vadd.f32 %v2755_v42, %v2627_v40 }
 0x3c6   : > { %v3850_v50 = vpop.f32.mrf.mxu0 }
 0x3c7   : > { %2908 = vst.msk [vmem:[%s4916_s21 + $0x18] sm:$0xff] %vm2904_vm11, %v2877_v27  ;;  %v2871_v60 = vadd.f32 %v2870_v52, %v2756_v45  ;;  %v2774_v29 = vadd.f32 %v3850_v50, %v2651_v36 }
 0x3c8   : > { %v2767_v14 = vpop.f32.mrf.mxu0 }
 0x3c9   : > { %2907 = vst.msk [vmem:[%s4916_s21 + $0x10] sm:$0xff] %vm2904_vm11, %v2871_v60  ;;  %v2889_v31 = vadd.f32 %v3866_v2, %v2774_v29  ;;  %v2768_v0 = vadd.f32 %v2767_v14, %v2643_v41 }
 0x3ca   : > { %v3853_v49 = vpop.f32.mrf.mxu0 }
 0x3cb   : > { %2910 = vst.msk [vmem:[%s4916_s21 + $0x28] sm:$0xff] %vm2904_vm11, %v2889_v31  ;;  %v2883_v39 = vadd.f32 %v2882_v15, %v2768_v0  ;;  %v2786_v28 = vadd.f32 %v3853_v49, %v2667_v63 }
 0x3cc   : > { %v2779_v62 = vpop.f32.mrf.mxu0 }
 0x3cd   : > { %2909 = vst.msk [vmem:[%s4916_s21 + $0x20] sm:$0xff] %vm2904_vm11, %v2883_v39  ;;  %v2901_v17 = vadd.f32 %v3869_v53, %v2786_v28  ;;  %v2780_v8 = vadd.f32 %v2779_v62, %v2659_v46  ;;  %2919 = sbr.rel (!%p4122_p4) target bundleno = 1017 (0x3f9), region = 48 }
 0x3cf   : > { %2912 = vst.msk [vmem:[%s4916_s21 + $0x38] sm:$0xff] %vm2904_vm11, %v2901_v17  ;;  %v2895_v13 = vadd.f32 %v2894_v54, %v2780_v8 }
 0x3d1   : > { %2911 = vst.msk [vmem:[%s4916_s21 + $0x30] sm:$0xff] %vm2904_vm11, %v2895_v13 }
 0x3d2   : > { %s5011_s20 = smov (!%p2922_p8, %s2921_s20), 8 }
 0x3d3   : > { %s3168_s7 = sshll.u32 %s5011_s20, 7 }
 0x3d4   : > { %p3171_p9 = scmp.eq.s32.totalorder %s3168_s7, 0 }
 0x3d5   : > { %s4948_s8 = sshrl.u32 (!%p3171_p9), %s5011_s20, 3 }
 0x3d6   : > { %2930 = sbr.rel (%p3171_p9) target bundleno = 1017 (0x3f9), region = 52  ;;  %p3172_p10 = scmp.le.s32.totalorder (!%p3171_p9), %s4948_s8, 0 }
 0x3db   : > { %3113 = sbr.rel (%p3172_p10) target bundleno = 1000 (0x3e8), region = 128  ;;  %s5004_s24 = smov (!%p3172_p10), %s4942_s30 }
 0x3dc   : > { %s5005_s29 = smov (!%p3172_p10), %s4916_s21  ;;  %s4957_s12 = smov (!%p3172_p10), 0  }
 0x3dd   : > { %s4959_s9 = smov (!%p3172_p10), 0  }
 0x3e0 LB: >> { %v3007_v5 = vld [vmem:[%s4036_s29] sm:$0xff]  ;;  %v3009_v11 = vld [vmem:[%s4036_s29 + $0x8] sm:$0xff]  ;;  %v3011_v33 = vld [vmem:[%s4036_s29 + $0x10] sm:$0xff]  ;;  %s3023_s10 = sadd.s32 1, %s4040_s12  ;;  %s3001_s9 = sadd.s32 1, %s4044_s9   ;;  %s4044_s9 = sphi %s4959_s9, %s3001_s9   ;;  %s4040_s12 = sphi %s4957_s12, %s5006_s12   ;;  %s4036_s29 = sphi %s5005_s29, %s3028_s29   ;;  %s4032_s24 = sphi %s5004_s24, %s3029_s24  }
 0x3e1   : >> { %3008 = vst [vmem:[%s4032_s24] sm:$0xff] %v3007_v5  ;;  %3010 = vst [vmem:[%s4032_s24 + $0x8] sm:$0xff] %v3009_v11  ;;  %v3013_v9 = vld [vmem:[%s4036_s29 + $0x18] sm:$0xff]  ;;  %v3015_v37 = vld [vmem:[%s4036_s29 + $0x20] sm:$0xff]  ;;  %p3024_p11 = scmp.ge.s32.totalorder %s3023_s10, %s4948_s8  ;;  %p3000_p12 = scmp.ge.s32.totalorder %s3001_s9, %s4948_s8 }
 0x3e2   : >> { %3012 = vst [vmem:[%s4032_s24 + $0x10] sm:$0xff] %v3011_v33  ;;  %v3017_v43 = vld [vmem:[%s4036_s29 + $0x28] sm:$0xff]  ;;  %3014 = vst [vmem:[%s4032_s24 + $0x18] sm:$0xff] %v3013_v9  ;;  %v3019_v19 = vld [vmem:[%s4036_s29 + $0x30] sm:$0xff] }
 0x3e3   : >> { %3016 = vst [vmem:[%s4032_s24 + $0x20] sm:$0xff] %v3015_v37  ;;  %3018 = vst [vmem:[%s4032_s24 + $0x28] sm:$0xff] %v3017_v43  ;;  %v3021_v21 = vld [vmem:[%s4036_s29 + $0x38] sm:$0xff]  ;;  %s5013_s10 = smov (%p3024_p11, %s3023_s10), 0  ;;  %3003 = sbr.rel (!%p3000_p12) target bundleno = 992 (0x3e0), region = 134 }
 0x3e4   : >> { %3020 = vst [vmem:[%s4032_s24 + $0x30] sm:$0xff] %v3019_v19  ;;  %3022 = vst [vmem:[%s4032_s24 + $0x38] sm:$0xff] %v3021_v21  ;;  %s3173_s11 = sshll.u32 %s5013_s10, 6  ;;  %s5006_s12 = smov %s5013_s10 }
 0x3e5   : >> { %s3028_s29 = scalar_lea.vmem %s4916_s21, %s3173_s11 [#allocation2]   ;;  %s3029_s24 = scalar_lea.vmem %s4942_s30, %s3173_s11  }
 0x3e8 PF: > { %s4978_s13 = sand.u32 7, %s5011_s20   ;;  %s3184_s14 = sshll.u32 %s4948_s8, 6 }
 0x3e9   : > { %s3034_s15 = scalar_lea.vmem %s4916_s21, %s3184_s14 [#allocation2]   ;;  %s3036_s16 = scalar_lea.vmem %s4942_s30, %s3184_s14  }
 0x3ea   : > { %p3178_p13 = scmp.le.s32.totalorder %s4978_s13, 0 }
 0x3eb   : > { %s4046_s17 = smov (!%p3178_p13), %s3036_s16   ;;  %s4050_s18 = smov (!%p3178_p13), %s3034_s15  }
 0x3ec   : > { %3127 = sbr.rel (%p3178_p13) target bundleno = 1017 (0x3f9), region = 139  ;;  %s4054_s19 = smov (!%p3178_p13), 0  }
 0x3ed   : > { %s4058_s23 = smov (!%p3178_p13), 0  }
 0x3f1 LB: >> { %v3046_v4 = vld [vmem:[%s4052_s18] sm:$0xff]  ;;  %s3048_s20 = sadd.s32 1, %s4056_s19  ;;  %s3040_s23 = sadd.s32 1, %s4060_s23   ;;  %s4060_s23 = sphi %s4058_s23, %s3040_s23   ;;  %s4056_s19 = sphi %s4054_s19, %s4055_s19   ;;  %s4052_s18 = sphi %s4050_s18, %s3053_s18   ;;  %s4048_s17 = sphi %s4046_s17, %s3054_s17  }
 0x3f2   : >> { %3047 = vst [vmem:[%s4048_s17] sm:$0xff] %v3046_v4  ;;  %p3049_p0 = scmp.ge.s32.totalorder %s3048_s20, %s4978_s13  ;;  %p3039_p1 = scmp.ge.s32.totalorder %s3040_s23, %s4978_s13 }
 0x3f4   : >> { %s5015_s20 = smov (%p3049_p0, %s3048_s20), 0  ;;  %3042 = sbr.rel (!%p3039_p1) target bundleno = 1009 (0x3f1), region = 145 }
 0x3f5   : >> { %s3179_s21 = sshll.u32 %s5015_s20, 3  ;;  %s4055_s19 = smov %s5015_s20  }
 0x3f6   : >> { %s3053_s18 = scalar_lea.vmem %s3034_s15, %s3179_s21 [#allocation2]   ;;  %s3054_s17 = scalar_lea.vmem %s3036_s16, %s3179_s21  }
 0x3f9 PF: > { %p13_p2 = scmp.ge.s32.totalorder %s4112_s25, 6   ;;  %s5007_s21 = smov %s4024_s22 }
 0x3fa   : > { %s5008_s22 = smov %s4120_s28  ;;  %s5009_s23 = smov %s4112_s25 }
 0x3fb   :  { %15 = sbr.rel (!%p13_p2) target bundleno = 2 (0x2), region = 156 }

</bundles_post_ra>
